<compile_context>
chip_gen: v5e
topology: v5e:2x2
jax: 0.10.0
libtpu: 0.0.40
codegen_flags: <defaults>
</compile_context>

<pallas_src>
import functools
import math

import jax
import jax.numpy as jnp
from jax import lax
from jax.experimental import pallas as pl
from jax.experimental.pallas import tpu as pltpu


# ----------------------------------------------------------------------------
# Helpers: tile selection / padding / VMEM budget
# ----------------------------------------------------------------------------
def _round_up(x, m):
    return ((x + m - 1) // m) * m


def _sublane_tile(dim, target):
    """Tile for a second-to-last (sublane) block dim: multiple of 8, or full."""
    for c in (target, 512, 256, 128, 64, 32, 16, 8):
        if c <= target and c <= dim and dim % c == 0:
            return c
    return dim


def _lane_tile(dim, target):
    """Tile for a last (lane) block dim: multiple of 128, or the full axis."""
    if dim <= target:
        return dim
    for c in (target, 512, 256, 128):
        if c <= target and dim % c == 0:
            return c
    return dim


def _vmem_limit_bytes():
    # Per-generation scoped VMEM: ~48 MiB on v7x (64 MiB physical per TC),
    # ~96 MiB on v5e/v6e (128 MiB physical).
    try:
        cap = pltpu.get_tpu_info().vmem_capacity_bytes
    except Exception:
        cap = 64 * 1024 * 1024
    return int(min(cap * 3 // 4, 100 * 1024 * 1024))


_VMEM_LIMIT = _vmem_limit_bytes()


# ----------------------------------------------------------------------------
# Kernel 1: tiled Linear (+ optional ReLU), f32 accumulator over K.
# ----------------------------------------------------------------------------
def _matmul_kernel(x_ref, w_ref, b_ref, o_ref, acc_ref, *, relu, mxu_dtype):
    @pl.when(pl.program_id(2) == 0)
    def _():
        acc_ref[...] = jnp.zeros_like(acc_ref)

    acc_ref[...] += jnp.dot(x_ref[...].astype(mxu_dtype),
                            w_ref[...].astype(mxu_dtype),
                            preferred_element_type=jnp.float32)

    @pl.when(pl.program_id(2) == pl.num_programs(2) - 1)
    def _():
        y = acc_ref[...] + b_ref[...].astype(jnp.float32)
        if relu:
            y = jnp.maximum(y, 0.0)
        o_ref[...] = y.astype(o_ref.dtype)


def tiled_linear(x, w, b, *, out_dtype=None, relu=False, tm=512, tk=512,
                 mxu_dtype=jnp.bfloat16):
    M, K = x.shape
    N = w.shape[1]
    out_dtype = x.dtype if out_dtype is None else out_dtype
    tm = _sublane_tile(M, tm)
    tk = _lane_tile(K, tk)
    # Full-width N tile: activations are streamed from HBM exactly once.
    tn = _lane_tile(N, 2048)
    grid = (M // tm, N // tn, K // tk)
    return pl.pallas_call(
        functools.partial(_matmul_kernel, relu=relu, mxu_dtype=mxu_dtype),
        grid=grid,
        in_specs=[
            pl.BlockSpec((tm, tk), lambda i, j, k: (i, k)),
            pl.BlockSpec((tk, tn), lambda i, j, k: (k, j)),
            pl.BlockSpec((1, tn), lambda i, j, k: (0, j)),
        ],
        out_specs=pl.BlockSpec((tm, tn), lambda i, j, k: (i, j)),
        out_shape=jax.ShapeDtypeStruct((M, N), out_dtype),
        scratch_shapes=[pltpu.VMEM((tm, tn), jnp.float32)],
        compiler_params=pltpu.CompilerParams(
            dimension_semantics=("parallel", "parallel", "arbitrary"),
            vmem_limit_bytes=_VMEM_LIMIT),
    )(x, w, b.reshape(1, N))


# ----------------------------------------------------------------------------
# Kernel 2: Linformer K/V projection.
#   Per (batch, Kp-tile):  X_p = P^T @ X  (accumulated over S tiles, f32 acc)
#                          K_p = X_p @ Wk + colsum(P) ⊗ bk
#                          V_p = X_p @ Wv + colsum(P) ⊗ bv
# ----------------------------------------------------------------------------
def _kv_project_kernel(x_ref, pt_ref, cp_ref, wk_ref, bk_ref, wv_ref, bv_ref,
                       kp_ref, vp_ref, acc_ref, *, mxu_dtype):
    s = pl.program_id(2)

    @pl.when(s == 0)
    def _():
        acc_ref[...] = jnp.zeros_like(acc_ref)

    # Standard (tkp, ts) x (ts, D) dot — projector is already transposed.
    acc_ref[...] += jnp.dot(pt_ref[...].astype(mxu_dtype),
                            x_ref[...].astype(mxu_dtype),
                            preferred_element_type=jnp.float32)

    @pl.when(s == pl.num_programs(2) - 1)
    def _():
        xp = acc_ref[...].astype(mxu_dtype)
        cp = cp_ref[...].astype(jnp.float32)            # (tkp, 1)
        kp = jnp.dot(xp, wk_ref[...].astype(mxu_dtype),
                     preferred_element_type=jnp.float32)
        kp = kp + cp * bk_ref[...].astype(jnp.float32)  # rank-1 bias correction
        vp = jnp.dot(xp, wv_ref[...].astype(mxu_dtype),
                     preferred_element_type=jnp.float32)
        vp = vp + cp * bv_ref[...].astype(jnp.float32)
        kp_ref[...] = kp.astype(kp_ref.dtype)
        vp_ref[...] = vp.astype(vp_ref.dtype)


def project_kv(emb, projector_t, colsum, wk, bk, wv, bv, *, out_dtype,
               ts=512, tkp=128, mxu_dtype=jnp.bfloat16):
    B, S, D = emb.shape
    Kp = projector_t.shape[0]
    ts = _lane_tile(S, ts)              # lane dim of the P^T tile
    tkp = _sublane_tile(Kp, tkp)        # parallel Kp-tile axis (megacore/2-TC)
    grid = (B, Kp // tkp, S // ts)
    kp, vp = pl.pallas_call(
        functools.partial(_kv_project_kernel, mxu_dtype=mxu_dtype),
        grid=grid,
        in_specs=[
            pl.BlockSpec((None, ts, D), lambda b, kpi, s: (b, s, 0)),   # emb
            pl.BlockSpec((tkp, ts), lambda b, kpi, s: (kpi, s)),        # P^T
            pl.BlockSpec((tkp, 1), lambda b, kpi, s: (kpi, 0)),         # colsum
            pl.BlockSpec((D, D), lambda b, kpi, s: (0, 0)),             # Wk
            pl.BlockSpec((1, D), lambda b, kpi, s: (0, 0)),             # bk
            pl.BlockSpec((D, D), lambda b, kpi, s: (0, 0)),             # Wv
            pl.BlockSpec((1, D), lambda b, kpi, s: (0, 0)),             # bv
        ],
        out_specs=[
            pl.BlockSpec((None, tkp, D), lambda b, kpi, s: (b, kpi, 0)),
            pl.BlockSpec((None, tkp, D), lambda b, kpi, s: (b, kpi, 0)),
        ],
        out_shape=[
            jax.ShapeDtypeStruct((B, Kp, D), out_dtype),
            jax.ShapeDtypeStruct((B, Kp, D), out_dtype),
        ],
        scratch_shapes=[pltpu.VMEM((tkp, D), jnp.float32)],
        compiler_params=pltpu.CompilerParams(
            dimension_semantics=("parallel", "parallel", "arbitrary"),
            vmem_limit_bytes=_VMEM_LIMIT),
    )(emb, projector_t, colsum, wk, bk.reshape(1, D), wv, bv.reshape(1, D))
    return kp, vp


# ----------------------------------------------------------------------------
# Kernel 3: attention (all heads) + output projection + add&LayerNorm (pp1).
#   grid = (B, S // tq); output written lane-dense in (B, S, D) layout.
# ----------------------------------------------------------------------------
def _attn_out_ln_kernel(q_ref, kp_ref, vp_ref, m_ref, res_ref,
                        wo_ref, bo_ref, g_ref, beta_ref, o_ref,
                        *, n_head, scale, eps, mxu_dtype):
    q = q_ref[...]                       # (tq, D)
    kp = kp_ref[...]                     # (Kp, D)
    vp = vp_ref[...]                     # (Kp, D)
    # additive mask: 0 where keep, -1e9 where masked (also kills Kp padding)
    mask_bias = (m_ref[...].astype(jnp.float32) - 1.0) * 1e9    # (tq, Kp)

    D = q.shape[-1]
    dh = D // n_head
    dn_hd = (((1,), (1,)), ((), ()))      # contract over the head dim

    ctx_parts = []
    for h in range(n_head):
        sl = slice(h * dh, (h + 1) * dh)
        q_h = q[:, sl].astype(mxu_dtype)          # (tq, dh)
        k_h = kp[:, sl].astype(mxu_dtype)         # (Kp, dh)
        v_h = vp[:, sl].astype(mxu_dtype)         # (Kp, dh)

        scores = lax.dot_general(q_h, k_h, dn_hd,
                                 preferred_element_type=jnp.float32)
        scores = scores * scale + mask_bias       # (tq, Kp)

        s_max = jnp.max(scores, axis=-1, keepdims=True)
        e = jnp.exp(scores - s_max)
        p_attn = e * pl.reciprocal(jnp.sum(e, axis=-1, keepdims=True),
                                   approx=True)

        o_h = jnp.dot(p_attn.astype(mxu_dtype), v_h,
                      preferred_element_type=jnp.float32)       # (tq, dh)
        ctx_parts.append(o_h)

    # Head-concat then ONE full-depth (K = D) output projection on the MXU.
    ctx = jnp.concatenate(ctx_parts, axis=-1)                    # (tq, D) f32
    attn = jnp.dot(ctx.astype(mxu_dtype), wo_ref[...].astype(mxu_dtype),
                   preferred_element_type=jnp.float32)
    attn = attn + bo_ref[...].astype(jnp.float32)

    # pp1: LayerNorm(residual + attn)
    z = res_ref[...].astype(jnp.float32) + attn
    mean = jnp.mean(z, axis=-1, keepdims=True)
    var = jnp.mean(jnp.square(z - mean), axis=-1, keepdims=True)
    zn = (z - mean) * lax.rsqrt(var + eps)
    o_ref[...] = (zn * g_ref[...] + beta_ref[...]).astype(o_ref.dtype)


def attention_block(q, kp, vp, mask, residual, wo, bo, gamma, beta, *,
                    n_head, scale, eps=1e-5, out_dtype=None, tq=128,
                    mxu_dtype=jnp.bfloat16):
    B, S, D = q.shape
    Kp = kp.shape[1]
    out_dtype = q.dtype if out_dtype is None else out_dtype
    tq = _sublane_tile(S, tq)
    grid = (B, S // tq)
    return pl.pallas_call(
        functools.partial(_attn_out_ln_kernel, n_head=n_head, scale=scale,
                          eps=eps, mxu_dtype=mxu_dtype),
        grid=grid,
        in_specs=[
            pl.BlockSpec((None, tq, D), lambda b, i: (b, i, 0)),   # Q
            pl.BlockSpec((None, Kp, D), lambda b, i: (b, 0, 0)),   # K_p
            pl.BlockSpec((None, Kp, D), lambda b, i: (b, 0, 0)),   # V_p
            pl.BlockSpec((None, tq, Kp), lambda b, i: (b, i, 0)),  # mask
            pl.BlockSpec((None, tq, D), lambda b, i: (b, i, 0)),   # residual
            pl.BlockSpec((D, D), lambda b, i: (0, 0)),             # Wo
            pl.BlockSpec((1, D), lambda b, i: (0, 0)),             # bo
            pl.BlockSpec((1, D), lambda b, i: (0, 0)),             # ln gamma
            pl.BlockSpec((1, D), lambda b, i: (0, 0)),             # ln beta
        ],
        out_specs=pl.BlockSpec((None, tq, D), lambda b, i: (b, i, 0)),
        out_shape=jax.ShapeDtypeStruct((B, S, D), out_dtype),
        compiler_params=pltpu.CompilerParams(
            dimension_semantics=("parallel", "parallel"),
            vmem_limit_bytes=_VMEM_LIMIT),
    )(q, kp, vp, mask, residual, wo, bo.reshape(1, D), gamma.reshape(1, D),
      beta.reshape(1, D))


# ----------------------------------------------------------------------------
# Kernel 4: fused PositionwiseFFN + add&LayerNorm (pp2).
#   grid = (M // tm, d_ff // tf); the (M, d_ff) intermediate never hits HBM.
# ----------------------------------------------------------------------------
def _ffn_ln_kernel(x_ref, w1_ref, b1_ref, w2_ref, b2_ref, g_ref, beta_ref,
                   o_ref, acc_ref, *, eps, mxu_dtype):
    f = pl.program_id(1)

    @pl.when(f == 0)
    def _():
        acc_ref[...] = jnp.zeros_like(acc_ref)

    x = x_ref[...]
    h = jnp.dot(x.astype(mxu_dtype), w1_ref[...].astype(mxu_dtype),
                preferred_element_type=jnp.float32)
    h = jnp.maximum(h + b1_ref[...].astype(jnp.float32), 0.0)
    acc_ref[...] += jnp.dot(h.astype(mxu_dtype), w2_ref[...].astype(mxu_dtype),
                            preferred_element_type=jnp.float32)

    @pl.when(f == pl.num_programs(1) - 1)
    def _():
        z = acc_ref[...] + b2_ref[...].astype(jnp.float32)
        y = x_ref[...].astype(jnp.float32) + z           # residual = FFN input
        mean = jnp.mean(y, axis=-1, keepdims=True)
        var = jnp.mean(jnp.square(y - mean), axis=-1, keepdims=True)
        yn = (y - mean) * lax.rsqrt(var + eps)
        o_ref[...] = (yn * g_ref[...] + beta_ref[...]).astype(o_ref.dtype)


def ffn_block(x, w1, b1, w2, b2, gamma, beta, *, eps=1e-5, out_dtype=None,
              tm=512, tf=512, mxu_dtype=jnp.bfloat16):
    M, D = x.shape
    d_ff = w1.shape[1]
    out_dtype = x.dtype if out_dtype is None else out_dtype

    # When d_ff gets tiled, pad it to a lane-dense multiple of 128.  Exact:
    # relu(0 + 0) @ 0 contributes nothing to the accumulator.
    if d_ff > tf:
        d_ff_pad = _round_up(d_ff, 128)
        if d_ff_pad != d_ff:
            w1 = jnp.pad(w1, ((0, 0), (0, d_ff_pad - d_ff)))
            b1 = jnp.pad(b1, (0, d_ff_pad - d_ff))
            w2 = jnp.pad(w2, ((0, d_ff_pad - d_ff), (0, 0)))
            d_ff = d_ff_pad

    tm = _sublane_tile(M, tm)            # big row tile -> W1/W2 reuse
    tf = _lane_tile(d_ff, tf)
    grid = (M // tm, d_ff // tf)
    return pl.pallas_call(
        functools.partial(_ffn_ln_kernel, eps=eps, mxu_dtype=mxu_dtype),
        grid=grid,
        in_specs=[
            pl.BlockSpec((tm, D), lambda i, f: (i, 0)),     # x (also residual)
            pl.BlockSpec((D, tf), lambda i, f: (0, f)),     # W1 tile
            pl.BlockSpec((1, tf), lambda i, f: (0, f)),     # b1 tile
            pl.BlockSpec((tf, D), lambda i, f: (f, 0)),     # W2 tile
            pl.BlockSpec((1, D), lambda i, f: (0, 0)),      # b2
            pl.BlockSpec((1, D), lambda i, f: (0, 0)),      # ln gamma
            pl.BlockSpec((1, D), lambda i, f: (0, 0)),      # ln beta
        ],
        out_specs=pl.BlockSpec((tm, D), lambda i, f: (i, 0)),
        out_shape=jax.ShapeDtypeStruct((M, D), out_dtype),
        scratch_shapes=[pltpu.VMEM((tm, D), jnp.float32)],
        compiler_params=pltpu.CompilerParams(
            dimension_semantics=("parallel", "arbitrary"),
            vmem_limit_bytes=_VMEM_LIMIT),
    )(x, w1, b1.reshape(1, d_ff), w2, b2.reshape(1, D), gamma.reshape(1, D),
      beta.reshape(1, D))


# ----------------------------------------------------------------------------
# Parameter init (deterministic, PyTorch nn.Linear-style uniform init)
# ----------------------------------------------------------------------------
def init_params(key, d_model, d_ff):
    def lin_init(k, fan_in, fan_out):
        bound = 1.0 / math.sqrt(fan_in)
        kw, kb = jax.random.split(k)
        w = jax.random.uniform(kw, (fan_in, fan_out), jnp.float32, -bound, bound)
        b = jax.random.uniform(kb, (fan_out,), jnp.float32, -bound, bound)
        return w, b

    ks = jax.random.split(key, 6)
    p = {}
    p["wq"], p["bq"] = lin_init(ks[0], d_model, d_model)
    p["wk"], p["bk"] = lin_init(ks[1], d_model, d_model)
    p["wv"], p["bv"] = lin_init(ks[2], d_model, d_model)
    p["wo"], p["bo"] = lin_init(ks[3], d_model, d_model)
    p["w1"], p["b1"] = lin_init(ks[4], d_model, d_ff)
    p["w2"], p["b2"] = lin_init(ks[5], d_ff, d_model)
    p["ln1_g"] = jnp.ones((d_model,), jnp.float32)
    p["ln1_b"] = jnp.zeros((d_model,), jnp.float32)
    p["ln2_g"] = jnp.ones((d_model,), jnp.float32)
    p["ln2_b"] = jnp.zeros((d_model,), jnp.float32)
    return p


# ----------------------------------------------------------------------------
# EncoderLayer.forward
# ----------------------------------------------------------------------------
def encoder_layer_forward(params, emb, mask_m, projector, n_head,
                          compute_dtype=jnp.bfloat16, eps=1e-5):
    """compute_dtype: MXU input / inter-kernel activation dtype (bf16 default).
    Accumulation, softmax and LayerNorm math stay f32; the rank-1 bias
    correction and all zero-padding below are mathematically exact."""
    B, S, D = emb.shape
    Kp = projector.shape[1]
    out_dtype = emb.dtype
    mxu_dtype = compute_dtype
    scale = 1.0 / math.sqrt(D)     # ScaledDotProductAttention(d_model)

    # --- exact zero-padding for predictable, lane/sublane-dense tiles -------
    S_pad = _round_up(S, 128) if S > 128 else _round_up(S, 8)
    Kp_pad = _round_up(Kp, 128)

    emb_p = jnp.pad(emb, ((0, 0), (0, S_pad - S), (0, 0)))
    proj_p = jnp.pad(projector.astype(jnp.float32),
                     ((0, S_pad - S), (0, Kp_pad - Kp)))
    # mask: padded Kp columns are 0 (= masked out), padded S rows harmless.
    mask = jnp.pad(mask_m[:, 0].astype(jnp.float32),
                   ((0, 0), (0, S_pad - S), (0, Kp_pad - Kp)))

    proj_t = proj_p.T.astype(compute_dtype)               # (Kp_pad, S_pad)
    colsum = jnp.sum(proj_p, axis=0).reshape(Kp_pad, 1)   # rank-1 bias corr.

    emb_c = emb_p.astype(compute_dtype)
    wq = params["wq"].astype(compute_dtype)
    wk = params["wk"].astype(compute_dtype)
    wv = params["wv"].astype(compute_dtype)
    wo = params["wo"].astype(compute_dtype)
    w1 = params["w1"].astype(compute_dtype)
    w2 = params["w2"].astype(compute_dtype)

    # 1) Q projection: the only full (B*S, D) x (D, D) linear needed.
    q = tiled_linear(emb_c.reshape(B * S_pad, D), wq, params["bq"],
                     out_dtype=compute_dtype, mxu_dtype=mxu_dtype)
    q = q.reshape(B, S_pad, D)

    # 2) Linformer K/V: project the sequence axis first (Kp << S FLOPs).
    kp, vp = project_kv(emb_c, proj_t, colsum, wk, params["bk"],
                        wv, params["bv"], out_dtype=compute_dtype,
                        mxu_dtype=mxu_dtype)

    # 3) Attention (all heads) + Wo + pp1 add&LN, one fused kernel.
    out1 = attention_block(q, kp, vp, mask, emb_p, wo, params["bo"],
                           params["ln1_g"], params["ln1_b"],
                           n_head=n_head, scale=scale, eps=eps,
                           out_dtype=compute_dtype, mxu_dtype=mxu_dtype)

    # 4) FFN (Linear->ReLU->Linear) + pp2 add&LN, one fused kernel.
    out2 = ffn_block(out1.reshape(B * S_pad, D), w1, params["b1"],
                     w2, params["b2"], params["ln2_g"], params["ln2_b"],
                     eps=eps, out_dtype=out_dtype, mxu_dtype=mxu_dtype)
    return out2.reshape(B, S_pad, D)[:, :S, :]


# ----------------------------------------------------------------------------
# Pure-JAX reference (mirrors the PyTorch module structure) for validation.
# ----------------------------------------------------------------------------
def reference_forward(params, emb, mask_m, projector, n_head, eps=1e-5):
    B, S, D = emb.shape
    H = n_head
    dh = D // H
    x = emb.reshape(B * S, D)

    def split(t):
        return t.reshape(B, S, H, dh).transpose(0, 2, 1, 3)

    q = split(x @ params["wq"] + params["bq"])
    k = split(x @ params["wk"] + params["bk"])
    v = split(x @ params["wv"] + params["bv"])
    k_p = jnp.einsum("bhsd,sk->bhkd", k, projector)
    v_p = jnp.einsum("bhsd,sk->bhkd", v, projector)
    scores = jnp.einsum("bhsd,bhkd->bhsk", q, k_p) / math.sqrt(D)
    scores = jnp.where(mask_m > 0, scores, -1e9)
    p = jax.nn.softmax(scores, axis=-1)
    ctx = jnp.einsum("bhsk,bhkd->bhsd", p, v_p)
    ctx = ctx.transpose(0, 2, 1, 3).reshape(B * S, D)
    attn = ctx @ params["wo"] + params["bo"]

    def ln(z, g, b):
        mu = z.mean(-1, keepdims=True)
        var = jnp.square(z - mu).mean(-1, keepdims=True)
        return (z - mu) / jnp.sqrt(var + eps) * g + b

    a1 = ln(x + attn, params["ln1_g"], params["ln1_b"])
    h = jnp.maximum(a1 @ params["w1"] + params["b1"], 0.0)
    z = h @ params["w2"] + params["b2"]
    return ln(a1 + z, params["ln2_g"], params["ln2_b"]).reshape(B, S, D)


if __name__ == "__main__":
    B, S, D, H, D_FF, KP = 2, 16, 32, 4, 64, 8

    root = jax.random.PRNGKey(0)
    k_par, k_emb, k_proj = jax.random.split(root, 3)

    params = init_params(k_par, D, D_FF)
    emb = jax.random.normal(k_emb, (B, S, D), jnp.float32)
    # JL random projection matrix for the sequence axis
    projector = jax.random.normal(k_proj, (S, KP), jnp.float32) / math.sqrt(KP)
    # mask: keep everything for batch 0, mask out last 2 projected positions for batch 1
    mask_m = jnp.ones((B, 1, S, KP), jnp.float32)
    mask_m = mask_m.at[1, :, :, KP - 2:].set(0.0)

    ref = reference_forward(params, emb, mask_m, projector, H)

    # f32 parity path: verifies the kernel algebra (padding, Linformer bias
    # correction, fused Wo/LN) against the reference tightly.
    fwd_f32 = jax.jit(functools.partial(encoder_layer_forward, n_head=H,
                                        compute_dtype=jnp.float32))
    out_f32 = fwd_f32(params, emb, mask_m, projector)
    jax.block_until_ready(out_f32)

    # bf16 performance path (the default): sanity-checked with a loose bound.
    fwd_bf16 = jax.jit(functools.partial(encoder_layer_forward, n_head=H,
                                         compute_dtype=jnp.bfloat16))
    out_bf16 = fwd_bf16(params, emb, mask_m, projector)
    jax.block_until_ready(out_bf16)

    assert out_f32.shape == (B, S, D) and out_f32.dtype == jnp.float32
    assert out_bf16.shape == (B, S, D)
    assert bool(jnp.all(jnp.isfinite(out_f32)))
    assert bool(jnp.all(jnp.isfinite(out_bf16)))

    err32 = float(jnp.max(jnp.abs(out_f32 - ref)))
    err16 = float(jnp.max(jnp.abs(out_bf16.astype(jnp.float32) - ref)))
    assert bool(jnp.allclose(out_f32, ref, rtol=1e-2, atol=1e-2)), (
        "f32 path max abs err = %g" % err32)
    assert bool(jnp.allclose(out_bf16.astype(jnp.float32), ref,
                             rtol=1e-1, atol=1e-1)), (
        "bf16 path max abs err = %g" % err16)
    print("KERNEL_OK")
</pallas_src>

<mosaic_0001>
module attributes {stable_mosaic.version = 11 : i64} {
  func.func @_kv_project_kernel(%arg0: i32, %arg1: i32, %arg2: i32, %arg3: memref<1x16x32xf32, #tpu.memory_space<vmem>>, %arg4: memref<128x16xf32, #tpu.memory_space<vmem>>, %arg5: memref<128x1xf32, #tpu.memory_space<vmem>>, %arg6: memref<32x32xf32, #tpu.memory_space<vmem>>, %arg7: memref<1x32xf32, #tpu.memory_space<vmem>>, %arg8: memref<32x32xf32, #tpu.memory_space<vmem>>, %arg9: memref<1x32xf32, #tpu.memory_space<vmem>>, %arg10: memref<1x128x32xf32, #tpu.memory_space<vmem>>, %arg11: memref<1x128x32xf32, #tpu.memory_space<vmem>>, %arg12: memref<128x32xf32, #tpu.memory_space<vmem>>) attributes {dimension_semantics = [#tpu.dimension_semantics<parallel>, #tpu.dimension_semantics<parallel>, #tpu.dimension_semantics<arbitrary>], iteration_bounds = array<i64: 2, 1, 1>, scalar_prefetch = 0 : i64, scratch_operands = 1 : i64, tpu.core_type = #tpu.core_type<tc>, window_params = [{transform_indices = @transform_0, window_bounds = array<i64: 1, 16, 32>}, {transform_indices = @transform_1, window_bounds = array<i64: 128, 16>}, {transform_indices = @transform_2, window_bounds = array<i64: 128, 1>}, {pipeline_mode = #tpu.pipeline_mode<synchronous>, transform_indices = @transform_3, window_bounds = array<i64: 32, 32>}, {pipeline_mode = #tpu.pipeline_mode<synchronous>, transform_indices = @transform_4, window_bounds = array<i64: 1, 32>}, {pipeline_mode = #tpu.pipeline_mode<synchronous>, transform_indices = @transform_5, window_bounds = array<i64: 32, 32>}, {pipeline_mode = #tpu.pipeline_mode<synchronous>, transform_indices = @transform_6, window_bounds = array<i64: 1, 32>}, {transform_indices = @transform_7, window_bounds = array<i64: 1, 128, 32>}, {transform_indices = @transform_8, window_bounds = array<i64: 1, 128, 32>}]} {
    %c0_i32 = arith.constant 0 : i32
    %0 = arith.cmpi eq, %arg2, %c0_i32 : i32
    %1 = arith.extui %0 : i1 to i32
    %c0_i32_0 = arith.constant 0 : i32
    %2 = arith.cmpi ne, %1, %c0_i32_0 : i32
    scf.if %2 {
      %cst_11 = arith.constant 0.000000e+00 : f32
      %13 = vector.broadcast %cst_11 : f32 to vector<128x32xf32>
      %c0_12 = arith.constant 0 : index
      %c0_13 = arith.constant 0 : index
      %14 = vector.load %arg12[%c0_12, %c0_13] : memref<128x32xf32, #tpu.memory_space<vmem>>, vector<128x32xf32>
      tpu.vector_store %arg12[%c0_12, %c0_13], %13 {strides = array<i32>} : memref<128x32xf32, #tpu.memory_space<vmem>>, vector<128x32xf32>,
    } else {
    }
    %c0 = arith.constant 0 : index
    %c0_1 = arith.constant 0 : index
    %3 = vector.load %arg12[%c0, %c0_1] : memref<128x32xf32, #tpu.memory_space<vmem>>, vector<128x32xf32>
    %c0_2 = arith.constant 0 : index
    %c0_3 = arith.constant 0 : index
    %4 = vector.load %arg4[%c0_2, %c0_3] : memref<128x16xf32, #tpu.memory_space<vmem>>, vector<128x16xf32>
    %c0_4 = arith.constant 0 : index
    %c0_5 = arith.constant 0 : index
    %c0_6 = arith.constant 0 : index
    %5 = vector.load %arg3[%c0_4, %c0_5, %c0_6] : memref<1x16x32xf32, #tpu.memory_space<vmem>>, vector<1x16x32xf32>
    %6 = vector.shape_cast %5 : vector<1x16x32xf32> to vector<16x32xf32>
    %cst = arith.constant dense<0.000000e+00> : vector<128x32xf32>
    %7 = tpu.matmul %4, %6, %cst {dimension_numbers = #tpu.dot_dimension_numbers<[1], [0], [0], [1], [0, 0, 1, 1], [], []>} : vector<128x16xf32>, vector<16x32xf32>, vector<128x32xf32> -> vector<128x32xf32>
    %8 = arith.addf %3, %7 : vector<128x32xf32>
    %c0_7 = arith.constant 0 : index
    %c0_8 = arith.constant 0 : index
    %9 = vector.load %arg12[%c0_7, %c0_8] : memref<128x32xf32, #tpu.memory_space<vmem>>, vector<128x32xf32>
    tpu.vector_store %arg12[%c0_7, %c0_8], %8 {strides = array<i32>} : memref<128x32xf32, #tpu.memory_space<vmem>>, vector<128x32xf32>,
    %c0_i32_9 = arith.constant 0 : i32
    %10 = arith.cmpi eq, %arg2, %c0_i32_9 : i32
    %11 = arith.extui %10 : i1 to i32
    %c0_i32_10 = arith.constant 0 : i32
    %12 = arith.cmpi ne, %11, %c0_i32_10 : i32
    scf.if %12 {
      %c0_11 = arith.constant 0 : index
      %c0_12 = arith.constant 0 : index
      %13 = vector.load %arg12[%c0_11, %c0_12] : memref<128x32xf32, #tpu.memory_space<vmem>>, vector<128x32xf32>
      %c0_13 = arith.constant 0 : index
      %c0_14 = arith.constant 0 : index
      %14 = vector.load %arg5[%c0_13, %c0_14] : memref<128x1xf32, #tpu.memory_space<vmem>>, vector<128x1xf32>
      %c0_15 = arith.constant 0 : index
      %c0_16 = arith.constant 0 : index
      %15 = vector.load %arg6[%c0_15, %c0_16] : memref<32x32xf32, #tpu.memory_space<vmem>>, vector<32x32xf32>
      %cst_17 = arith.constant dense<0.000000e+00> : vector<128x32xf32>
      %16 = tpu.matmul %13, %15, %cst_17 {dimension_numbers = #tpu.dot_dimension_numbers<[1], [0], [0], [1], [0, 0, 1, 1], [], []>} : vector<128x32xf32>, vector<32x32xf32>, vector<128x32xf32> -> vector<128x32xf32>
      %c0_18 = arith.constant 0 : index
      %c0_19 = arith.constant 0 : index
      %17 = vector.load %arg7[%c0_18, %c0_19] : memref<1x32xf32, #tpu.memory_space<vmem>>, vector<1x32xf32>
      %18 = vector.broadcast %14 : vector<128x1xf32> to vector<128x32xf32>
      %19 = vector.broadcast %17 : vector<1x32xf32> to vector<128x32xf32>
      %20 = arith.mulf %18, %19 : vector<128x32xf32>
      %21 = arith.addf %16, %20 : vector<128x32xf32>
      %c0_20 = arith.constant 0 : index
      %c0_21 = arith.constant 0 : index
      %22 = vector.load %arg8[%c0_20, %c0_21] : memref<32x32xf32, #tpu.memory_space<vmem>>, vector<32x32xf32>
      %cst_22 = arith.constant dense<0.000000e+00> : vector<128x32xf32>
      %23 = tpu.matmul %13, %22, %cst_22 {dimension_numbers = #tpu.dot_dimension_numbers<[1], [0], [0], [1], [0, 0, 1, 1], [], []>} : vector<128x32xf32>, vector<32x32xf32>, vector<128x32xf32> -> vector<128x32xf32>
      %c0_23 = arith.constant 0 : index
      %c0_24 = arith.constant 0 : index
      %24 = vector.load %arg9[%c0_23, %c0_24] : memref<1x32xf32, #tpu.memory_space<vmem>>, vector<1x32xf32>
      %25 = vector.broadcast %14 : vector<128x1xf32> to vector<128x32xf32>
      %26 = vector.broadcast %24 : vector<1x32xf32> to vector<128x32xf32>
      %27 = arith.mulf %25, %26 : vector<128x32xf32>
      %28 = arith.addf %23, %27 : vector<128x32xf32>
      %c0_25 = arith.constant 0 : index
      %c0_26 = arith.constant 0 : index
      %c0_27 = arith.constant 0 : index
      %29 = vector.load %arg10[%c0_25, %c0_26, %c0_27] : memref<1x128x32xf32, #tpu.memory_space<vmem>>, vector<1x128x32xf32>
      %30 = vector.shape_cast %29 : vector<1x128x32xf32> to vector<128x32xf32>
      %31 = vector.shape_cast %21 : vector<128x32xf32> to vector<1x128x32xf32>
      tpu.vector_store %arg10[%c0_25, %c0_26, %c0_27], %31 {strides = array<i32>} : memref<1x128x32xf32, #tpu.memory_space<vmem>>, vector<1x128x32xf32>,
      %c0_28 = arith.constant 0 : index
      %c0_29 = arith.constant 0 : index
      %c0_30 = arith.constant 0 : index
      %32 = vector.load %arg11[%c0_28, %c0_29, %c0_30] : memref<1x128x32xf32, #tpu.memory_space<vmem>>, vector<1x128x32xf32>
      %33 = vector.shape_cast %32 : vector<1x128x32xf32> to vector<128x32xf32>
      %34 = vector.shape_cast %28 : vector<128x32xf32> to vector<1x128x32xf32>
      tpu.vector_store %arg11[%c0_28, %c0_29, %c0_30], %34 {strides = array<i32>} : memref<1x128x32xf32, #tpu.memory_space<vmem>>, vector<1x128x32xf32>,
    } else {
    }
    return
  }
  func.func @transform_0(%arg0: i32, %arg1: i32, %arg2: i32) -> (i32, i32, i32) {
    %c0_i32 = arith.constant 0 : i32
    %c0_i32_0 = arith.constant 0 : i32
    return %arg0, %arg2, %c0_i32 : i32, i32, i32
  }
  func.func @transform_1(%arg0: i32, %arg1: i32, %arg2: i32) -> (i32, i32) {
    %c0_i32 = arith.constant 0 : i32
    return %arg1, %arg2 : i32, i32
  }
  func.func @transform_2(%arg0: i32, %arg1: i32, %arg2: i32) -> (i32, i32) {
    %c0_i32 = arith.constant 0 : i32
    %c0_i32_0 = arith.constant 0 : i32
    return %arg1, %c0_i32 : i32, i32
  }
  func.func @transform_3(%arg0: i32, %arg1: i32, %arg2: i32) -> (i32, i32) {
    %c0_i32 = arith.constant 0 : i32
    %c0_i32_0 = arith.constant 0 : i32
    %c0_i32_1 = arith.constant 0 : i32
    return %c0_i32, %c0_i32_0 : i32, i32
  }
  func.func @transform_4(%arg0: i32, %arg1: i32, %arg2: i32) -> (i32, i32) {
    %c0_i32 = arith.constant 0 : i32
    %c0_i32_0 = arith.constant 0 : i32
    %c0_i32_1 = arith.constant 0 : i32
    return %c0_i32, %c0_i32_0 : i32, i32
  }
  func.func @transform_5(%arg0: i32, %arg1: i32, %arg2: i32) -> (i32, i32) {
    %c0_i32 = arith.constant 0 : i32
    %c0_i32_0 = arith.constant 0 : i32
    %c0_i32_1 = arith.constant 0 : i32
    return %c0_i32, %c0_i32_0 : i32, i32
  }
  func.func @transform_6(%arg0: i32, %arg1: i32, %arg2: i32) -> (i32, i32) {
    %c0_i32 = arith.constant 0 : i32
    %c0_i32_0 = arith.constant 0 : i32
    %c0_i32_1 = arith.constant 0 : i32
    return %c0_i32, %c0_i32_0 : i32, i32
  }
  func.func @transform_7(%arg0: i32, %arg1: i32, %arg2: i32) -> (i32, i32, i32) {
    %c0_i32 = arith.constant 0 : i32
    %c0_i32_0 = arith.constant 0 : i32
    return %arg0, %arg1, %c0_i32 : i32, i32, i32
  }
  func.func @transform_8(%arg0: i32, %arg1: i32, %arg2: i32) -> (i32, i32, i32) {
    %c0_i32 = arith.constant 0 : i32
    %c0_i32_0 = arith.constant 0 : i32
    return %arg0, %arg1, %c0_i32 : i32, i32, i32
  }
}

module attributes {stable_mosaic.version = 11 : i64} {
  func.func @_matmul_kernel(%arg0: i32, %arg1: i32, %arg2: i32, %arg3: memref<32x32xf32, #tpu.memory_space<vmem>>, %arg4: memref<32x32xf32, #tpu.memory_space<vmem>>, %arg5: memref<1x32xf32, #tpu.memory_space<vmem>>, %arg6: memref<32x32xf32, #tpu.memory_space<vmem>>, %arg7: memref<32x32xf32, #tpu.memory_space<vmem>>) attributes {dimension_semantics = [#tpu.dimension_semantics<parallel>, #tpu.dimension_semantics<parallel>, #tpu.dimension_semantics<arbitrary>], iteration_bounds = array<i64: 1, 1, 1>, scalar_prefetch = 0 : i64, scratch_operands = 1 : i64, tpu.core_type = #tpu.core_type<tc>, window_params = [{transform_indices = @transform_0, window_bounds = array<i64: 32, 32>}, {transform_indices = @transform_1, window_bounds = array<i64: 32, 32>}, {transform_indices = @transform_2, window_bounds = array<i64: 1, 32>}, {transform_indices = @transform_3, window_bounds = array<i64: 32, 32>}]} {
    %c0_i32 = arith.constant 0 : i32
    %0 = arith.cmpi eq, %arg2, %c0_i32 : i32
    %1 = arith.extui %0 : i1 to i32
    %c0_i32_0 = arith.constant 0 : i32
    %2 = arith.cmpi ne, %1, %c0_i32_0 : i32
    scf.if %2 {
      %cst_10 = arith.constant 0.000000e+00 : f32
      %12 = vector.broadcast %cst_10 : f32 to vector<32x32xf32>
      %c0_11 = arith.constant 0 : index
      %c0_12 = arith.constant 0 : index
      %13 = vector.load %arg7[%c0_11, %c0_12] : memref<32x32xf32, #tpu.memory_space<vmem>>, vector<32x32xf32>
      tpu.vector_store %arg7[%c0_11, %c0_12], %12 {strides = array<i32>} : memref<32x32xf32, #tpu.memory_space<vmem>>, vector<32x32xf32>,
    } else {
    }
    %c0 = arith.constant 0 : index
    %c0_1 = arith.constant 0 : index
    %3 = vector.load %arg7[%c0, %c0_1] : memref<32x32xf32, #tpu.memory_space<vmem>>, vector<32x32xf32>
    %c0_2 = arith.constant 0 : index
    %c0_3 = arith.constant 0 : index
    %4 = vector.load %arg3[%c0_2, %c0_3] : memref<32x32xf32, #tpu.memory_space<vmem>>, vector<32x32xf32>
    %c0_4 = arith.constant 0 : index
    %c0_5 = arith.constant 0 : index
    %5 = vector.load %arg4[%c0_4, %c0_5] : memref<32x32xf32, #tpu.memory_space<vmem>>, vector<32x32xf32>
    %cst = arith.constant dense<0.000000e+00> : vector<32x32xf32>
    %6 = tpu.matmul %4, %5, %cst {dimension_numbers = #tpu.dot_dimension_numbers<[1], [0], [0], [1], [0, 0, 1, 1], [], []>} : vector<32x32xf32>, vector<32x32xf32>, vector<32x32xf32> -> vector<32x32xf32>
    %7 = arith.addf %3, %6 : vector<32x32xf32>
    %c0_6 = arith.constant 0 : index
    %c0_7 = arith.constant 0 : index
    %8 = vector.load %arg7[%c0_6, %c0_7] : memref<32x32xf32, #tpu.memory_space<vmem>>, vector<32x32xf32>
    tpu.vector_store %arg7[%c0_6, %c0_7], %7 {strides = array<i32>} : memref<32x32xf32, #tpu.memory_space<vmem>>, vector<32x32xf32>,
    %c0_i32_8 = arith.constant 0 : i32
    %9 = arith.cmpi eq, %arg2, %c0_i32_8 : i32
    %10 = arith.extui %9 : i1 to i32
    %c0_i32_9 = arith.constant 0 : i32
    %11 = arith.cmpi ne, %10, %c0_i32_9 : i32
    scf.if %11 {
      %c0_10 = arith.constant 0 : index
      %c0_11 = arith.constant 0 : index
      %12 = vector.load %arg7[%c0_10, %c0_11] : memref<32x32xf32, #tpu.memory_space<vmem>>, vector<32x32xf32>
      %c0_12 = arith.constant 0 : index
      %c0_13 = arith.constant 0 : index
      %13 = vector.load %arg5[%c0_12, %c0_13] : memref<1x32xf32, #tpu.memory_space<vmem>>, vector<1x32xf32>
      %14 = vector.broadcast %13 : vector<1x32xf32> to vector<32x32xf32>
      %15 = arith.addf %12, %14 : vector<32x32xf32>
      %c0_14 = arith.constant 0 : index
      %c0_15 = arith.constant 0 : index
      %16 = vector.load %arg6[%c0_14, %c0_15] : memref<32x32xf32, #tpu.memory_space<vmem>>, vector<32x32xf32>
      tpu.vector_store %arg6[%c0_14, %c0_15], %15 {strides = array<i32>} : memref<32x32xf32, #tpu.memory_space<vmem>>, vector<32x32xf32>,
    } else {
    }
    return
  }
  func.func @transform_0(%arg0: i32, %arg1: i32, %arg2: i32) -> (i32, i32) {
    %c0_i32 = arith.constant 0 : i32
    return %arg0, %arg2 : i32, i32
  }
  func.func @transform_1(%arg0: i32, %arg1: i32, %arg2: i32) -> (i32, i32) {
    %c0_i32 = arith.constant 0 : i32
    return %arg2, %arg1 : i32, i32
  }
  func.func @transform_2(%arg0: i32, %arg1: i32, %arg2: i32) -> (i32, i32) {
    %c0_i32 = arith.constant 0 : i32
    %c0_i32_0 = arith.constant 0 : i32
    return %c0_i32, %arg1 : i32, i32
  }
  func.func @transform_3(%arg0: i32, %arg1: i32, %arg2: i32) -> (i32, i32) {
    %c0_i32 = arith.constant 0 : i32
    return %arg0, %arg1 : i32, i32
  }
}

module attributes {stable_mosaic.version = 11 : i64} {
  func.func @_attn_out_ln_kernel(%arg0: i32, %arg1: i32, %arg2: memref<1x16x32xf32, #tpu.memory_space<vmem>>, %arg3: memref<1x128x32xf32, #tpu.memory_space<vmem>>, %arg4: memref<1x128x32xf32, #tpu.memory_space<vmem>>, %arg5: memref<1x16x128xf32, #tpu.memory_space<vmem>>, %arg6: memref<1x16x32xf32, #tpu.memory_space<vmem>>, %arg7: memref<32x32xf32, #tpu.memory_space<vmem>>, %arg8: memref<1x32xf32, #tpu.memory_space<vmem>>, %arg9: memref<1x32xf32, #tpu.memory_space<vmem>>, %arg10: memref<1x32xf32, #tpu.memory_space<vmem>>, %arg11: memref<1x16x32xf32, #tpu.memory_space<vmem>>) attributes {dimension_semantics = [#tpu.dimension_semantics<parallel>, #tpu.dimension_semantics<parallel>], iteration_bounds = array<i64: 2, 1>, scalar_prefetch = 0 : i64, scratch_operands = 0 : i64, tpu.core_type = #tpu.core_type<tc>, window_params = [{transform_indices = @transform_0, window_bounds = array<i64: 1, 16, 32>}, {transform_indices = @transform_1, window_bounds = array<i64: 1, 128, 32>}, {transform_indices = @transform_2, window_bounds = array<i64: 1, 128, 32>}, {transform_indices = @transform_3, window_bounds = array<i64: 1, 16, 128>}, {transform_indices = @transform_4, window_bounds = array<i64: 1, 16, 32>}, {pipeline_mode = #tpu.pipeline_mode<synchronous>, transform_indices = @transform_5, window_bounds = array<i64: 32, 32>}, {pipeline_mode = #tpu.pipeline_mode<synchronous>, transform_indices = @transform_6, window_bounds = array<i64: 1, 32>}, {pipeline_mode = #tpu.pipeline_mode<synchronous>, transform_indices = @transform_7, window_bounds = array<i64: 1, 32>}, {pipeline_mode = #tpu.pipeline_mode<synchronous>, transform_indices = @transform_8, window_bounds = array<i64: 1, 32>}, {transform_indices = @transform_9, window_bounds = array<i64: 1, 16, 32>}]} {
    %c0 = arith.constant 0 : index
    %c0_0 = arith.constant 0 : index
    %c0_1 = arith.constant 0 : index
    %0 = vector.load %arg2[%c0, %c0_0, %c0_1] : memref<1x16x32xf32, #tpu.memory_space<vmem>>, vector<1x16x32xf32>
    %1 = vector.shape_cast %0 : vector<1x16x32xf32> to vector<16x32xf32>
    %c0_2 = arith.constant 0 : index
    %c0_3 = arith.constant 0 : index
    %c0_4 = arith.constant 0 : index
    %2 = vector.load %arg3[%c0_2, %c0_3, %c0_4] : memref<1x128x32xf32, #tpu.memory_space<vmem>>, vector<1x128x32xf32>
    %3 = vector.shape_cast %2 : vector<1x128x32xf32> to vector<128x32xf32>
    %c0_5 = arith.constant 0 : index
    %c0_6 = arith.constant 0 : index
    %c0_7 = arith.constant 0 : index
    %4 = vector.load %arg4[%c0_5, %c0_6, %c0_7] : memref<1x128x32xf32, #tpu.memory_space<vmem>>, vector<1x128x32xf32>
    %5 = vector.shape_cast %4 : vector<1x128x32xf32> to vector<128x32xf32>
    %c0_8 = arith.constant 0 : index
    %c0_9 = arith.constant 0 : index
    %c0_10 = arith.constant 0 : index
    %6 = vector.load %arg5[%c0_8, %c0_9, %c0_10] : memref<1x16x128xf32, #tpu.memory_space<vmem>>, vector<1x16x128xf32>
    %7 = vector.shape_cast %6 : vector<1x16x128xf32> to vector<16x128xf32>
    %cst = arith.constant 1.000000e+00 : f32
    %8 = vector.broadcast %cst : f32 to vector<16x128xf32>
    %9 = arith.subf %7, %8 : vector<16x128xf32>
    %cst_11 = arith.constant 1.000000e+09 : f32
    %10 = vector.broadcast %cst_11 : f32 to vector<16x128xf32>
    %11 = arith.mulf %9, %10 : vector<16x128xf32>
    %12 = vector.extract_strided_slice %1 {offsets = [0, 0], sizes = [16, 8], strides = [1, 1]} : vector<16x32xf32> to vector<16x8xf32>
    %13 = vector.extract_strided_slice %3 {offsets = [0, 0], sizes = [128, 8], strides = [1, 1]} : vector<128x32xf32> to vector<128x8xf32>
    %14 = vector.extract_strided_slice %5 {offsets = [0, 0], sizes = [128, 8], strides = [1, 1]} : vector<128x32xf32> to vector<128x8xf32>
    %cst_12 = arith.constant dense<0.000000e+00> : vector<16x128xf32>
    %15 = tpu.matmul %12, %13, %cst_12 {dimension_numbers = #tpu.dot_dimension_numbers<[1], [1], [0], [0], [0, 0, 1, 0], [], []>} : vector<16x8xf32>, vector<128x8xf32>, vector<16x128xf32> -> vector<16x128xf32>
    %cst_13 = arith.constant 0.176776692 : f32
    %16 = vector.broadcast %cst_13 : f32 to vector<16x128xf32>
    %17 = arith.mulf %15, %16 : vector<16x128xf32>
    %18 = arith.addf %17, %11 : vector<16x128xf32>
    %cst_14 = arith.constant dense<0xFF800000> : vector<16xf32>
    %19 = vector.multi_reduction <maximumf>, %18, %cst_14 [1] : vector<16x128xf32> to vector<16xf32>
    %20 = vector.shape_cast %19 : vector<16xf32> to vector<16x1xf32>
    %21 = vector.broadcast %20 : vector<16x1xf32> to vector<16x128xf32>
    %22 = arith.subf %18, %21 : vector<16x128xf32>
    %23 = math.exp %22 : vector<16x128xf32>
    %cst_15 = arith.constant dense<0.000000e+00> : vector<16xf32>
    %24 = vector.multi_reduction <add>, %23, %cst_15 [1] : vector<16x128xf32> to vector<16xf32>
    %25 = vector.shape_cast %24 : vector<16xf32> to vector<16x1xf32>
    %26 = tpu.reciprocal %25 {approx = true} : vector<16x1xf32> -> vector<16x1xf32>
    %27 = vector.broadcast %26 : vector<16x1xf32> to vector<16x128xf32>
    %28 = arith.mulf %23, %27 : vector<16x128xf32>
    %cst_16 = arith.constant dense<0.000000e+00> : vector<16x8xf32>
    %29 = tpu.matmul %28, %14, %cst_16 {dimension_numbers = #tpu.dot_dimension_numbers<[1], [0], [0], [1], [0, 0, 1, 1], [], []>} : vector<16x128xf32>, vector<128x8xf32>, vector<16x8xf32> -> vector<16x8xf32>
    %30 = vector.extract_strided_slice %1 {offsets = [0, 8], sizes = [16, 8], strides = [1, 1]} : vector<16x32xf32> to vector<16x8xf32>
    %31 = vector.extract_strided_slice %3 {offsets = [0, 8], sizes = [128, 8], strides = [1, 1]} : vector<128x32xf32> to vector<128x8xf32>
    %32 = vector.extract_strided_slice %5 {offsets = [0, 8], sizes = [128, 8], strides = [1, 1]} : vector<128x32xf32> to vector<128x8xf32>
    %cst_17 = arith.constant dense<0.000000e+00> : vector<16x128xf32>
    %33 = tpu.matmul %30, %31, %cst_17 {dimension_numbers = #tpu.dot_dimension_numbers<[1], [1], [0], [0], [0, 0, 1, 0], [], []>} : vector<16x8xf32>, vector<128x8xf32>, vector<16x128xf32> -> vector<16x128xf32>
    %cst_18 = arith.constant 0.176776692 : f32
    %34 = vector.broadcast %cst_18 : f32 to vector<16x128xf32>
    %35 = arith.mulf %33, %34 : vector<16x128xf32>
    %36 = arith.addf %35, %11 : vector<16x128xf32>
    %cst_19 = arith.constant dense<0xFF800000> : vector<16xf32>
    %37 = vector.multi_reduction <maximumf>, %36, %cst_19 [1] : vector<16x128xf32> to vector<16xf32>
    %38 = vector.shape_cast %37 : vector<16xf32> to vector<16x1xf32>
    %39 = vector.broadcast %38 : vector<16x1xf32> to vector<16x128xf32>
    %40 = arith.subf %36, %39 : vector<16x128xf32>
    %41 = math.exp %40 : vector<16x128xf32>
    %cst_20 = arith.constant dense<0.000000e+00> : vector<16xf32>
    %42 = vector.multi_reduction <add>, %41, %cst_20 [1] : vector<16x128xf32> to vector<16xf32>
    %43 = vector.shape_cast %42 : vector<16xf32> to vector<16x1xf32>
    %44 = tpu.reciprocal %43 {approx = true} : vector<16x1xf32> -> vector<16x1xf32>
    %45 = vector.broadcast %44 : vector<16x1xf32> to vector<16x128xf32>
    %46 = arith.mulf %41, %45 : vector<16x128xf32>
    %cst_21 = arith.constant dense<0.000000e+00> : vector<16x8xf32>
    %47 = tpu.matmul %46, %32, %cst_21 {dimension_numbers = #tpu.dot_dimension_numbers<[1], [0], [0], [1], [0, 0, 1, 1], [], []>} : vector<16x128xf32>, vector<128x8xf32>, vector<16x8xf32> -> vector<16x8xf32>
    %48 = vector.extract_strided_slice %1 {offsets = [0, 16], sizes = [16, 8], strides = [1, 1]} : vector<16x32xf32> to vector<16x8xf32>
    %49 = vector.extract_strided_slice %3 {offsets = [0, 16], sizes = [128, 8], strides = [1, 1]} : vector<128x32xf32> to vector<128x8xf32>
    %50 = vector.extract_strided_slice %5 {offsets = [0, 16], sizes = [128, 8], strides = [1, 1]} : vector<128x32xf32> to vector<128x8xf32>
    %cst_22 = arith.constant dense<0.000000e+00> : vector<16x128xf32>
    %51 = tpu.matmul %48, %49, %cst_22 {dimension_numbers = #tpu.dot_dimension_numbers<[1], [1], [0], [0], [0, 0, 1, 0], [], []>} : vector<16x8xf32>, vector<128x8xf32>, vector<16x128xf32> -> vector<16x128xf32>
    %cst_23 = arith.constant 0.176776692 : f32
    %52 = vector.broadcast %cst_23 : f32 to vector<16x128xf32>
    %53 = arith.mulf %51, %52 : vector<16x128xf32>
    %54 = arith.addf %53, %11 : vector<16x128xf32>
    %cst_24 = arith.constant dense<0xFF800000> : vector<16xf32>
    %55 = vector.multi_reduction <maximumf>, %54, %cst_24 [1] : vector<16x128xf32> to vector<16xf32>
    %56 = vector.shape_cast %55 : vector<16xf32> to vector<16x1xf32>
    %57 = vector.broadcast %56 : vector<16x1xf32> to vector<16x128xf32>
    %58 = arith.subf %54, %57 : vector<16x128xf32>
    %59 = math.exp %58 : vector<16x128xf32>
    %cst_25 = arith.constant dense<0.000000e+00> : vector<16xf32>
    %60 = vector.multi_reduction <add>, %59, %cst_25 [1] : vector<16x128xf32> to vector<16xf32>
    %61 = vector.shape_cast %60 : vector<16xf32> to vector<16x1xf32>
    %62 = tpu.reciprocal %61 {approx = true} : vector<16x1xf32> -> vector<16x1xf32>
    %63 = vector.broadcast %62 : vector<16x1xf32> to vector<16x128xf32>
    %64 = arith.mulf %59, %63 : vector<16x128xf32>
    %cst_26 = arith.constant dense<0.000000e+00> : vector<16x8xf32>
    %65 = tpu.matmul %64, %50, %cst_26 {dimension_numbers = #tpu.dot_dimension_numbers<[1], [0], [0], [1], [0, 0, 1, 1], [], []>} : vector<16x128xf32>, vector<128x8xf32>, vector<16x8xf32> -> vector<16x8xf32>
    %66 = vector.extract_strided_slice %1 {offsets = [0, 24], sizes = [16, 8], strides = [1, 1]} : vector<16x32xf32> to vector<16x8xf32>
    %67 = vector.extract_strided_slice %3 {offsets = [0, 24], sizes = [128, 8], strides = [1, 1]} : vector<128x32xf32> to vector<128x8xf32>
    %68 = vector.extract_strided_slice %5 {offsets = [0, 24], sizes = [128, 8], strides = [1, 1]} : vector<128x32xf32> to vector<128x8xf32>
    %cst_27 = arith.constant dense<0.000000e+00> : vector<16x128xf32>
    %69 = tpu.matmul %66, %67, %cst_27 {dimension_numbers = #tpu.dot_dimension_numbers<[1], [1], [0], [0], [0, 0, 1, 0], [], []>} : vector<16x8xf32>, vector<128x8xf32>, vector<16x128xf32> -> vector<16x128xf32>
    %cst_28 = arith.constant 0.176776692 : f32
    %70 = vector.broadcast %cst_28 : f32 to vector<16x128xf32>
    %71 = arith.mulf %69, %70 : vector<16x128xf32>
    %72 = arith.addf %71, %11 : vector<16x128xf32>
    %cst_29 = arith.constant dense<0xFF800000> : vector<16xf32>
    %73 = vector.multi_reduction <maximumf>, %72, %cst_29 [1] : vector<16x128xf32> to vector<16xf32>
    %74 = vector.shape_cast %73 : vector<16xf32> to vector<16x1xf32>
    %75 = vector.broadcast %74 : vector<16x1xf32> to vector<16x128xf32>
    %76 = arith.subf %72, %75 : vector<16x128xf32>
    %77 = math.exp %76 : vector<16x128xf32>
    %cst_30 = arith.constant dense<0.000000e+00> : vector<16xf32>
    %78 = vector.multi_reduction <add>, %77, %cst_30 [1] : vector<16x128xf32> to vector<16xf32>
    %79 = vector.shape_cast %78 : vector<16xf32> to vector<16x1xf32>
    %80 = tpu.reciprocal %79 {approx = true} : vector<16x1xf32> -> vector<16x1xf32>
    %81 = vector.broadcast %80 : vector<16x1xf32> to vector<16x128xf32>
    %82 = arith.mulf %77, %81 : vector<16x128xf32>
    %cst_31 = arith.constant dense<0.000000e+00> : vector<16x8xf32>
    %83 = tpu.matmul %82, %68, %cst_31 {dimension_numbers = #tpu.dot_dimension_numbers<[1], [0], [0], [1], [0, 0, 1, 1], [], []>} : vector<16x128xf32>, vector<128x8xf32>, vector<16x8xf32> -> vector<16x8xf32>
    %84 = tpu.concatenate %29, %47, %65, %83 in 1 : vector<16x8xf32>, vector<16x8xf32>, vector<16x8xf32>, vector<16x8xf32> -> vector<16x32xf32>
    %c0_32 = arith.constant 0 : index
    %c0_33 = arith.constant 0 : index
    %85 = vector.load %arg7[%c0_32, %c0_33] : memref<32x32xf32, #tpu.memory_space<vmem>>, vector<32x32xf32>
    %cst_34 = arith.constant dense<0.000000e+00> : vector<16x32xf32>
    %86 = tpu.matmul %84, %85, %cst_34 {dimension_numbers = #tpu.dot_dimension_numbers<[1], [0], [0], [1], [0, 0, 1, 1], [], []>} : vector<16x32xf32>, vector<32x32xf32>, vector<16x32xf32> -> vector<16x32xf32>
    %c0_35 = arith.constant 0 : index
    %c0_36 = arith.constant 0 : index
    %87 = vector.load %arg8[%c0_35, %c0_36] : memref<1x32xf32, #tpu.memory_space<vmem>>, vector<1x32xf32>
    %88 = vector.broadcast %87 : vector<1x32xf32> to vector<16x32xf32>
    %89 = arith.addf %86, %88 : vector<16x32xf32>
    %c0_37 = arith.constant 0 : index
    %c0_38 = arith.constant 0 : index
    %c0_39 = arith.constant 0 : index
    %90 = vector.load %arg6[%c0_37, %c0_38, %c0_39] : memref<1x16x32xf32, #tpu.memory_space<vmem>>, vector<1x16x32xf32>
    %91 = vector.shape_cast %90 : vector<1x16x32xf32> to vector<16x32xf32>
    %92 = arith.addf %91, %89 : vector<16x32xf32>
    %cst_40 = arith.constant dense<0.000000e+00> : vector<16xf32>
    %93 = vector.multi_reduction <add>, %92, %cst_40 [1] : vector<16x32xf32> to vector<16xf32>
    %94 = vector.shape_cast %93 : vector<16xf32> to vector<16x1xf32>
    %cst_41 = arith.constant 3.200000e+01 : f32
    %95 = vector.broadcast %cst_41 : f32 to vector<16x1xf32>
    %96 = arith.divf %94, %95 : vector<16x1xf32>
    %97 = vector.broadcast %96 : vector<16x1xf32> to vector<16x32xf32>
    %98 = arith.subf %92, %97 : vector<16x32xf32>
    %99 = arith.mulf %98, %98 : vector<16x32xf32>
    %cst_42 = arith.constant dense<0.000000e+00> : vector<16xf32>
    %100 = vector.multi_reduction <add>, %99, %cst_42 [1] : vector<16x32xf32> to vector<16xf32>
    %101 = vector.shape_cast %100 : vector<16xf32> to vector<16x1xf32>
    %cst_43 = arith.constant 3.200000e+01 : f32
    %102 = vector.broadcast %cst_43 : f32 to vector<16x1xf32>
    %103 = arith.divf %101, %102 : vector<16x1xf32>
    %104 = vector.broadcast %96 : vector<16x1xf32> to vector<16x32xf32>
    %105 = arith.subf %92, %104 : vector<16x32xf32>
    %cst_44 = arith.constant 9.99999974E-6 : f32
    %106 = vector.broadcast %cst_44 : f32 to vector<16x1xf32>
    %107 = arith.addf %103, %106 : vector<16x1xf32>
    %108 = math.rsqrt %107 : vector<16x1xf32>
    %109 = vector.broadcast %108 : vector<16x1xf32> to vector<16x32xf32>
    %110 = arith.mulf %105, %109 : vector<16x32xf32>
    %c0_45 = arith.constant 0 : index
    %c0_46 = arith.constant 0 : index
    %111 = vector.load %arg9[%c0_45, %c0_46] : memref<1x32xf32, #tpu.memory_space<vmem>>, vector<1x32xf32>
    %112 = vector.broadcast %111 : vector<1x32xf32> to vector<16x32xf32>
    %113 = arith.mulf %110, %112 : vector<16x32xf32>
    %c0_47 = arith.constant 0 : index
    %c0_48 = arith.constant 0 : index
    %114 = vector.load %arg10[%c0_47, %c0_48] : memref<1x32xf32, #tpu.memory_space<vmem>>, vector<1x32xf32>
    %115 = vector.broadcast %114 : vector<1x32xf32> to vector<16x32xf32>
    %116 = arith.addf %113, %115 : vector<16x32xf32>
    %c0_49 = arith.constant 0 : index
    %c0_50 = arith.constant 0 : index
    %c0_51 = arith.constant 0 : index
    %117 = vector.load %arg11[%c0_49, %c0_50, %c0_51] : memref<1x16x32xf32, #tpu.memory_space<vmem>>, vector<1x16x32xf32>
    %118 = vector.shape_cast %117 : vector<1x16x32xf32> to vector<16x32xf32>
    %119 = vector.shape_cast %116 : vector<16x32xf32> to vector<1x16x32xf32>
    tpu.vector_store %arg11[%c0_49, %c0_50, %c0_51], %119 {strides = array<i32>} : memref<1x16x32xf32, #tpu.memory_space<vmem>>, vector<1x16x32xf32>,
    return
  }
  func.func @transform_0(%arg0: i32, %arg1: i32) -> (i32, i32, i32) {
    %c0_i32 = arith.constant 0 : i32
    %c0_i32_0 = arith.constant 0 : i32
    return %arg0, %arg1, %c0_i32 : i32, i32, i32
  }
  func.func @transform_1(%arg0: i32, %arg1: i32) -> (i32, i32, i32) {
    %c0_i32 = arith.constant 0 : i32
    %c0_i32_0 = arith.constant 0 : i32
    %c0_i32_1 = arith.constant 0 : i32
    return %arg0, %c0_i32, %c0_i32_0 : i32, i32, i32
  }
  func.func @transform_2(%arg0: i32, %arg1: i32) -> (i32, i32, i32) {
    %c0_i32 = arith.constant 0 : i32
    %c0_i32_0 = arith.constant 0 : i32
    %c0_i32_1 = arith.constant 0 : i32
    return %arg0, %c0_i32, %c0_i32_0 : i32, i32, i32
  }
  func.func @transform_3(%arg0: i32, %arg1: i32) -> (i32, i32, i32) {
    %c0_i32 = arith.constant 0 : i32
    %c0_i32_0 = arith.constant 0 : i32
    return %arg0, %arg1, %c0_i32 : i32, i32, i32
  }
  func.func @transform_4(%arg0: i32, %arg1: i32) -> (i32, i32, i32) {
    %c0_i32 = arith.constant 0 : i32
    %c0_i32_0 = arith.constant 0 : i32
    return %arg0, %arg1, %c0_i32 : i32, i32, i32
  }
  func.func @transform_5(%arg0: i32, %arg1: i32) -> (i32, i32) {
    %c0_i32 = arith.constant 0 : i32
    %c0_i32_0 = arith.constant 0 : i32
    %c0_i32_1 = arith.constant 0 : i32
    return %c0_i32, %c0_i32_0 : i32, i32
  }
  func.func @transform_6(%arg0: i32, %arg1: i32) -> (i32, i32) {
    %c0_i32 = arith.constant 0 : i32
    %c0_i32_0 = arith.constant 0 : i32
    %c0_i32_1 = arith.constant 0 : i32
    return %c0_i32, %c0_i32_0 : i32, i32
  }
  func.func @transform_7(%arg0: i32, %arg1: i32) -> (i32, i32) {
    %c0_i32 = arith.constant 0 : i32
    %c0_i32_0 = arith.constant 0 : i32
    %c0_i32_1 = arith.constant 0 : i32
    return %c0_i32, %c0_i32_0 : i32, i32
  }
  func.func @transform_8(%arg0: i32, %arg1: i32) -> (i32, i32) {
    %c0_i32 = arith.constant 0 : i32
    %c0_i32_0 = arith.constant 0 : i32
    %c0_i32_1 = arith.constant 0 : i32
    return %c0_i32, %c0_i32_0 : i32, i32
  }
  func.func @transform_9(%arg0: i32, %arg1: i32) -> (i32, i32, i32) {
    %c0_i32 = arith.constant 0 : i32
    %c0_i32_0 = arith.constant 0 : i32
    return %arg0, %arg1, %c0_i32 : i32, i32, i32
  }
}

module attributes {stable_mosaic.version = 11 : i64} {
  func.func @_ffn_ln_kernel(%arg0: i32, %arg1: i32, %arg2: memref<32x32xf32, #tpu.memory_space<vmem>>, %arg3: memref<32x64xf32, #tpu.memory_space<vmem>>, %arg4: memref<1x64xf32, #tpu.memory_space<vmem>>, %arg5: memref<64x32xf32, #tpu.memory_space<vmem>>, %arg6: memref<1x32xf32, #tpu.memory_space<vmem>>, %arg7: memref<1x32xf32, #tpu.memory_space<vmem>>, %arg8: memref<1x32xf32, #tpu.memory_space<vmem>>, %arg9: memref<32x32xf32, #tpu.memory_space<vmem>>, %arg10: memref<32x32xf32, #tpu.memory_space<vmem>>) attributes {dimension_semantics = [#tpu.dimension_semantics<parallel>, #tpu.dimension_semantics<arbitrary>], iteration_bounds = array<i64: 1, 1>, scalar_prefetch = 0 : i64, scratch_operands = 1 : i64, tpu.core_type = #tpu.core_type<tc>, window_params = [{transform_indices = @transform_0, window_bounds = array<i64: 32, 32>}, {transform_indices = @transform_1, window_bounds = array<i64: 32, 64>}, {transform_indices = @transform_2, window_bounds = array<i64: 1, 64>}, {transform_indices = @transform_3, window_bounds = array<i64: 64, 32>}, {pipeline_mode = #tpu.pipeline_mode<synchronous>, transform_indices = @transform_4, window_bounds = array<i64: 1, 32>}, {pipeline_mode = #tpu.pipeline_mode<synchronous>, transform_indices = @transform_5, window_bounds = array<i64: 1, 32>}, {pipeline_mode = #tpu.pipeline_mode<synchronous>, transform_indices = @transform_6, window_bounds = array<i64: 1, 32>}, {transform_indices = @transform_7, window_bounds = array<i64: 32, 32>}]} {
    %c0_i32 = arith.constant 0 : i32
    %0 = arith.cmpi eq, %arg1, %c0_i32 : i32
    %1 = arith.extui %0 : i1 to i32
    %c0_i32_0 = arith.constant 0 : i32
    %2 = arith.cmpi ne, %1, %c0_i32_0 : i32
    scf.if %2 {
      %cst_16 = arith.constant 0.000000e+00 : f32
      %19 = vector.broadcast %cst_16 : f32 to vector<32x32xf32>
      %c0_17 = arith.constant 0 : index
      %c0_18 = arith.constant 0 : index
      %20 = vector.load %arg10[%c0_17, %c0_18] : memref<32x32xf32, #tpu.memory_space<vmem>>, vector<32x32xf32>
      tpu.vector_store %arg10[%c0_17, %c0_18], %19 {strides = array<i32>} : memref<32x32xf32, #tpu.memory_space<vmem>>, vector<32x32xf32>,
    } else {
    }
    %c0 = arith.constant 0 : index
    %c0_1 = arith.constant 0 : index
    %3 = vector.load %arg2[%c0, %c0_1] : memref<32x32xf32, #tpu.memory_space<vmem>>, vector<32x32xf32>
    %c0_2 = arith.constant 0 : index
    %c0_3 = arith.constant 0 : index
    %4 = vector.load %arg3[%c0_2, %c0_3] : memref<32x64xf32, #tpu.memory_space<vmem>>, vector<32x64xf32>
    %cst = arith.constant dense<0.000000e+00> : vector<32x64xf32>
    %5 = tpu.matmul %3, %4, %cst {dimension_numbers = #tpu.dot_dimension_numbers<[1], [0], [0], [1], [0, 0, 1, 1], [], []>} : vector<32x32xf32>, vector<32x64xf32>, vector<32x64xf32> -> vector<32x64xf32>
    %c0_4 = arith.constant 0 : index
    %c0_5 = arith.constant 0 : index
    %6 = vector.load %arg4[%c0_4, %c0_5] : memref<1x64xf32, #tpu.memory_space<vmem>>, vector<1x64xf32>
    %7 = vector.broadcast %6 : vector<1x64xf32> to vector<32x64xf32>
    %8 = arith.addf %5, %7 : vector<32x64xf32>
    %cst_6 = arith.constant 0.000000e+00 : f32
    %9 = vector.broadcast %cst_6 : f32 to vector<32x64xf32>
    %10 = arith.maximumf %8, %9 : vector<32x64xf32>
    %c0_7 = arith.constant 0 : index
    %c0_8 = arith.constant 0 : index
    %11 = vector.load %arg10[%c0_7, %c0_8] : memref<32x32xf32, #tpu.memory_space<vmem>>, vector<32x32xf32>
    %c0_9 = arith.constant 0 : index
    %c0_10 = arith.constant 0 : index
    %12 = vector.load %arg5[%c0_9, %c0_10] : memref<64x32xf32, #tpu.memory_space<vmem>>, vector<64x32xf32>
    %cst_11 = arith.constant dense<0.000000e+00> : vector<32x32xf32>
    %13 = tpu.matmul %10, %12, %cst_11 {dimension_numbers = #tpu.dot_dimension_numbers<[1], [0], [0], [1], [0, 0, 1, 1], [], []>} : vector<32x64xf32>, vector<64x32xf32>, vector<32x32xf32> -> vector<32x32xf32>
    %14 = arith.addf %11, %13 : vector<32x32xf32>
    %c0_12 = arith.constant 0 : index
    %c0_13 = arith.constant 0 : index
    %15 = vector.load %arg10[%c0_12, %c0_13] : memref<32x32xf32, #tpu.memory_space<vmem>>, vector<32x32xf32>
    tpu.vector_store %arg10[%c0_12, %c0_13], %14 {strides = array<i32>} : memref<32x32xf32, #tpu.memory_space<vmem>>, vector<32x32xf32>,
    %c0_i32_14 = arith.constant 0 : i32
    %16 = arith.cmpi eq, %arg1, %c0_i32_14 : i32
    %17 = arith.extui %16 : i1 to i32
    %c0_i32_15 = arith.constant 0 : i32
    %18 = arith.cmpi ne, %17, %c0_i32_15 : i32
    scf.if %18 {
      %c0_16 = arith.constant 0 : index
      %c0_17 = arith.constant 0 : index
      %19 = vector.load %arg10[%c0_16, %c0_17] : memref<32x32xf32, #tpu.memory_space<vmem>>, vector<32x32xf32>
      %c0_18 = arith.constant 0 : index
      %c0_19 = arith.constant 0 : index
      %20 = vector.load %arg6[%c0_18, %c0_19] : memref<1x32xf32, #tpu.memory_space<vmem>>, vector<1x32xf32>
      %21 = vector.broadcast %20 : vector<1x32xf32> to vector<32x32xf32>
      %22 = arith.addf %19, %21 : vector<32x32xf32>
      %c0_20 = arith.constant 0 : index
      %c0_21 = arith.constant 0 : index
      %23 = vector.load %arg2[%c0_20, %c0_21] : memref<32x32xf32, #tpu.memory_space<vmem>>, vector<32x32xf32>
      %24 = arith.addf %23, %22 : vector<32x32xf32>
      %cst_22 = arith.constant dense<0.000000e+00> : vector<32xf32>
      %25 = vector.multi_reduction <add>, %24, %cst_22 [1] : vector<32x32xf32> to vector<32xf32>
      %26 = vector.shape_cast %25 : vector<32xf32> to vector<32x1xf32>
      %cst_23 = arith.constant 3.200000e+01 : f32
      %27 = vector.broadcast %cst_23 : f32 to vector<32x1xf32>
      %28 = arith.divf %26, %27 : vector<32x1xf32>
      %29 = vector.broadcast %28 : vector<32x1xf32> to vector<32x32xf32>
      %30 = arith.subf %24, %29 : vector<32x32xf32>
      %31 = arith.mulf %30, %30 : vector<32x32xf32>
      %cst_24 = arith.constant dense<0.000000e+00> : vector<32xf32>
      %32 = vector.multi_reduction <add>, %31, %cst_24 [1] : vector<32x32xf32> to vector<32xf32>
      %33 = vector.shape_cast %32 : vector<32xf32> to vector<32x1xf32>
      %cst_25 = arith.constant 3.200000e+01 : f32
      %34 = vector.broadcast %cst_25 : f32 to vector<32x1xf32>
      %35 = arith.divf %33, %34 : vector<32x1xf32>
      %36 = vector.broadcast %28 : vector<32x1xf32> to vector<32x32xf32>
      %37 = arith.subf %24, %36 : vector<32x32xf32>
      %cst_26 = arith.constant 9.99999974E-6 : f32
      %38 = vector.broadcast %cst_26 : f32 to vector<32x1xf32>
      %39 = arith.addf %35, %38 : vector<32x1xf32>
      %40 = math.rsqrt %39 : vector<32x1xf32>
      %41 = vector.broadcast %40 : vector<32x1xf32> to vector<32x32xf32>
      %42 = arith.mulf %37, %41 : vector<32x32xf32>
      %c0_27 = arith.constant 0 : index
      %c0_28 = arith.constant 0 : index
      %43 = vector.load %arg7[%c0_27, %c0_28] : memref<1x32xf32, #tpu.memory_space<vmem>>, vector<1x32xf32>
      %44 = vector.broadcast %43 : vector<1x32xf32> to vector<32x32xf32>
      %45 = arith.mulf %42, %44 : vector<32x32xf32>
      %c0_29 = arith.constant 0 : index
      %c0_30 = arith.constant 0 : index
      %46 = vector.load %arg8[%c0_29, %c0_30] : memref<1x32xf32, #tpu.memory_space<vmem>>, vector<1x32xf32>
      %47 = vector.broadcast %46 : vector<1x32xf32> to vector<32x32xf32>
      %48 = arith.addf %45, %47 : vector<32x32xf32>
      %c0_31 = arith.constant 0 : index
      %c0_32 = arith.constant 0 : index
      %49 = vector.load %arg9[%c0_31, %c0_32] : memref<32x32xf32, #tpu.memory_space<vmem>>, vector<32x32xf32>
      tpu.vector_store %arg9[%c0_31, %c0_32], %48 {strides = array<i32>} : memref<32x32xf32, #tpu.memory_space<vmem>>, vector<32x32xf32>,
    } else {
    }
    return
  }
  func.func @transform_0(%arg0: i32, %arg1: i32) -> (i32, i32) {
    %c0_i32 = arith.constant 0 : i32
    %c0_i32_0 = arith.constant 0 : i32
    return %arg0, %c0_i32 : i32, i32
  }
  func.func @transform_1(%arg0: i32, %arg1: i32) -> (i32, i32) {
    %c0_i32 = arith.constant 0 : i32
    %c0_i32_0 = arith.constant 0 : i32
    return %c0_i32, %arg1 : i32, i32
  }
  func.func @transform_2(%arg0: i32, %arg1: i32) -> (i32, i32) {
    %c0_i32 = arith.constant 0 : i32
    %c0_i32_0 = arith.constant 0 : i32
    return %c0_i32, %arg1 : i32, i32
  }
  func.func @transform_3(%arg0: i32, %arg1: i32) -> (i32, i32) {
    %c0_i32 = arith.constant 0 : i32
    %c0_i32_0 = arith.constant 0 : i32
    return %arg1, %c0_i32 : i32, i32
  }
  func.func @transform_4(%arg0: i32, %arg1: i32) -> (i32, i32) {
    %c0_i32 = arith.constant 0 : i32
    %c0_i32_0 = arith.constant 0 : i32
    %c0_i32_1 = arith.constant 0 : i32
    return %c0_i32, %c0_i32_0 : i32, i32
  }
  func.func @transform_5(%arg0: i32, %arg1: i32) -> (i32, i32) {
    %c0_i32 = arith.constant 0 : i32
    %c0_i32_0 = arith.constant 0 : i32
    %c0_i32_1 = arith.constant 0 : i32
    return %c0_i32, %c0_i32_0 : i32, i32
  }
  func.func @transform_6(%arg0: i32, %arg1: i32) -> (i32, i32) {
    %c0_i32 = arith.constant 0 : i32
    %c0_i32_0 = arith.constant 0 : i32
    %c0_i32_1 = arith.constant 0 : i32
    return %c0_i32, %c0_i32_0 : i32, i32
  }
  func.func @transform_7(%arg0: i32, %arg1: i32) -> (i32, i32) {
    %c0_i32 = arith.constant 0 : i32
    %c0_i32_0 = arith.constant 0 : i32
    return %arg0, %c0_i32 : i32, i32
  }
}

</mosaic_0001>

<bundles_post_ra>
// kernel: encoder_layer_forward.4
= control target key start
LH: loop header
LB: loop body
LE: loop exit
PB: predicated region body
PF: predicated region fallthrough
CT: control target
= control target key end

     0   :  { %vm18_vm0 = vcmask 261120   ;;  %v126_v2 = vmov 0.0   ;;  %s202_s1 = inlined_call_operand.vmem [shape: f32[32,32], index: 1, kind: input, shape index: {}]   ;;  %s203_s2 = inlined_call_operand.vmem [shape: f32[1,32], index: 2, kind: input, shape index: {}]   ;;  %s204_s0 = inlined_call_operand.vmem [shape: f32[32,32], index: 0, kind: input, shape index: {}]   ;;  %s205_s3 = inlined_call_operand.vmem [shape: f32[32,32], index: 3, kind: output, shape index: {}]  }
   0x1   :  { %v34_v0 = vld [vmem:[%s202_s1 + $0x18] sm:$0xff]  ;;  %v33_v1 = vld [vmem:[%s202_s1 + $0x10] sm:$0xff]  ;;  %19 = vst.msk [vmem:[#allocation2] sm:$0xff] %vm18_vm0, %v126_v2  ;;  %v32_v3 = vld [vmem:[%s202_s1 + $0x8] sm:$0xff] }
   0x2   :  { %113 = vmatpush.msra.mxu2 %v34_v0  ;;  %114 = vmatpush.msra.mxu3 %v34_v0  ;;  %20 = vst.msk [vmem:[#allocation2 + $0x8] sm:$0xff] %vm18_vm0, %v126_v2  ;;  %v31_v4 = vld [vmem:[%s202_s1] sm:$0xff]  ;;  %v29_v5 = vld [vmem:[%s204_s0 + $0x10] sm:$0xff]  ;;  %v30_v6 = vld [vmem:[%s204_s0 + $0x18] sm:$0xff] }
   0x3   :  { %60 = vmatpush.msra.mxu0 %v34_v0  ;;  %112 = vmatpush.msra.mxu1 %v34_v0  ;;  %21 = vst.msk [vmem:[#allocation2 + $0x10] sm:$0xff] %vm18_vm0, %v126_v2  ;;  %v27_v7 = vld [vmem:[%s204_s0] sm:$0xff]  ;;  %v28_v8 = vld [vmem:[%s204_s0 + $0x8] sm:$0xff] }
   0x4   :  { %116 = vmatpush.msra.mxu2 %v33_v1  ;;  %117 = vmatpush.msra.mxu3 %v33_v1  ;;  %22 = vst.msk [vmem:[#allocation2 + $0x18] sm:$0xff] %vm18_vm0, %v126_v2  ;;  %v125_v21 = vld [vmem:[%s203_s2] ss:$0 sm:$0xff] }
   0x5   :  { %61 = vmatpush.msra.mxu0 %v33_v1  ;;  %115 = vmatpush.msra.mxu1 %v33_v1 }
   0x6   :  { %119 = vmatpush.msra.mxu2 %v32_v3  ;;  %120 = vmatpush.msra.mxu3 %v32_v3 }
   0x7   :  { %62 = vmatpush.msra.mxu0 %v32_v3  ;;  %118 = vmatpush.msra.mxu1 %v32_v3 }
   0x8   :  { %122 = vmatpush.msra.mxu2 %v31_v4  ;;  %123 = vmatpush.msra.mxu3 %v31_v4  ;;  %v23_v9 = vld [vmem:[#allocation2] sm:$0xff] }
   0x9   :  { %110 = vmatmul.msk.f32.vlgmr.msra.gmra.mxu2 %vm18_vm0, %v29_v5  ;;  %111 = vmatmul.msk.f32.vlgmr.msra.gmra.mxu3 %vm18_vm0, %v30_v6  ;;  %v24_v10 = vld [vmem:[#allocation2 + $0x8] sm:$0xff] }
   0xa   :  { %63 = vmatpush.msra.mxu0 %v31_v4  ;;  %121 = vmatpush.msra.mxu1 %v31_v4  ;;  %v25_v15 = vld [vmem:[#allocation2 + $0x10] sm:$0xff] }
   0xb   :  { %108 = vmatmul.msk.f32.vlgmr.msra.gmra.mxu0 %vm18_vm0, %v27_v7  ;;  %109 = vmatmul.msk.f32.vlgmr.msra.gmra.mxu1 %vm18_vm0, %v28_v8  ;;  %v26_v16 = vld [vmem:[#allocation2 + $0x18] sm:$0xff] }
  0x88   :  { %v65_v11 = vpop.f32.mrf.mxu0  ;;  %v68_v12 = vpop.f32.mrf.mxu1 }
  0x89   :  { %v77_v13 = vadd.f32 %v65_v11, %v23_v9  ;;  %v78_v14 = vadd.f32 %v68_v12, %v24_v10 }
  0x8b   :  { %81 = vst.msk [vmem:[#allocation2] sm:$0xff] %vm18_vm0, %v77_v13 }
  0x8c   :  { %82 = vst.msk [vmem:[#allocation2 + $0x8] sm:$0xff] %vm18_vm0, %v78_v14  ;;  %v71_v17 = vpop.f32.mrf.mxu2  ;;  %v74_v18 = vpop.f32.mrf.mxu3 }
  0x8d   :  { %v79_v19 = vadd.f32 %v71_v17, %v25_v15  ;;  %v80_v20 = vadd.f32 %v74_v18, %v26_v16 }
  0x8f   :  { %83 = vst.msk [vmem:[#allocation2 + $0x10] sm:$0xff] %vm18_vm0, %v79_v19 }
  0x90   :  { %84 = vst.msk [vmem:[#allocation2 + $0x18] sm:$0xff] %vm18_vm0, %v80_v20 }
  0x92   :  { %v88_v22 = vld [vmem:[#allocation2] sm:$0xff] }
  0x93   :  { %v96_v23 = vadd.f32 %v125_v21, %v88_v22  ;;  %v89_v24 = vld [vmem:[#allocation2 + $0x8] sm:$0xff] }
  0x94   :  { %v97_v25 = vadd.f32 %v125_v21, %v89_v24 }
  0x95   :  { %100 = vst.msk [vmem:[%s205_s3] sm:$0xff] %vm18_vm0, %v96_v23 }
  0x96   :  { %101 = vst.msk [vmem:[%s205_s3 + $0x8] sm:$0xff] %vm18_vm0, %v97_v25  ;;  %v90_v26 = vld [vmem:[#allocation2 + $0x10] sm:$0xff] }
  0x97   :  { %v98_v27 = vadd.f32 %v125_v21, %v90_v26  ;;  %v91_v28 = vld [vmem:[#allocation2 + $0x18] sm:$0xff] }
  0x98   :  { %v99_v29 = vadd.f32 %v125_v21, %v91_v28 }
  0x99   :  { %102 = vst.msk [vmem:[%s205_s3 + $0x10] sm:$0xff] %vm18_vm0, %v98_v27 }
  0x9a   :  { %103 = vst.msk [vmem:[%s205_s3 + $0x18] sm:$0xff] %vm18_vm0, %v99_v29 }

// kernel: encoder_layer_forward.5
= control target key start
LH: loop header
LB: loop body
LE: loop exit
PB: predicated region body
PF: predicated region fallthrough
CT: control target
= control target key end

     0   :  { %s1357_s27 = smov 0   ;;  %s1359_s28 = smov 0   ;;  %s1707_s0 = inlined_call_operand.vmem [shape: f32[2,16,32], index: 0, kind: input, shape index: {}]   ;;  %s1708_s1 = inlined_call_operand.vmem [shape: f32[128,16], index: 1, kind: input, shape index: {}]   ;;  %s1709_s2 = inlined_call_operand.vmem [shape: f32[128,1], index: 2, kind: input, shape index: {}]   ;;  %s1710_s3 = inlined_call_operand.vmem [shape: f32[32,32], index: 3, kind: input, shape index: {}]   ;;  %s1711_s4 = inlined_call_operand.vmem [shape: f32[1,32], index: 4, kind: input, shape index: {}]   ;;  %s1712_s5 = inlined_call_operand.vmem [shape: f32[32,32], index: 5, kind: input, shape index: {}]   ;;  %s1713_s6 = inlined_call_operand.vmem [shape: f32[1,32], index: 6, kind: input, shape index: {}]   ;;  %s1714_s7 = inlined_call_operand.vmem [shape: f32[2,128,32], index: 7, kind: output, shape index: {0}]   ;;  %s1715_s8 = inlined_call_operand.vmem [shape: f32[2,128,32], index: 8, kind: output, shape index: {1}]  }
   0x1   :  { %s1361_s29 = smov 0  }
   0x2 LB: > { %s38_s30 = sadd.s32 1, %s1304_s28  ;;  %p1185_p0 = scmp.ge.s32.totalorder %s1308_s29, 1  ;;  %s1308_s29 = sphi %s1361_s29, %s19_s29   ;;  %s1304_s28 = sphi %s1359_s28, %s1717_s28   ;;  %s1300_s27 = sphi %s1357_s27, %s1716_s27  }
   0x3   : > { %p40_p1 = scmp.ge.s32.totalorder %s38_s30, 2  ;;  %p322_p2 = scmp.lt.s32.totalorder %s1308_s29, 3 }
   0x5   : > { %s1719_s30 = smov (%p40_p1, %s38_s30), 0  ;;  %p323_p3 = pnand %p1185_p0, %p322_p2 }
   0x6   : > { %p387_p4 = scmp.lt.s32.totalorder (!%p323_p3), %s1300_s27, 1 }
   0x7   : > { %326 = sbr.rel (%p323_p3) target bundleno = 442 (0x1ba), region = 48 }
   0xc   : > { %s1721_s27 = smov (!%p387_p4, %s1300_s27), 1  ;;  %v468_v2 = vld [vmem:[%s1708_s1] sm:$0xff]  ;;  %vm486_vm0 = vcmask 130048   ;;  %v469_v3 = vld [vmem:[%s1708_s1 + $0x8] sm:$0xff]  ;;  %v470_v4 = vld [vmem:[%s1708_s1 + $0x10] sm:$0xff]  ;;  %vm435_vm1 = vcmask 261120  }
   0xd   : > { %s1242_s9 = sshll.u32 %s1721_s27, 4  ;;  %v471_v5 = vld [vmem:[%s1708_s1 + $0x18] sm:$0xff]  ;;  %v472_v6 = vld [vmem:[%s1708_s1 + $0x20] sm:$0xff]  ;;  %v473_v7 = vld [vmem:[%s1708_s1 + $0x28] sm:$0xff]  ;;  %v1310_v12 = vmov 0.0   ;;  %v1311_v27 = vmov 0  }
   0xe   : > { %s394_s12 = scalar_lea.vmem %s1707_s0, %s1242_s9  ;;  %v474_v8 = vld [vmem:[%s1708_s1 + $0x30] sm:$0xff]  ;;  %v475_v9 = vld [vmem:[%s1708_s1 + $0x38] sm:$0xff]  ;;  %v476_v10 = vld [vmem:[%s1708_s1 + $0x40] sm:$0xff]  ;;  %436 = vst.msk [vmem:[#allocation2] sm:$0xff] %vm435_vm1, %v1310_v12  ;;  %1281 = vset.pattern.permute.xlu0 %v1311_v27  ;;  %1282 = vset.pattern.permute.xlu1 %v1311_v27  ;;  %s1243_s23 = sshll.u32 %s1721_s27, 7 }
   0xf   : > { %v485_v0 = vld [vmem:[%s394_s12 + $0x8] sm:$0xff]  ;;  %v484_v1 = vld [vmem:[%s394_s12] sm:$0xff]  ;;  %437 = vst.msk [vmem:[#allocation2 + $0x8] sm:$0xff] %vm435_vm1, %v1310_v12  ;;  %v482_v14 = vld [vmem:[%s1708_s1 + $0x70] sm:$0xff]  ;;  %1283 = vset.pattern.permute.xlu2 %v1311_v27  ;;  %s1592_s10 = scalar_lea.vmem %s1714_s7, %s1243_s23  ;;  %s1602_s12 = scalar_lea.vmem %s1715_s8, %s1243_s23 }
  0x10   : > { %549 = vmatpush.msra.mxu0 %v485_v0  ;;  %1245 = vmatpush.msra.mxu3 %v485_v0  ;;  %v481_v11 = vld [vmem:[%s1708_s1 + $0x68] sm:$0xff]  ;;  %438 = vst.msk [vmem:[#allocation2 + $0x10] sm:$0xff] %vm435_vm1, %v1310_v12  ;;  %v478_v15 = vld [vmem:[%s1708_s1 + $0x50] sm:$0xff]  ;;  %v483_v16 = vld [vmem:[%s1708_s1 + $0x78] sm:$0xff] }
  0x11   : > { %439 = vst.msk [vmem:[#allocation2 + $0x18] sm:$0xff] %vm435_vm1, %v1310_v12  ;;  %v477_v13 = vld [vmem:[%s1708_s1 + $0x48] sm:$0xff]  ;;  %v479_v17 = vld [vmem:[%s1708_s1 + $0x58] sm:$0xff]  ;;  %v480_v18 = vld [vmem:[%s1708_s1 + $0x60] sm:$0xff] }
  0x12   : > { %550 = vmatpush.msra.mxu0 %v484_v1  ;;  %1246 = vmatpush.msra.mxu3 %v484_v1  ;;  %440 = vst.msk [vmem:[#allocation2 + $0x20] sm:$0xff] %vm435_vm1, %v1310_v12  ;;  %v671_v19 = vld [vmem:[%s1710_s3 + $0x18] sm:$0xff]  ;;  %v670_v21 = vld [vmem:[%s1710_s3 + $0x10] sm:$0xff]  ;;  %v669_v23 = vld [vmem:[%s1710_s3 + $0x8] sm:$0xff] }
  0x13   : > { %1192 = vmatmul.msk.f32.vlgmr.msra.gmra.mxu0 %vm486_vm0, %v468_v2  ;;  %1205 = vmatmul.msk.f32.vlgmr.msra.gmra.mxu3 %vm486_vm0, %v481_v11  ;;  %441 = vst.msk [vmem:[#allocation2 + $0x28] sm:$0xff] %vm435_vm1, %v1310_v12  ;;  %v888_v20 = vld [vmem:[%s1712_s5 + $0x18] sm:$0xff]  ;;  %v887_v22 = vld [vmem:[%s1712_s5 + $0x10] sm:$0xff]  ;;  %v886_v24 = vld [vmem:[%s1712_s5 + $0x8] sm:$0xff] }
  0x14   : > { %442 = vst.msk [vmem:[#allocation2 + $0x30] sm:$0xff] %vm435_vm1, %v1310_v12  ;;  %832 = vmatpush.msra.mxu1 %v671_v19  ;;  %921 = vmatpush.msra.mxu2 %v888_v20  ;;  %v668_v25 = vld [vmem:[%s1710_s3] sm:$0xff]  ;;  %v653_v29 = vld [vmem:[%s1709_s2 + $0x8] sm:$0xff]  ;;  %v654_v33 = vld [vmem:[%s1709_s2 + $0x10] sm:$0xff] }
  0x15   : > { %443 = vst.msk [vmem:[#allocation2 + $0x38] sm:$0xff] %vm435_vm1, %v1310_v12  ;;  %1247 = vmatpush.msrb.mxu3 %v671_v19  ;;  %v885_v26 = vld [vmem:[%s1712_s5] sm:$0xff]  ;;  %685 = vperm.xlu1 %1282, %v654_v33   ;;  %v655_v38 = vld [vmem:[%s1709_s2 + $0x18] sm:$0xff]  ;;  %v658_v51 = vld [vmem:[%s1709_s2 + $0x30] sm:$0xff] }
  0x16   : > { %444 = vst.msk [vmem:[#allocation2 + $0x40] sm:$0xff] %vm435_vm1, %v1310_v12  ;;  %833 = vmatpush.msra.mxu1 %v670_v21  ;;  %922 = vmatpush.msra.mxu2 %v887_v22  ;;  %v652_v28 = vld [vmem:[%s1709_s2] sm:$0xff]  ;;  %v453_v34 = vld [vmem:[#allocation2 + $0x8] sm:$0xff]  ;;  %v659_v57 = vld [vmem:[%s1709_s2 + $0x38] sm:$0xff] }
  0x17   : > { %445 = vst.msk [vmem:[#allocation2 + $0x48] sm:$0xff] %vm435_vm1, %v1310_v12  ;;  %1248 = vmatpush.msrb.mxu3 %v670_v21  ;;  %675 = vperm.xlu0 %1281, %v652_v28   ;;  %v452_v30 = vld [vmem:[#allocation2] sm:$0xff]  ;;  %v454_v39 = vld [vmem:[#allocation2 + $0x10] sm:$0xff]  ;;  %v657_v62 = vld [vmem:[%s1709_s2 + $0x28] sm:$0xff] }
  0x18   : > { %446 = vst.msk [vmem:[#allocation2 + $0x50] sm:$0xff] %vm435_vm1, %v1310_v12  ;;  %834 = vmatpush.msra.mxu1 %v669_v23  ;;  %923 = vmatpush.msra.mxu2 %v886_v24  ;;  %v455_v43 = vld [vmem:[#allocation2 + $0x18] sm:$0xff]  ;;  %v656_v56 = vld [vmem:[%s1709_s2 + $0x20] sm:$0xff] }
  0x19   : > { %447 = vst.msk [vmem:[#allocation2 + $0x58] sm:$0xff] %vm435_vm1, %v1310_v12  ;;  %1249 = vmatpush.msrb.mxu3 %v669_v23  ;;  %v456_v47 = vld [vmem:[#allocation2 + $0x20] sm:$0xff]  ;;  %695 = vperm.xlu2 %1283, %v656_v56  }
  0x1a   : > { %448 = vst.msk [vmem:[#allocation2 + $0x60] sm:$0xff] %vm435_vm1, %v1310_v12  ;;  %835 = vmatpush.msra.mxu1 %v668_v25  ;;  %924 = vmatpush.msra.mxu2 %v885_v26  ;;  %v457_v52 = vld [vmem:[#allocation2 + $0x28] sm:$0xff] }
  0x1b   : > { %1193 = vmatmul.msk.f32.gmra.mxu0 %vm486_vm0, %v469_v3  ;;  %1206 = vmatmul.msk.f32.gmra.mxu3 %vm486_vm0, %v482_v14  ;;  %449 = vst.msk [vmem:[#allocation2 + $0x68] sm:$0xff] %vm435_vm1, %v1310_v12  ;;  %v458_v58 = vld [vmem:[#allocation2 + $0x30] sm:$0xff]  ;;  %v661_v3 = vld [vmem:[%s1709_s2 + $0x48] sm:$0xff] }
  0x1c   : > { %450 = vst.msk [vmem:[#allocation2 + $0x70] sm:$0xff] %vm435_vm1, %v1310_v12  ;;  %1250 = vmatpush.msrb.mxu3 %v668_v25  ;;  %v459_v63 = vld [vmem:[#allocation2 + $0x38] sm:$0xff] }
  0x1d   : > { %451 = vst.msk [vmem:[#allocation2 + $0x78] sm:$0xff] %vm435_vm1, %v1310_v12  ;;  %690 = vperm.xlu1 %1282, %v655_v38   ;;  %v667_v38 = vld [vmem:[%s1709_s2 + $0x78] sm:$0xff] }
  0x1e   : > { %1251 = vmatpush.msra.mxu3 %v888_v20 }
  0x1f   : > { %680 = vperm.xlu0 %1281, %v653_v29  }
  0x20   : > { %1252 = vmatpush.msra.mxu3 %v887_v22 }
  0x21   : > { %700 = vperm.xlu2 %1283, %v657_v62   ;;  %v464_v33 = vld [vmem:[#allocation2 + $0x60] sm:$0xff] }
  0x22   : > { %1253 = vmatpush.msra.mxu3 %v886_v24  ;;  %v664_v24 = vld [vmem:[%s1709_s2 + $0x60] sm:$0xff] }
  0x23   : > { %1194 = vmatmul.msk.f32.gmra.mxu0 %vm486_vm0, %v470_v4  ;;  %1207 = vmatmul.msk.f32.gmra.mxu3 %vm486_vm0, %v483_v16  ;;  %v460_v4 = vld [vmem:[#allocation2 + $0x40] sm:$0xff] }
  0x24   : > { %1254 = vmatpush.msra.mxu3 %v885_v26  ;;  %v660_v16 = vld [vmem:[%s1709_s2 + $0x40] sm:$0xff]  ;;  %v467_v25 = vld [vmem:[#allocation2 + $0x78] sm:$0xff] }
  0x25   : > { %710 = vperm.xlu1 %1282, %v659_v57   ;;  %v463_v26 = vld [vmem:[#allocation2 + $0x58] sm:$0xff] }
  0x27   : > { %705 = vperm.xlu0 %1281, %v658_v51  }
  0x29   : > { %715 = vperm.xlu2 %1283, %v660_v16  }
  0x2b   : > { %1195 = vmatmul.msk.f32.gmra.mxu0 %vm486_vm0, %v471_v5 }
  0x2f   : > { %720 = vperm.xlu0 %1281, %v661_v3  }
  0x33   : > { %1196 = vmatmul.msk.f32.gmra.mxu0 %vm486_vm0, %v472_v6 }
  0x37   : > { %735 = vperm.xlu0 %1281, %v664_v24  }
  0x3b   : > { %1197 = vmatmul.msk.f32.gmra.mxu0 %vm486_vm0, %v473_v7 }
  0x3f   : > { %750 = vperm.xlu0 %1281, %v667_v38  }
  0x43   : > { %1198 = vmatmul.msk.f32.gmra.mxu0 %vm486_vm0, %v474_v8  ;;  %v662_v8 = vld [vmem:[%s1709_s2 + $0x50] sm:$0xff] }
  0x44   : > { %725 = vperm.xlu1 %1282, %v662_v8  }
  0x4b   : > { %1199 = vmatmul.msk.f32.gmra.mxu0 %vm486_vm0, %v475_v9  ;;  %v465_v9 = vld [vmem:[#allocation2 + $0x68] sm:$0xff] }
  0x53   : > { %1200 = vmatmul.msk.f32.gmra.mxu0 %vm486_vm0, %v476_v10  ;;  %v461_v10 = vld [vmem:[#allocation2 + $0x48] sm:$0xff] }
  0x5b   : > { %1201 = vmatmul.msk.f32.gmra.mxu0 %vm486_vm0, %v477_v13 }
  0x63   : > { %1202 = vmatmul.msk.f32.gmra.mxu0 %vm486_vm0, %v478_v15 }
  0x6b   : > { %1203 = vmatmul.msk.f32.gmra.mxu0 %vm486_vm0, %v479_v17  ;;  %v466_v17 = vld [vmem:[#allocation2 + $0x70] sm:$0xff] }
  0x73   : > { %1204 = vmatmul.msk.f32.gmra.mxu0 %vm486_vm0, %v480_v18  ;;  %v462_v18 = vld [vmem:[#allocation2 + $0x50] sm:$0xff] }
  0x87   : > { %v686_v56 = vpop.permute.xlu1 %685 }
  0x90   : > { %v552_v31 = vpop.f32.mrf.mxu0 }
  0x91   : > { %v600_v32 = vadd.f32 %v552_v31, %v452_v30 }
  0x93   : > { %617 = vst.msk [vmem:[#allocation2] sm:$0xff] %vm435_vm1, %v600_v32  ;;  %v665_v32 = vld [vmem:[%s1709_s2 + $0x68] sm:$0xff] }
  0x94   : > { %740 = vperm.xlu1 %1282, %v665_v32  }
  0x96   : > { %v591_v11 = vpop.f32.mrf.mxu3 }
  0x97   : > { %v613_v13 = vadd.f32 %v591_v11, %v465_v9 }
  0x98   : > { %v555_v35 = vpop.f32.mrf.mxu0 }
  0x99   : > { %v601_v36 = vadd.f32 %v555_v35, %v453_v34  ;;  %630 = vst.msk [vmem:[#allocation2 + $0x68] sm:$0xff] %vm435_vm1, %v613_v13 }
  0x9a   : > { %v636_v37 = vld [vmem:[#allocation2] sm:$0xff] }
  0x9b   : > { %618 = vst.msk [vmem:[#allocation2 + $0x8] sm:$0xff] %vm435_vm1, %v601_v36  ;;  %1208 = vmatmul.msk.f32.vlgmr.msra.gmra.mxu1 %vm435_vm1, %v636_v37  ;;  %1224 = vmatmul.msk.f32.vlgmr.msra.gmra.mxu2 %vm435_vm1, %v636_v37  ;;  %v663_v37 = vld [vmem:[%s1709_s2 + $0x58] sm:$0xff] }
  0x9c   : > { %730 = vperm.xlu2 %1283, %v663_v37  }
  0x9e   : > { %v594_v19 = vpop.f32.mrf.mxu3 }
  0x9f   : > { %v614_v21 = vadd.f32 %v594_v19, %v466_v17 }
  0xa0   : > { %v558_v40 = vpop.f32.mrf.mxu0 }
  0xa1   : > { %v602_v41 = vadd.f32 %v558_v40, %v454_v39  ;;  %631 = vst.msk [vmem:[#allocation2 + $0x70] sm:$0xff] %vm435_vm1, %v614_v21  ;;  %v649_v40 = vld [vmem:[#allocation2 + $0x68] sm:$0xff] }
  0xa2   : > { %v637_v42 = vld [vmem:[#allocation2 + $0x8] sm:$0xff] }
  0xa3   : > { %619 = vst.msk [vmem:[#allocation2 + $0x10] sm:$0xff] %vm435_vm1, %v602_v41  ;;  %1209 = vmatmul.msk.f32.gmra.mxu1 %vm435_vm1, %v637_v42  ;;  %1225 = vmatmul.msk.f32.gmra.mxu2 %vm435_vm1, %v637_v42 }
  0xa6   : > { %v597_v27 = vpop.f32.mrf.mxu3 }
  0xa7   : > { %v615_v29 = vadd.f32 %v597_v27, %v467_v25 }
  0xa8   : > { %v561_v44 = vpop.f32.mrf.mxu0  ;;  %v650_v41 = vld [vmem:[#allocation2 + $0x70] sm:$0xff] }
  0xa9   : > { %v603_v45 = vadd.f32 %v561_v44, %v455_v43  ;;  %632 = vst.msk [vmem:[#allocation2 + $0x78] sm:$0xff] %vm435_vm1, %v615_v29  ;;  %v676_v43 = vpop.permute.xlu0 %675  ;;  %v1576_v44 = vld [vmem:[%s1711_s4] ss:$0 sm:$0xff] }
  0xaa   : > { %v638_v46 = vld [vmem:[#allocation2 + $0x10] sm:$0xff] }
  0xab   : > { %620 = vst.msk [vmem:[#allocation2 + $0x18] sm:$0xff] %vm435_vm1, %v603_v45  ;;  %1210 = vmatmul.msk.f32.gmra.mxu1 %vm435_vm1, %v638_v46  ;;  %1226 = vmatmul.msk.f32.gmra.mxu2 %vm435_vm1, %v638_v46  ;;  %v666_v45 = vld [vmem:[%s1709_s2 + $0x70] sm:$0xff]  ;;  %v756_v46 = vmul.f32 %v1576_v44, %v676_v43 }
  0xac   : > { %745 = vperm.xlu2 %1283, %v666_v45  }
  0xb0   : > { %v564_v48 = vpop.f32.mrf.mxu0  ;;  %v651_v42 = vld [vmem:[#allocation2 + $0x78] sm:$0xff] }
  0xb1   : > { %v604_v49 = vadd.f32 %v564_v48, %v456_v47  ;;  %v1587_v47 = vld [vmem:[%s1713_s6] ss:$0 sm:$0xff] }
  0xb2   : > { %v639_v50 = vld [vmem:[#allocation2 + $0x18] sm:$0xff]  ;;  %v893_v51 = vmul.f32 %v1587_v47, %v676_v43 }
  0xb3   : > { %621 = vst.msk [vmem:[#allocation2 + $0x20] sm:$0xff] %vm435_vm1, %v604_v49  ;;  %1211 = vmatmul.msk.f32.gmra.mxu1 %vm435_vm1, %v639_v50  ;;  %1227 = vmatmul.msk.f32.gmra.mxu2 %vm435_vm1, %v639_v50  ;;  %v681_v50 = vpop.permute.xlu0 %680 }
  0xb8   : > { %v567_v53 = vpop.f32.mrf.mxu0 }
  0xb9   : > { %v605_v54 = vadd.f32 %v567_v53, %v457_v52  ;;  %v757_v52 = vmul.f32 %v1576_v44, %v681_v50 }
  0xba   : > { %v640_v55 = vld [vmem:[#allocation2 + $0x20] sm:$0xff] }
  0xbb   : > { %622 = vst.msk [vmem:[#allocation2 + $0x28] sm:$0xff] %vm435_vm1, %v605_v54  ;;  %1212 = vmatmul.msk.f32.gmra.mxu1 %vm435_vm1, %v640_v55  ;;  %1228 = vmatmul.msk.f32.gmra.mxu2 %vm435_vm1, %v640_v55  ;;  %v706_v21 = vpop.permute.xlu0 %705 }
  0xbc   : > { %v899_v29 = vmul.f32 %v1587_v47, %v706_v21 }
  0xc0   : > { %v570_v59 = vpop.f32.mrf.mxu0 }
  0xc1   : > { %v606_v60 = vadd.f32 %v570_v59, %v458_v58  ;;  %v894_v58 = vmul.f32 %v1587_v47, %v681_v50  ;;  %v758_v59 = vmul.f32 %v1576_v44, %v686_v56 }
  0xc2   : > { %v641_v61 = vld [vmem:[#allocation2 + $0x28] sm:$0xff] }
  0xc3   : > { %623 = vst.msk [vmem:[#allocation2 + $0x30] sm:$0xff] %vm435_vm1, %v606_v60  ;;  %1213 = vmatmul.msk.f32.gmra.mxu1 %vm435_vm1, %v641_v61  ;;  %1229 = vmatmul.msk.f32.gmra.mxu2 %vm435_vm1, %v641_v61 }
  0xc8   : > { %v573_v0 = vpop.f32.mrf.mxu0 }
  0xc9   : > { %v607_v1 = vadd.f32 %v573_v0, %v459_v63  ;;  %v691_v0 = vpop.permute.xlu1 %690 }
  0xca   : > { %v642_v2 = vld [vmem:[#allocation2 + $0x30] sm:$0xff]  ;;  %v896_v8 = vmul.f32 %v1587_v47, %v691_v0 }
  0xcb   : > { %624 = vst.msk [vmem:[#allocation2 + $0x38] sm:$0xff] %vm435_vm1, %v607_v1  ;;  %1214 = vmatmul.msk.f32.gmra.mxu1 %vm435_vm1, %v642_v2  ;;  %1230 = vmatmul.msk.f32.gmra.mxu2 %vm435_vm1, %v642_v2  ;;  %v895_v1 = vmul.f32 %v1587_v47, %v686_v56  ;;  %v759_v2 = vmul.f32 %v1576_v44, %v691_v0 }
  0xd0   : > { %v576_v5 = vpop.f32.mrf.mxu0 }
  0xd1   : > { %v608_v6 = vadd.f32 %v576_v5, %v460_v4 }
  0xd2   : > { %v643_v7 = vld [vmem:[#allocation2 + $0x38] sm:$0xff] }
  0xd3   : > { %625 = vst.msk [vmem:[#allocation2 + $0x40] sm:$0xff] %vm435_vm1, %v608_v6  ;;  %1215 = vmatmul.msk.f32.gmra.mxu1 %vm435_vm1, %v643_v7  ;;  %1231 = vmatmul.msk.f32.gmra.mxu2 %vm435_vm1, %v643_v7  ;;  %v696_v6 = vpop.permute.xlu2 %695 }
  0xd4   : > { %v760_v9 = vmul.f32 %v1576_v44, %v696_v6 }
  0xd8   : > { %v579_v12 = vpop.f32.mrf.mxu0 }
  0xd9   : > { %v609_v14 = vadd.f32 %v579_v12, %v461_v10 }
  0xda   : > { %v644_v15 = vld [vmem:[#allocation2 + $0x40] sm:$0xff] }
  0xdb   : > { %626 = vst.msk [vmem:[#allocation2 + $0x48] sm:$0xff] %vm435_vm1, %v609_v14  ;;  %1216 = vmatmul.msk.f32.gmra.mxu1 %vm435_vm1, %v644_v15  ;;  %1232 = vmatmul.msk.f32.gmra.mxu2 %vm435_vm1, %v644_v15  ;;  %v701_v14 = vpop.permute.xlu2 %700  ;;  %v897_v15 = vmul.f32 %v1587_v47, %v696_v6 }
  0xdc   : > { %v761_v16 = vmul.f32 %v1576_v44, %v701_v14 }
  0xe0   : > { %v582_v20 = vpop.f32.mrf.mxu0 }
  0xe1   : > { %v610_v22 = vadd.f32 %v582_v20, %v462_v18 }
  0xe2   : > { %v645_v23 = vld [vmem:[#allocation2 + $0x48] sm:$0xff] }
  0xe3   : > { %627 = vst.msk [vmem:[#allocation2 + $0x50] sm:$0xff] %vm435_vm1, %v610_v22  ;;  %1217 = vmatmul.msk.f32.gmra.mxu1 %vm435_vm1, %v645_v23  ;;  %1233 = vmatmul.msk.f32.gmra.mxu2 %vm435_vm1, %v645_v23  ;;  %v898_v22 = vmul.f32 %v1587_v47, %v701_v14  ;;  %v762_v23 = vmul.f32 %v1576_v44, %v706_v21 }
  0xe8   : > { %v585_v28 = vpop.f32.mrf.mxu0 }
  0xe9   : > { %v611_v30 = vadd.f32 %v585_v28, %v463_v26  ;;  %v711_v28 = vpop.permute.xlu1 %710 }
  0xea   : > { %v646_v31 = vld [vmem:[#allocation2 + $0x50] sm:$0xff] }
  0xeb   : > { %628 = vst.msk [vmem:[#allocation2 + $0x58] sm:$0xff] %vm435_vm1, %v611_v30  ;;  %1218 = vmatmul.msk.f32.gmra.mxu1 %vm435_vm1, %v646_v31  ;;  %1234 = vmatmul.msk.f32.gmra.mxu2 %vm435_vm1, %v646_v31  ;;  %v763_v30 = vmul.f32 %v1576_v44, %v711_v28 }
  0xf0   : > { %v588_v34 = vpop.f32.mrf.mxu0 }
  0xf1   : > { %v612_v35 = vadd.f32 %v588_v34, %v464_v33 }
  0xf2   : > { %v647_v36 = vld [vmem:[#allocation2 + $0x58] sm:$0xff] }
  0xf3   : > { %629 = vst.msk [vmem:[#allocation2 + $0x60] sm:$0xff] %vm435_vm1, %v612_v35  ;;  %1219 = vmatmul.msk.f32.gmra.mxu1 %vm435_vm1, %v647_v36  ;;  %1235 = vmatmul.msk.f32.gmra.mxu2 %vm435_vm1, %v647_v36  ;;  %v716_v35 = vpop.permute.xlu2 %715  ;;  %v900_v36 = vmul.f32 %v1587_v47, %v711_v28 }
  0xf4   : > { %v764_v37 = vmul.f32 %v1576_v44, %v716_v35  ;;  %v901_v43 = vmul.f32 %v1587_v47, %v716_v35 }
  0xfa   : > { %v648_v39 = vld [vmem:[#allocation2 + $0x60] sm:$0xff] }
  0xfb   : > { %1220 = vmatmul.msk.f32.vlgmr.msrb.gmra.mxu3 %vm435_vm1, %v648_v39 }
 0x103   : > { %1221 = vmatmul.msk.f32.gmra.mxu3 %vm435_vm1, %v649_v40 }
 0x10b   : > { %1222 = vmatmul.msk.f32.gmra.mxu3 %vm435_vm1, %v650_v41 }
 0x113   : > { %1223 = vmatmul.msk.f32.gmra.mxu3 %vm435_vm1, %v651_v42 }
 0x118   : > { %v837_v48 = vpop.f32.mrf.mxu1 }
 0x119   : > { %v838_v49 = vadd.f32 %v837_v48, %v756_v46 }
 0x11b   : > { %974 = vst.msk [vmem:[%s1592_s10] sm:$0xff] %vm435_vm1, %v838_v49  ;;  %1236 = vmatmul.msk.f32.vlgmr.msra.gmra.mxu3 %vm435_vm1, %v648_v39 }
 0x11e   : > { %v926_v53 = vpop.f32.mrf.mxu2 }
 0x11f   : > { %v927_v54 = vadd.f32 %v926_v53, %v893_v51  ;;  %v726_v51 = vpop.permute.xlu1 %725 }
 0x120   : > { %v840_v55 = vpop.f32.mrf.mxu1  ;;  %v766_v53 = vmul.f32 %v1576_v44, %v726_v51 }
 0x121   : > { %990 = vst.msk [vmem:[%s1602_s12] sm:$0xff] %vm435_vm1, %v927_v54  ;;  %v841_v57 = vadd.f32 %v840_v55, %v757_v52 }
 0x123   : > { %975 = vst.msk [vmem:[%s1592_s10 + $0x8] sm:$0xff] %vm435_vm1, %v841_v57  ;;  %1237 = vmatmul.msk.f32.gmra.mxu3 %vm435_vm1, %v649_v40 }
 0x126   : > { %v929_v60 = vpop.f32.mrf.mxu2 }
 0x127   : > { %v930_v61 = vadd.f32 %v929_v60, %v894_v58  ;;  %v731_v58 = vpop.permute.xlu2 %730 }
 0x128   : > { %v843_v62 = vpop.f32.mrf.mxu1  ;;  %v767_v60 = vmul.f32 %v1576_v44, %v731_v58 }
 0x129   : > { %991 = vst.msk [vmem:[%s1602_s12 + $0x8] sm:$0xff] %vm435_vm1, %v930_v61  ;;  %v844_v63 = vadd.f32 %v843_v62, %v758_v59  ;;  %v903_v59 = vmul.f32 %v1587_v47, %v726_v51 }
 0x12b   : > { %976 = vst.msk [vmem:[%s1592_s10 + $0x10] sm:$0xff] %vm435_vm1, %v844_v63  ;;  %1238 = vmatmul.msk.f32.gmra.mxu3 %vm435_vm1, %v650_v41 }
 0x12e   : > { %v932_v3 = vpop.f32.mrf.mxu2 }
 0x12f   : > { %v933_v4 = vadd.f32 %v932_v3, %v895_v1  ;;  %v904_v1 = vmul.f32 %v1587_v47, %v731_v58 }
 0x130   : > { %v846_v5 = vpop.f32.mrf.mxu1 }
 0x131   : > { %992 = vst.msk [vmem:[%s1602_s12 + $0x10] sm:$0xff] %vm435_vm1, %v933_v4  ;;  %v847_v7 = vadd.f32 %v846_v5, %v759_v2 }
 0x133   : > { %977 = vst.msk [vmem:[%s1592_s10 + $0x18] sm:$0xff] %vm435_vm1, %v847_v7  ;;  %1239 = vmatmul.msk.f32.gmra.mxu3 %vm435_vm1, %v651_v42  ;;  %v721_v42 = vpop.permute.xlu0 %720 }
 0x134   : > { %v765_v45 = vmul.f32 %v1576_v44, %v721_v42  ;;  %v902_v52 = vmul.f32 %v1587_v47, %v721_v42 }
 0x136   : > { %v935_v10 = vpop.f32.mrf.mxu2 }
 0x137   : > { %v936_v11 = vadd.f32 %v935_v10, %v896_v8  ;;  %v741_v8 = vpop.permute.xlu1 %740 }
 0x138   : > { %v849_v12 = vpop.f32.mrf.mxu1 }
 0x139   : > { %993 = vst.msk [vmem:[%s1602_s12 + $0x18] sm:$0xff] %vm435_vm1, %v936_v11  ;;  %v850_v13 = vadd.f32 %v849_v12, %v760_v9  ;;  %v769_v9 = vmul.f32 %v1576_v44, %v741_v8  ;;  %v746_v12 = vpop.permute.xlu2 %745 }
 0x13b   : > { %978 = vst.msk [vmem:[%s1592_s10 + $0x20] sm:$0xff] %vm435_vm1, %v850_v13  ;;  %v736_v4 = vpop.permute.xlu0 %735  ;;  %v770_v13 = vmul.f32 %v1576_v44, %v746_v12 }
 0x13c   : > { %v768_v5 = vmul.f32 %v1576_v44, %v736_v4 }
 0x13e   : > { %v938_v17 = vpop.f32.mrf.mxu2 }
 0x13f   : > { %v939_v18 = vadd.f32 %v938_v17, %v897_v15 }
 0x140   : > { %v852_v19 = vpop.f32.mrf.mxu1 }
 0x141   : > { %994 = vst.msk [vmem:[%s1602_s12 + $0x20] sm:$0xff] %vm435_vm1, %v939_v18  ;;  %v853_v20 = vadd.f32 %v852_v19, %v761_v16 }
 0x143   : > { %979 = vst.msk [vmem:[%s1592_s10 + $0x28] sm:$0xff] %vm435_vm1, %v853_v20  ;;  %v751_v16 = vpop.permute.xlu0 %750  ;;  %v905_v20 = vmul.f32 %v1587_v47, %v736_v4 }
 0x144   : > { %v771_v17 = vmul.f32 %v1576_v44, %v751_v16  ;;  %v908_v28 = vmul.f32 %v1587_v47, %v751_v16 }
 0x146   : > { %v941_v24 = vpop.f32.mrf.mxu2 }
 0x147   : > { %v942_v25 = vadd.f32 %v941_v24, %v898_v22 }
 0x148   : > { %v855_v26 = vpop.f32.mrf.mxu1 }
 0x149   : > { %995 = vst.msk [vmem:[%s1602_s12 + $0x28] sm:$0xff] %vm435_vm1, %v942_v25  ;;  %v856_v27 = vadd.f32 %v855_v26, %v762_v23  ;;  %v906_v23 = vmul.f32 %v1587_v47, %v741_v8  ;;  %v907_v26 = vmul.f32 %v1587_v47, %v746_v12 }
 0x14b   : > { %980 = vst.msk [vmem:[%s1592_s10 + $0x30] sm:$0xff] %vm435_vm1, %v856_v27 }
 0x14e   : > { %v944_v31 = vpop.f32.mrf.mxu2 }
 0x14f   : > { %v945_v32 = vadd.f32 %v944_v31, %v899_v29 }
 0x150   : > { %v858_v33 = vpop.f32.mrf.mxu1 }
 0x151   : > { %996 = vst.msk [vmem:[%s1602_s12 + $0x30] sm:$0xff] %vm435_vm1, %v945_v32  ;;  %v859_v34 = vadd.f32 %v858_v33, %v763_v30 }
 0x153   : > { %981 = vst.msk [vmem:[%s1592_s10 + $0x38] sm:$0xff] %vm435_vm1, %v859_v34 }
 0x156   : > { %v947_v38 = vpop.f32.mrf.mxu2 }
 0x157   : > { %v948_v39 = vadd.f32 %v947_v38, %v900_v36 }
 0x158   : > { %v861_v40 = vpop.f32.mrf.mxu1 }
 0x159   : > { %997 = vst.msk [vmem:[%s1602_s12 + $0x38] sm:$0xff] %vm435_vm1, %v948_v39  ;;  %v862_v41 = vadd.f32 %v861_v40, %v764_v37 }
 0x15b   : > { %982 = vst.msk [vmem:[%s1592_s10 + $0x40] sm:$0xff] %vm435_vm1, %v862_v41 }
 0x15e   : > { %v950_v46 = vpop.f32.mrf.mxu2 }
 0x15f   : > { %v951_v48 = vadd.f32 %v950_v46, %v901_v43 }
 0x160   : > { %v864_v49 = vpop.f32.mrf.mxu1 }
 0x161   : > { %998 = vst.msk [vmem:[%s1602_s12 + $0x40] sm:$0xff] %vm435_vm1, %v951_v48  ;;  %v865_v50 = vadd.f32 %v864_v49, %v765_v45 }
 0x163   : > { %983 = vst.msk [vmem:[%s1592_s10 + $0x48] sm:$0xff] %vm435_vm1, %v865_v50 }
 0x166   : > { %v953_v54 = vpop.f32.mrf.mxu2 }
 0x167   : > { %v954_v55 = vadd.f32 %v953_v54, %v902_v52 }
 0x168   : > { %v867_v56 = vpop.f32.mrf.mxu1 }
 0x169   : > { %999 = vst.msk [vmem:[%s1602_s12 + $0x48] sm:$0xff] %vm435_vm1, %v954_v55  ;;  %v868_v57 = vadd.f32 %v867_v56, %v766_v53 }
 0x16b   : > { %984 = vst.msk [vmem:[%s1592_s10 + $0x50] sm:$0xff] %vm435_vm1, %v868_v57 }
 0x16e   : > { %v956_v61 = vpop.f32.mrf.mxu2 }
 0x16f   : > { %v957_v62 = vadd.f32 %v956_v61, %v903_v59 }
 0x170   : > { %v870_v63 = vpop.f32.mrf.mxu1 }
 0x171   : > { %1000 = vst.msk [vmem:[%s1602_s12 + $0x50] sm:$0xff] %vm435_vm1, %v957_v62  ;;  %v871_v0 = vadd.f32 %v870_v63, %v767_v60 }
 0x173   : > { %985 = vst.msk [vmem:[%s1592_s10 + $0x58] sm:$0xff] %vm435_vm1, %v871_v0 }
 0x176   : > { %v959_v2 = vpop.f32.mrf.mxu2 }
 0x177   : > { %v960_v3 = vadd.f32 %v959_v2, %v904_v1 }
 0x179   : > { %1001 = vst.msk [vmem:[%s1602_s12 + $0x58] sm:$0xff] %vm435_vm1, %v960_v3 }
 0x17e   : > { %v873_v6 = vpop.f32.mrf.mxu3 }
 0x17f   : > { %v874_v7 = vadd.f32 %v873_v6, %v768_v5 }
 0x181   : > { %986 = vst.msk [vmem:[%s1592_s10 + $0x60] sm:$0xff] %vm435_vm1, %v874_v7 }
 0x186   : > { %v876_v10 = vpop.f32.mrf.mxu3 }
 0x187   : > { %v877_v11 = vadd.f32 %v876_v10, %v769_v9 }
 0x189   : > { %987 = vst.msk [vmem:[%s1592_s10 + $0x68] sm:$0xff] %vm435_vm1, %v877_v11 }
 0x18e   : > { %v879_v14 = vpop.f32.mrf.mxu3 }
 0x18f   : > { %v880_v15 = vadd.f32 %v879_v14, %v770_v13 }
 0x191   : > { %988 = vst.msk [vmem:[%s1592_s10 + $0x70] sm:$0xff] %vm435_vm1, %v880_v15 }
 0x196   : > { %v882_v18 = vpop.f32.mrf.mxu3 }
 0x197   : > { %v883_v19 = vadd.f32 %v882_v18, %v771_v17 }
 0x199   : > { %989 = vst.msk [vmem:[%s1592_s10 + $0x78] sm:$0xff] %vm435_vm1, %v883_v19 }
 0x19e   : > { %v962_v21 = vpop.f32.mrf.mxu3 }
 0x19f   : > { %v963_v22 = vadd.f32 %v962_v21, %v905_v20 }
 0x1a1   : > { %1002 = vst.msk [vmem:[%s1602_s12 + $0x60] sm:$0xff] %vm435_vm1, %v963_v22 }
 0x1a6   : > { %v965_v24 = vpop.f32.mrf.mxu3 }
 0x1a7   : > { %v966_v25 = vadd.f32 %v965_v24, %v906_v23 }
 0x1a9   : > { %1003 = vst.msk [vmem:[%s1602_s12 + $0x68] sm:$0xff] %vm435_vm1, %v966_v25 }
 0x1ae   : > { %v968_v44 = vpop.f32.mrf.mxu3 }
 0x1af   : > { %v969_v27 = vadd.f32 %v968_v44, %v907_v26 }
 0x1b1   : > { %1004 = vst.msk [vmem:[%s1602_s12 + $0x70] sm:$0xff] %vm435_vm1, %v969_v27 }
 0x1b6   : > { %v971_v29 = vpop.f32.mrf.mxu3 }
 0x1b7   : > { %v972_v30 = vadd.f32 %v971_v29, %v908_v28 }
 0x1b9   : > { %1005 = vst.msk [vmem:[%s1602_s12 + $0x78] sm:$0xff] %vm435_vm1, %v972_v30 }
 0x1ba PF: > { %s19_s29 = sadd.s32 1, %s1308_s29   ;;  %s1716_s27 = smov %s1304_s28 }
 0x1bb   : > { %p16_p5 = scmp.ge.s32.totalorder %s19_s29, 4   ;;  %s1717_s28 = smov %s1719_s30 }
 0x1bd   :  { %18 = sbr.rel (!%p16_p5) target bundleno = 2 (0x2), region = 104 }

// kernel: encoder_layer_forward.7
= control target key start
LH: loop header
LB: loop body
LE: loop exit
PB: predicated region body
PF: predicated region fallthrough
CT: control target
= control target key end

     0   :  { %vm31_vm0 = vcmask 261120   ;;  %s545_s0 = inlined_call_operand.vmem [shape: f32[32,32], index: 0, kind: input, shape index: {}]   ;;  %s546_s1 = inlined_call_operand.vmem [shape: f32[32,64], index: 1, kind: input, shape index: {}]   ;;  %s547_s2 = inlined_call_operand.vmem [shape: f32[1,64], index: 2, kind: input, shape index: {}]   ;;  %s548_s3 = inlined_call_operand.vmem [shape: f32[64,32], index: 3, kind: input, shape index: {}]   ;;  %s549_s4 = inlined_call_operand.vmem [shape: f32[1,32], index: 4, kind: input, shape index: {}]   ;;  %s550_s5 = inlined_call_operand.vmem [shape: f32[1,32], index: 5, kind: input, shape index: {}]   ;;  %s551_s6 = inlined_call_operand.vmem [shape: f32[1,32], index: 6, kind: input, shape index: {}]   ;;  %s552_s7 = inlined_call_operand.hbm [shape: f32[32,32], index: 7, kind: output, shape index: {}]  }
   0x1   :  { %v43_v0 = vld [vmem:[%s546_s1 + $0x18] sm:$0xff]  ;;  %v42_v1 = vld [vmem:[%s546_s1 + $0x10] sm:$0xff]  ;;  %v41_v2 = vld [vmem:[%s546_s1 + $0x8] sm:$0xff] }
   0x2   :  { %73 = vmatpush.msra.mxu0 %v43_v0  ;;  %320 = vmatpush.msra.mxu3 %v43_v0  ;;  %v105_v3 = vld [vmem:[%s548_s3 + $0x38] sm:$0xff]  ;;  %v40_v4 = vld [vmem:[%s546_s1] sm:$0xff]  ;;  %v104_v5 = vld [vmem:[%s548_s3 + $0x30] sm:$0xff] }
   0x3   :  { %v443_v6 = vld [vmem:[%s545_s0] sm:$0xff]  ;;  %v448_v7 = vld [vmem:[%s545_s0 + $0x8] sm:$0xff]  ;;  %127 = vmatpush.msra.mxu1 %v105_v3  ;;  %324 = vmatpush.msra.mxu2 %v105_v3 }
   0x4   :  { %74 = vmatpush.msra.mxu0 %v42_v1  ;;  %321 = vmatpush.msra.mxu3 %v42_v1  ;;  %v103_v8 = vld [vmem:[%s548_s3 + $0x28] sm:$0xff] }
   0x5   :  { %128 = vmatpush.msra.mxu1 %v104_v5  ;;  %325 = vmatpush.msra.mxu2 %v104_v5 }
   0x6   :  { %75 = vmatpush.msra.mxu0 %v41_v2  ;;  %322 = vmatpush.msra.mxu3 %v41_v2 }
   0x7   :  { %12 = vsyncpa [#allocation4], 0  ;;  %v102_v9 = vld [vmem:[%s548_s3 + $0x20] sm:$0xff]  ;;  %129 = vmatpush.msra.mxu1 %v103_v8  ;;  %326 = vmatpush.msra.mxu2 %v103_v8  ;;  %v101_v10 = vld [vmem:[%s548_s3 + $0x18] sm:$0xff]  ;;  %v377_v16 = vmov 0.0   ;;  %vm106_vm1 = vcmask 523264  }
   0x8   :  { %76 = vmatpush.msra.mxu0 %v40_v4  ;;  %323 = vmatpush.msra.mxu3 %v40_v4  ;;  %v466_v11 = vld [vmem:[%s545_s0 + $0x10] sm:$0xff]  ;;  %v473_v12 = vld [vmem:[%s545_s0 + $0x18] sm:$0xff]  ;;  %v99_v14 = vld [vmem:[%s548_s3 + $0x8] sm:$0xff]  ;;  %32 = vst.msk [vmem:[#allocation2] sm:$0xff] %vm31_vm0, %v377_v16  ;;  %v378_v59 = vmov 32.0   ;;  %s300_s15 = sshll.u32 %s552_s7, 4  ;;  %s301_s15 = int_to_ptr.hbm [resolvable:$true] %s300_s15 }
   0x9   :  { %312 = vmatmul.msk.f32.vlgmr.msra.gmra.mxu0 %vm31_vm0, %v443_v6  ;;  %313 = vmatmul.msk.f32.vlgmr.msra.gmra.mxu3 %vm31_vm0, %v448_v7  ;;  %v100_v13 = vld [vmem:[%s548_s3 + $0x10] sm:$0xff]  ;;  %v98_v15 = vld [vmem:[%s548_s3] sm:$0xff]  ;;  %33 = vst.msk [vmem:[#allocation2 + $0x8] sm:$0xff] %vm31_vm0, %v377_v16  ;;  %341 = vrcp.f32 %v378_v59  ;;  %s380_s16 = smov 128   ;;  %s381_s1 = smov 8  }
   0xa   :  { %130 = vmatpush.msra.mxu1 %v102_v9  ;;  %327 = vmatpush.msra.mxu2 %v102_v9  ;;  %v337_v17 = vld [vmem:[%s547_s2] ss:$0 sm:$0xff]  ;;  %34 = vst.msk [vmem:[#allocation2 + $0x10] sm:$0xff] %vm31_vm0, %v377_v16 }
   0xb   :  { %35 = vst.msk [vmem:[#allocation2 + $0x18] sm:$0xff] %vm31_vm0, %v377_v16  ;;  %v338_v34 = vld [vmem:[%s549_s4] ss:$0 sm:$0xff] }
   0xc   :  { %131 = vmatpush.msra.mxu1 %v101_v10  ;;  %328 = vmatpush.msra.mxu2 %v101_v10 }
   0xe   :  { %132 = vmatpush.msra.mxu1 %v100_v13  ;;  %329 = vmatpush.msra.mxu2 %v100_v13 }
   0xf   :  { %v94_v30 = vld [vmem:[#allocation2] sm:$0xff]  ;;  %v342_v60 = vpop.eup %341 }
  0x10   :  { %133 = vmatpush.msra.mxu1 %v99_v14  ;;  %330 = vmatpush.msra.mxu2 %v99_v14  ;;  %v95_v33 = vld [vmem:[#allocation2 + $0x8] sm:$0xff]  ;;  %v192_v61 = vmul.f32 32.0, %v342_v60  ;;  %vm196_vm2 = vweird.f32 %v342_v60 }
  0x11   :  { %314 = vmatmul.msk.f32.gmra.mxu3 %vm31_vm0, %v466_v11  ;;  %v96_v41 = vld [vmem:[#allocation2 + $0x10] sm:$0xff] }
  0x12   :  { %134 = vmatpush.msra.mxu1 %v98_v15  ;;  %331 = vmatpush.msra.mxu2 %v98_v15  ;;  %v97_v48 = vld [vmem:[#allocation2 + $0x18] sm:$0xff]  ;;  %v193_v62 = vsub.f32 1.0, %v192_v61 }
  0x14   :  { %v194_v63 = vmul.f32 %v342_v60, %v193_v62 }
  0x16   :  { %v195_v0 = vadd.f32 %v342_v60, %v194_v63 }
  0x18   :  { %v508_v1 = vsel %vm196_vm2, %v342_v60, %v195_v0 }
  0x19   :  { %315 = vmatmul.msk.f32.gmra.mxu3 %vm31_vm0, %v473_v12 }
  0x86   :  { %v78_v18 = vpop.f32.mrf.mxu0 }
  0x87   :  { %v79_v19 = vadd.f32 %v337_v17, %v78_v18 }
  0x89   :  { %v90_v20 = vmax.f32 %v79_v19, 0.0 }
  0x8b   :  { %316 = vmatmul.msk.f32.vlgmr.msra.gmra.mxu1 %vm106_vm1, %v90_v20 }
  0x8c   :  { %v81_v21 = vpop.f32.mrf.mxu3 }
  0x8d   :  { %v82_v22 = vadd.f32 %v337_v17, %v81_v21 }
  0x8f   :  { %v91_v23 = vmax.f32 %v82_v22, 0.0 }
  0x93   :  { %317 = vmatmul.msk.f32.gmra.mxu1 %vm106_vm1, %v91_v23 }
  0x94   :  { %v84_v24 = vpop.f32.mrf.mxu3 }
  0x95   :  { %v85_v25 = vadd.f32 %v337_v17, %v84_v24 }
  0x97   :  { %v92_v26 = vmax.f32 %v85_v25, 0.0 }
  0x99   :  { %318 = vmatmul.msk.f32.vlgmr.msra.gmra.mxu2 %vm106_vm1, %v92_v26 }
  0x9c   :  { %v87_v27 = vpop.f32.mrf.mxu3 }
  0x9d   :  { %v88_v28 = vadd.f32 %v337_v17, %v87_v27 }
  0x9f   :  { %v93_v29 = vmax.f32 %v88_v28, 0.0 }
  0xa1   :  { %319 = vmatmul.msk.f32.gmra.mxu2 %vm106_vm1, %v93_v29 }
 0x108   :  { %v136_v31 = vpop.f32.mrf.mxu1 }
 0x109   :  { %v148_v32 = vadd.f32 %v136_v31, %v94_v30 }
 0x10b   :  { %152 = vst.msk [vmem:[#allocation2] sm:$0xff] %vm31_vm0, %v148_v32 }
 0x110   :  { %v139_v35 = vpop.f32.mrf.mxu1 }
 0x111   :  { %v149_v36 = vadd.f32 %v139_v35, %v95_v33 }
 0x112   :  { %v159_v37 = vld [vmem:[#allocation2] sm:$0xff] }
 0x113   :  { %153 = vst.msk [vmem:[#allocation2 + $0x8] sm:$0xff] %vm31_vm0, %v149_v36  ;;  %v167_v38 = vadd.f32 %v338_v34, %v159_v37  ;;  %v339_v37 = vld [vmem:[%s550_s5] ss:$0 sm:$0xff]  ;;  %s379_s5 = smov [#allocation3]  }
 0x115   :  { %v175_v39 = vadd.f32 %v167_v38, %v443_v6 }
 0x117   :  { %v179_v40 = vsel %vm31_vm0, %v175_v39, 0.0 }
 0x118   :  { %180 = vadd.xlane.f32.xlu0 %v179_v40 }
 0x11a   :  { %v160_v42 = vld [vmem:[#allocation2 + $0x8] sm:$0xff] }
 0x11b   :  { %v168_v43 = vadd.f32 %v338_v34, %v160_v42 }
 0x11c   :  { %v142_v44 = vpop.f32.mrf.mxu2 }
 0x11d   :  { %v150_v45 = vadd.f32 %v142_v44, %v96_v41  ;;  %v176_v46 = vadd.f32 %v168_v43, %v448_v7  ;;  %v340_v41 = vld [vmem:[%s551_s6] ss:$0 sm:$0xff]  ;;  %s298_s6 = sshll.u32 %s379_s5, 4  ;;  %s299_s6 = int_to_ptr.vmem [resolvable:$true] %s298_s6 }
 0x11f   :  { %154 = vst.msk [vmem:[#allocation2 + $0x10] sm:$0xff] %vm31_vm0, %v150_v45  ;;  %v182_v47 = vsel %vm31_vm0, %v176_v46, 0.0 }
 0x120   :  { %183 = vadd.xlane.f32.xlu0 %v182_v47 }
 0x124   :  { %v145_v49 = vpop.f32.mrf.mxu2 }
 0x125   :  { %v151_v50 = vadd.f32 %v145_v49, %v97_v48 }
 0x126   :  { %v161_v51 = vld [vmem:[#allocation2 + $0x10] sm:$0xff] }
 0x127   :  { %155 = vst.msk [vmem:[#allocation2 + $0x18] sm:$0xff] %vm31_vm0, %v151_v50  ;;  %v169_v52 = vadd.f32 %v338_v34, %v161_v51 }
 0x129   :  { %v177_v53 = vadd.f32 %v169_v52, %v466_v11 }
 0x12b   :  { %v185_v54 = vsel %vm31_vm0, %v177_v53, 0.0 }
 0x12c   :  { %186 = vadd.xlane.f32.xlu1 %v185_v54 }
 0x12e   :  { %v162_v55 = vld [vmem:[#allocation2 + $0x18] sm:$0xff] }
 0x12f   :  { %v170_v56 = vadd.f32 %v338_v34, %v162_v55 }
 0x131   :  { %v178_v57 = vadd.f32 %v170_v56, %v473_v12 }
 0x133   :  { %v188_v58 = vsel %vm31_vm0, %v178_v57, 0.0 }
 0x134   :  { %189 = vadd.xlane.f32.xlu1 %v188_v58 }
 0x18b   :  { %v181_v2 = vpop.xlane.xlu0 %180 }
 0x18c   :  { %v198_v3 = vmul.f32 %v508_v1, %v181_v2 }
 0x18e   :  { %v202_v4 = vsub.f32 %v175_v39, %v198_v3 }
 0x190   :  { %v206_v5 = vmul.f32 %v202_v4, %v202_v4 }
 0x192   :  { %v210_v6 = vsel %vm31_vm0, %v206_v5, 0.0 }
 0x193   :  { %211 = vadd.xlane.f32.xlu2 %v210_v6  ;;  %v184_v7 = vpop.xlane.xlu0 %183 }
 0x194   :  { %v199_v8 = vmul.f32 %v508_v1, %v184_v7 }
 0x196   :  { %v203_v9 = vsub.f32 %v176_v46, %v199_v8 }
 0x198   :  { %v207_v10 = vmul.f32 %v203_v9, %v203_v9 }
 0x19a   :  { %v213_v11 = vsel %vm31_vm0, %v207_v10, 0.0 }
 0x19b   :  { %214 = vadd.xlane.f32.xlu2 %v213_v11 }
 0x19f   :  { %v187_v12 = vpop.xlane.xlu1 %186 }
 0x1a0   :  { %v200_v13 = vmul.f32 %v508_v1, %v187_v12 }
 0x1a2   :  { %v515_v14 = vsub.f32 %v177_v53, %v200_v13 }
 0x1a4   :  { %v208_v15 = vmul.f32 %v515_v14, %v515_v14 }
 0x1a6   :  { %v216_v16 = vsel %vm31_vm0, %v208_v15, 0.0 }
 0x1a7   :  { %v190_v17 = vpop.xlane.xlu1 %189  ;;  %217 = vadd.xlane.f32.xlu0 %v216_v16 }
 0x1a8   :  { %v201_v18 = vmul.f32 %v508_v1, %v190_v17 }
 0x1aa   :  { %v521_v19 = vsub.f32 %v178_v57, %v201_v18 }
 0x1ac   :  { %v209_v20 = vmul.f32 %v521_v19, %v521_v19 }
 0x1ae   :  { %v219_v21 = vsel %vm31_vm0, %v209_v20, 0.0 }
 0x1af   :  { %220 = vadd.xlane.f32.xlu1 %v219_v21 }
 0x206   :  { %v212_v22 = vpop.xlane.xlu2 %211 }
 0x207   :  { %v222_v23 = vmul.f32 %v212_v22, %v508_v1 }
 0x209   :  { %v226_v24 = vadd.f32 1e-05, %v222_v23 }
 0x20b   :  { %343 = vrsqrt.f32 %v226_v24  ;;  %vm236_vm4 = vweird.f32 %v226_v24 }
 0x20e   :  { %v215_v25 = vpop.xlane.xlu2 %214 }
 0x20f   :  { %v223_v26 = vmul.f32 %v215_v25, %v508_v1 }
 0x211   :  { %v344_v27 = vpop.eup %343  ;;  %v227_v28 = vadd.f32 1e-05, %v223_v26 }
 0x212   :  { %v231_v29 = vmul.f32 %v344_v27, %v226_v24  ;;  %vm237_vm3 = vweird.f32 %v344_v27 }
 0x213   :  { %345 = vrsqrt.f32 %v227_v28  ;;  %vm238_vm5 = vmor %vm236_vm4, %vm237_vm3  ;;  %vm246_vm7 = vweird.f32 %v227_v28 }
 0x214   :  { %v232_v30 = vmul.f32 %v344_v27, %v231_v29 }
 0x216   :  { %v233_v31 = vmul.f32 0.5, %v232_v30 }
 0x218   :  { %v234_v32 = vsub.f32 1.5, %v233_v31 }
 0x219   :  { %v346_v33 = vpop.eup %345 }
 0x21a   :  { %v235_v34 = vmul.f32 %v344_v27, %v234_v32  ;;  %v241_v35 = vmul.f32 %v346_v33, %v227_v28  ;;  %v218_v36 = vpop.xlane.xlu0 %217  ;;  %vm247_vm6 = vweird.f32 %v346_v33 }
 0x21b   :  { %v224_v38 = vmul.f32 %v218_v36, %v508_v1  ;;  %vm248_vm8 = vmor %vm246_vm7, %vm247_vm6 }
 0x21c   :  { %v239_v39 = vsel %vm238_vm5, %v344_v27, %v235_v34  ;;  %v242_v40 = vmul.f32 %v346_v33, %v241_v35 }
 0x21d   :  { %v270_v42 = vmul.f32 %v239_v39, %v202_v4  ;;  %v228_v43 = vadd.f32 1e-05, %v224_v38 }
 0x21e   :  { %v243_v44 = vmul.f32 0.5, %v242_v40 }
 0x21f   :  { %v278_v45 = vmul.f32 %v339_v37, %v270_v42  ;;  %347 = vrsqrt.f32 %v228_v43  ;;  %vm256_vm10 = vweird.f32 %v228_v43 }
 0x220   :  { %v244_v46 = vsub.f32 1.5, %v243_v44 }
 0x221   :  { %v286_v47 = vadd.f32 %v340_v41, %v278_v45 }
 0x222   :  { %v245_v48 = vmul.f32 %v346_v33, %v244_v46  ;;  %v221_v49 = vpop.xlane.xlu1 %220 }
 0x223   :  { %290 = vst.msk [vmem:[#allocation3] sm:$0xff] %vm31_vm0, %v286_v47  ;;  %v225_v50 = vmul.f32 %v221_v49, %v508_v1 }
 0x224   :  { %v249_v51 = vsel %vm248_vm8, %v346_v33, %v245_v48 }
 0x225   :  { %v348_v52 = vpop.eup %347  ;;  %v271_v53 = vmul.f32 %v249_v51, %v203_v9  ;;  %v229_v54 = vadd.f32 1e-05, %v225_v50 }
 0x226   :  { %v251_v55 = vmul.f32 %v348_v52, %v228_v43  ;;  %vm257_vm9 = vweird.f32 %v348_v52 }
 0x227   :  { %v279_v56 = vmul.f32 %v339_v37, %v271_v53  ;;  %349 = vrsqrt.f32 %v229_v54  ;;  %vm258_vm11 = vmor %vm256_vm10, %vm257_vm9  ;;  %vm266_vm13 = vweird.f32 %v229_v54 }
 0x228   :  { %v252_v57 = vmul.f32 %v348_v52, %v251_v55 }
 0x229   :  { %v287_v58 = vadd.f32 %v340_v41, %v279_v56 }
 0x22a   :  { %v253_v59 = vmul.f32 0.5, %v252_v57 }
 0x22b   :  { %291 = vst.msk [vmem:[#allocation3 + $0x8] sm:$0xff] %vm31_vm0, %v287_v58 }
 0x22c   :  { %v254_v60 = vsub.f32 1.5, %v253_v59 }
 0x22d   :  { %v350_v61 = vpop.eup %349 }
 0x22e   :  { %v255_v62 = vmul.f32 %v348_v52, %v254_v60  ;;  %v261_v63 = vmul.f32 %v350_v61, %v229_v54  ;;  %vm267_vm12 = vweird.f32 %v350_v61 }
 0x22f   :  { %vm268_vm14 = vmor %vm266_vm13, %vm267_vm12 }
 0x230   :  { %v259_v0 = vsel %vm258_vm11, %v348_v52, %v255_v62  ;;  %v262_v1 = vmul.f32 %v350_v61, %v261_v63 }
 0x231   :  { %v272_v2 = vmul.f32 %v259_v0, %v515_v14 }
 0x232   :  { %v263_v3 = vmul.f32 0.5, %v262_v1 }
 0x233   :  { %v280_v4 = vmul.f32 %v339_v37, %v272_v2 }
 0x234   :  { %v264_v5 = vsub.f32 1.5, %v263_v3 }
 0x235   :  { %v288_v6 = vadd.f32 %v340_v41, %v280_v4 }
 0x236   :  { %v265_v7 = vmul.f32 %v350_v61, %v264_v5 }
 0x237   :  { %292 = vst.msk [vmem:[#allocation3 + $0x10] sm:$0xff] %vm31_vm0, %v288_v6 }
 0x238   :  { %v269_v8 = vsel %vm268_vm14, %v350_v61, %v265_v7 }
 0x239   :  { %v273_v9 = vmul.f32 %v269_v8, %v521_v19 }
 0x23b   :  { %v281_v10 = vmul.f32 %v339_v37, %v273_v9 }
 0x23d   :  { %v289_v11 = vadd.f32 %v340_v41, %v281_v10 }
 0x23f   :  { %293 = vst.msk [vmem:[#allocation3 + $0x18] sm:$0xff] %vm31_vm0, %v289_v11 }
 0x240   :  { %306 = dma.vmem_to_hbm [thread:$0]  %s299_s6, 512, %s301_s15, [#allocation4], %s380_s16, %s380_s16, %s381_s1  }
 0x241   :  { %375 = dma.done.wait [#allocation4], 512  }
 0x242   :  { %376 = vsyncadd [#allocation4], 4294966784 }
 0x243   :  { %311 = vsyncpa [#allocation4], 1 }

// kernel: encoder_layer_forward.6
= control target key start
LH: loop header
LB: loop body
LE: loop exit
PB: predicated region body
PF: predicated region fallthrough
CT: control target
= control target key end

     0   :  { %s1887_s30 = smov 0   ;;  %s1889_s10 = smov 0   ;;  %s2367_s0 = inlined_call_operand.vmem [shape: f32[2,16,32], index: 0, kind: input, shape index: {}]   ;;  %s2368_s1 = inlined_call_operand.vmem [shape: f32[2,128,32], index: 1, kind: input, shape index: {}]   ;;  %s2369_s2 = inlined_call_operand.vmem [shape: f32[2,128,32], index: 2, kind: input, shape index: {}]   ;;  %s2370_s3 = inlined_call_operand.vmem [shape: f32[2,16,128], index: 3, kind: input, shape index: {}]   ;;  %s2371_s4 = inlined_call_operand.vmem [shape: f32[2,16,32], index: 4, kind: input, shape index: {}]   ;;  %s2372_s5 = inlined_call_operand.vmem [shape: f32[32,32], index: 5, kind: input, shape index: {}]   ;;  %s2373_s6 = inlined_call_operand.vmem [shape: f32[1,32], index: 6, kind: input, shape index: {}]   ;;  %s2374_s7 = inlined_call_operand.vmem [shape: f32[1,32], index: 7, kind: input, shape index: {}]   ;;  %s2375_s8 = inlined_call_operand.vmem [shape: f32[1,32], index: 8, kind: input, shape index: {}]   ;;  %s2376_s9 = inlined_call_operand.vmem [shape: f32[2,16,32], index: 9, kind: output, shape index: {}]  }
   0x1   :  { %s1891_s11 = smov 0  }
   0x2 LB: > { %s31_s12 = sadd.s32 1, %s1824_s10  ;;  %p1517_p0 = scmp.ge.s32.totalorder %s1828_s11, 1  ;;  %s1828_s11 = sphi %s1891_s11, %s19_s11   ;;  %s1824_s10 = sphi %s1889_s10, %s2378_s10   ;;  %s1820_s30 = sphi %s1887_s30, %s2377_s30  }
   0x3   : > { %p33_p1 = scmp.ge.s32.totalorder %s31_s12, 2  ;;  %p362_p2 = scmp.lt.s32.totalorder %s1828_s11, 3 }
   0x5   : > { %s2380_s12 = smov (%p33_p1, %s31_s12), 0  ;;  %p363_p3 = pnand %p1517_p0, %p362_p2 }
   0x6   : > { %p435_p4 = scmp.lt.s32.totalorder (!%p363_p3), %s1820_s30, 1  ;;  %s1830_s17 = smov (!%p363_p3), 120  }
   0x7   : > { %366 = sbr.rel (%p363_p3) target bundleno = 1669 (0x685), region = 56  ;;  %s1831_s18 = smov (!%p363_p3), 104  }
   0x8   : > { %s1832_s19 = smov (!%p363_p3), 112   ;;  %s1835_s14 = smov (!%p363_p3), 24  }
   0xc   : > { %s2382_s30 = smov (!%p435_p4, %s1820_s30), 1  ;;  %vm524_vm0 = vcmask 64512   ;;  %vm1253_vm1 = vcmask 130048   ;;  %vm1267_vm2 = vcmask 261120   ;;  %vm1256_vm3 = vcmask 195584  }
   0xd   : > { %s1609_s13 = sshll.u32 %s2382_s30, 7  ;;  %s1983_s20 = sshll.u32 %s2382_s30, 4 }
   0xe   : > { %s1913_s16 = scalar_lea.vmem %s2368_s1, %s1609_s13  ;;  %s442_s23 = scalar_lea.vmem %s2367_s0, %s1983_s20 }
   0xf   : > { %v501_v0 = vld [vmem:[%s1913_s16 + $0x78] sm:$0xff]  ;;  %v499_v1 = vld [vmem:[%s1913_s16 + $0x68] sm:$0xff]  ;;  %v500_v2 = vld [vmem:[%s1913_s16 + $0x70] sm:$0xff]  ;;  %s2021_s26 = scalar_lea.vmem %s2369_s2, %s1609_s13  ;;  %s462_s29 = scalar_lea.vmem %s2370_s3, %s1983_s20 }
  0x10   : > { %681 = vrot.lane.b32.xlu0 %v501_v0, %s1830_s17  ;;  %1532 = vmatpush.xpose.msk.msra.mxu0 %vm524_vm0, %v501_v0  ;;  %v498_v3 = vld [vmem:[%s1913_s16 + $0x60] sm:$0xff]  ;;  %v497_v4 = vld [vmem:[%s1913_s16 + $0x58] sm:$0xff]  ;;  %v496_v5 = vld [vmem:[%s1913_s16 + $0x50] sm:$0xff]  ;;  %s1833_s30 = smov 8   ;;  %s1834_s13 = smov 16  }
  0x11   : > { %677 = vrot.lane.b32.xlu1 %v499_v1, %s1830_s17  ;;  %675 = vrot.lane.b32.xlu2 %v498_v3, %s1830_s17  ;;  %v495_v6 = vld [vmem:[%s1913_s16 + $0x48] sm:$0xff]  ;;  %v494_v7 = vld [vmem:[%s1913_s16 + $0x40] sm:$0xff]  ;;  %s472_s28 = scalar_lea.vmem %s2371_s4, %s1983_s20 }
  0x12   : > { %v493_v8 = vld [vmem:[%s1913_s16 + $0x38] sm:$0xff]  ;;  %v1947_v9 = vld [vmem:[%s1913_s16 + $0x30] sm:$0xff]  ;;  %v1954_v10 = vld [vmem:[%s1913_s16 + $0x28] sm:$0xff] }
  0x13   : > { %v1960_v11 = vld [vmem:[%s1913_s16 + $0x20] sm:$0xff]  ;;  %v1967_v12 = vld [vmem:[%s1913_s16 + $0x18] sm:$0xff]  ;;  %v1973_v13 = vld [vmem:[%s1913_s16 + $0x10] sm:$0xff] }
  0x14   : > { %1533 = vmatpush.xpose.msk.msra.mxu0 %vm524_vm0, %v500_v2  ;;  %v1980_v14 = vld [vmem:[%s1913_s16 + $0x8] sm:$0xff]  ;;  %v1993_v15 = vld [vmem:[%s1913_s16] sm:$0xff]  ;;  %v2028_v18 = vld [vmem:[%s2021_s26 + $0x78] sm:$0xff] }
  0x15   : > { %v1996_v16 = vld [vmem:[%s442_s23 + $0x8] sm:$0xff]  ;;  %v2002_v17 = vld [vmem:[%s442_s23] sm:$0xff]  ;;  %v2031_v19 = vld [vmem:[%s2021_s26 + $0x70] sm:$0xff]  ;;  %624 = vmatpush.msra.mxu1 %v2028_v18 }
  0x16   : > { %v2040_v20 = vld [vmem:[%s2021_s26 + $0x68] sm:$0xff]  ;;  %v2043_v21 = vld [vmem:[%s2021_s26 + $0x60] sm:$0xff]  ;;  %v2047_v22 = vld [vmem:[%s2021_s26 + $0x58] sm:$0xff] }
  0x17   : > { %625 = vmatpush.msra.mxu1 %v2031_v19  ;;  %v2051_v23 = vld [vmem:[%s2021_s26 + $0x50] sm:$0xff]  ;;  %v2060_v24 = vld [vmem:[%s2021_s26 + $0x48] sm:$0xff]  ;;  %v2063_v25 = vld [vmem:[%s2021_s26 + $0x40] sm:$0xff] }
  0x18   : > { %679 = vrot.lane.b32.xlu0 %v500_v2, %s1830_s17  ;;  %1534 = vmatpush.xpose.msk.msra.mxu0 %vm524_vm0, %v499_v1  ;;  %v2067_v26 = vld [vmem:[%s2021_s26 + $0x38] sm:$0xff]  ;;  %v2071_v27 = vld [vmem:[%s2021_s26 + $0x30] sm:$0xff]  ;;  %v2080_v29 = vld [vmem:[%s2021_s26 + $0x28] sm:$0xff] }
  0x19   : > { %1073 = vrot.lane.b32.xlu1 %v501_v0, %s1831_s18  ;;  %881 = vrot.lane.b32.xlu2 %v499_v1, %s1832_s19  ;;  %v2083_v30 = vld [vmem:[%s2021_s26 + $0x20] sm:$0xff]  ;;  %v2088_v32 = vld [vmem:[%s2021_s26 + $0x18] sm:$0xff] }
  0x1a   : > { %626 = vmatpush.msra.mxu1 %v2040_v20  ;;  %v2092_v33 = vld [vmem:[%s2021_s26 + $0x10] sm:$0xff]  ;;  %v2101_v35 = vld [vmem:[%s2021_s26 + $0x8] sm:$0xff]  ;;  %v2104_v36 = vld [vmem:[%s2021_s26] sm:$0xff] }
  0x1b   : > { %v518_v56 = vld [vmem:[%s462_s29] sm:$0xff]  ;;  %v519_v63 = vld [vmem:[%s462_s29 + $0x8] sm:$0xff] }
  0x1c   : > { %1535 = vmatpush.xpose.msk.msra.mxu0 %vm524_vm0, %v498_v3  ;;  %627 = vmatpush.msra.mxu1 %v2043_v21  ;;  %v1530_v58 = vadd.f32 -1.0, %v518_v56 }
  0x1e   : > { %628 = vmatpush.msra.mxu1 %v2047_v22  ;;  %v2135_v60 = vmul.f32 1e+09, %v1530_v58 }
  0x20   : > { %673 = vrot.lane.b32.xlu0 %v497_v4, %s1830_s17  ;;  %1536 = vmatpush.xpose.msk.msra.mxu0 %vm524_vm0, %v497_v4 }
  0x21   : > { %883 = vrot.lane.b32.xlu1 %v500_v2, %s1832_s19  ;;  %1065 = vrot.lane.b32.xlu2 %v497_v4, %s1831_s18 }
  0x22   : > { %629 = vmatpush.msra.mxu1 %v2051_v23 }
  0x24   : > { %1537 = vmatpush.xpose.msk.msra.mxu0 %vm524_vm0, %v496_v5  ;;  %630 = vmatpush.msra.mxu1 %v2060_v24 }
  0x26   : > { %631 = vmatpush.msra.mxu1 %v2063_v25 }
  0x28   : > { %671 = vrot.lane.b32.xlu0 %v496_v5, %s1830_s17  ;;  %1538 = vmatpush.xpose.msk.msra.mxu0 %vm524_vm0, %v495_v6 }
  0x29   : > { %667 = vrot.lane.b32.xlu1 %v494_v7, %s1830_s17  ;;  %1063 = vrot.lane.b32.xlu2 %v496_v5, %s1831_s18 }
  0x2a   : > { %632 = vmatpush.msra.mxu1 %v2067_v26 }
  0x2c   : > { %1539 = vmatpush.xpose.msk.msra.mxu0 %vm524_vm0, %v494_v7  ;;  %633 = vmatpush.msra.mxu1 %v2071_v27 }
  0x2e   : > { %634 = vmatpush.msra.mxu1 %v2080_v29 }
  0x30   : > { %885 = vrot.lane.b32.xlu0 %v501_v0, %s1832_s19  ;;  %1540 = vmatpush.xpose.msk.msra.mxu0 %vm524_vm0, %v493_v8 }
  0x31   : > { %665 = vrot.lane.b32.xlu1 %v493_v8, %s1830_s17  ;;  %1061 = vrot.lane.b32.xlu2 %v495_v6, %s1831_s18 }
  0x32   : > { %635 = vmatpush.msra.mxu1 %v2083_v30 }
  0x34   : > { %1541 = vmatpush.xpose.msk.msra.mxu0 %vm524_vm0, %v1947_v9  ;;  %636 = vmatpush.msra.mxu1 %v2088_v32 }
  0x36   : > { %637 = vmatpush.msra.mxu1 %v2092_v33 }
  0x38   : > { %669 = vrot.lane.b32.xlu0 %v495_v6, %s1830_s17  ;;  %1542 = vmatpush.xpose.msk.msra.mxu0 %vm524_vm0, %v1954_v10 }
  0x39   : > { %1067 = vrot.lane.b32.xlu1 %v498_v3, %s1831_s18  ;;  %1059 = vrot.lane.b32.xlu2 %v494_v7, %s1831_s18 }
  0x3a   : > { %638 = vmatpush.msra.mxu1 %v2101_v35 }
  0x3c   : > { %1543 = vmatpush.xpose.msk.msra.mxu0 %vm524_vm0, %v1960_v11  ;;  %639 = vmatpush.msra.mxu1 %v2104_v36 }
  0x40   : > { %1071 = vrot.lane.b32.xlu0 %v500_v2, %s1831_s18  ;;  %1544 = vmatpush.xpose.msk.msra.mxu0 %vm524_vm0, %v1967_v12 }
  0x41   : > { %877 = vrot.lane.b32.xlu1 %v497_v4, %s1832_s19  ;;  %1057 = vrot.lane.b32.xlu2 %v493_v8, %s1831_s18 }
  0x44   : > { %1545 = vmatpush.xpose.msk.msra.mxu0 %vm524_vm0, %v1973_v13 }
  0x48   : > { %1069 = vrot.lane.b32.xlu0 %v499_v1, %s1831_s18  ;;  %1546 = vmatpush.xpose.msk.msra.mxu0 %vm524_vm0, %v1980_v14 }
  0x49   : > { %875 = vrot.lane.b32.xlu1 %v496_v5, %s1832_s19  ;;  %649 = vrot.lane.b32.xlu2 %v1996_v16, %s1830_s17 }
  0x4c   : > { %1547 = vmatpush.xpose.msk.msra.mxu0 %vm524_vm0, %v1993_v15 }
  0x4f   : > { %1548 = vmatmul.msk.f32.vlgmr.msra.gmra.mxu0 %vm524_vm0, %v2002_v17 }
  0x50   : > { %879 = vrot.lane.b32.xlu0 %v498_v3, %s1832_s19  ;;  %v1531_v3 = vadd.f32 -1.0, %v519_v63  ;;  %v2209_v63 = vpack.i.bf16 %v2071_v27, %v2067_v26 }
  0x51   : > { %873 = vrot.lane.b32.xlu1 %v495_v6, %s1832_s19 }
  0x52   : > { %v2143_v5 = vmul.f32 1e+09, %v1531_v3 }
  0x57   : > { %1549 = vmatmul.msk.f32.gmra.mxu0 %vm524_vm0, %v1996_v16 }
  0x58   : > { %663 = vrot.lane.b32.xlu0 %v1947_v9, %s1830_s17 }
  0x59   : > { %871 = vrot.lane.b32.xlu1 %v494_v7, %s1832_s19 }
  0x60   : > { %661 = vrot.lane.b32.xlu0 %v1954_v10, %s1830_s17 }
  0x61   : > { %869 = vrot.lane.b32.xlu1 %v493_v8, %s1832_s19 }
  0x68   : > { %659 = vrot.lane.b32.xlu0 %v1960_v11, %s1830_s17 }
  0x69   : > { %867 = vrot.lane.b32.xlu1 %v1947_v9, %s1832_s19 }
  0x6b   : > { %v676_v38 = vpop.permute.xlu2 %675 }
  0x70   : > { %657 = vrot.lane.b32.xlu0 %v1967_v12, %s1830_s17 }
  0x71   : > { %651 = vrot.lane.b32.xlu1 %v1993_v15, %s1830_s17 }
  0x73   : > { %v882_v45 = vpop.permute.xlu2 %881 }
  0x78   : > { %655 = vrot.lane.b32.xlu0 %v1973_v13, %s1830_s17 }
  0x79   : > { %647 = vrot.lane.b32.xlu1 %v2002_v17, %s1830_s17 }
  0x7b   : > { %v1066_v50 = vpop.permute.xlu2 %1065 }
  0x80   : > { %653 = vrot.lane.b32.xlu0 %v1980_v14, %s1830_s17 }
  0x81   : > { %863 = vrot.lane.b32.xlu1 %v1960_v11, %s1832_s19 }
  0x82   : > { %v682_v28 = vpop.permute.xlu0 %681 }
  0x83   : > { %v678_v31 = vpop.permute.xlu1 %677  ;;  %1550 = vmatpush.xpose.msk.msra.mxu2 %vm524_vm0, %v682_v28  ;;  %v1064_v53 = vpop.permute.xlu2 %1063 }
  0x88   : > { %1055 = vrot.lane.b32.xlu0 %v1947_v9, %s1831_s18 }
  0x89   : > { %1051 = vrot.lane.b32.xlu1 %v1960_v11, %s1831_s18 }
  0x8a   : > { %v680_v34 = vpop.permute.xlu0 %679 }
  0x8b   : > { %v1074_v37 = vpop.permute.xlu1 %1073  ;;  %1551 = vmatpush.xpose.msk.msra.mxu2 %vm524_vm0, %v680_v34  ;;  %v1062_v57 = vpop.permute.xlu2 %1061 }
  0x8c   : > { %1586 = vmatpush.xpose.msk.msrb.mxu0 %vm524_vm0, %v1074_v37 }
  0x8f   : > { %1552 = vmatpush.xpose.msk.msra.mxu2 %vm524_vm0, %v678_v31 }
  0x90   : > { %865 = vrot.lane.b32.xlu0 %v1954_v10, %s1832_s19 }
  0x92   : > { %v674_v39 = vpop.permute.xlu0 %673 }
  0x93   : > { %v884_v40 = vpop.permute.xlu1 %883  ;;  %1553 = vmatpush.xpose.msk.msra.mxu2 %vm524_vm0, %v676_v38  ;;  %v1060_v1 = vpop.permute.xlu2 %1059 }
  0x97   : > { %1554 = vmatpush.xpose.msk.msra.mxu2 %vm524_vm0, %v674_v39 }
  0x98   : > { %1053 = vrot.lane.b32.xlu0 %v1954_v10, %s1831_s18 }
  0x9a   : > { %v672_v41 = vpop.permute.xlu0 %671 }
  0x9b   : > { %v668_v42 = vpop.permute.xlu1 %667  ;;  %1555 = vmatpush.xpose.msk.msra.mxu2 %vm524_vm0, %v672_v41  ;;  %v1058_v10 = vpop.permute.xlu2 %1057 }
  0xa2   : > { %v886_v43 = vpop.permute.xlu0 %885 }
  0xa3   : > { %1568 = vmatpush.xpose.msk.msrb.mxu1 %vm524_vm0, %v886_v43  ;;  %v666_v44 = vpop.permute.xlu1 %665  ;;  %v650_v41 = vpop.permute.xlu2 %649 }
  0xa7   : > { %1569 = vmatpush.xpose.msk.msrb.mxu1 %vm524_vm0, %v884_v40 }
  0xaa   : > { %v670_v46 = vpop.permute.xlu0 %669 }
  0xab   : > { %1556 = vmatpush.xpose.msk.msra.mxu2 %vm524_vm0, %v670_v46  ;;  %v1068_v47 = vpop.permute.xlu1 %1067  ;;  %1570 = vmatpush.xpose.msk.msrb.mxu1 %vm524_vm0, %v882_v45 }
  0xaf   : > { %1557 = vmatpush.xpose.msk.msra.mxu2 %vm524_vm0, %v668_v42 }
  0xb2   : > { %v1072_v48 = vpop.permute.xlu0 %1071 }
  0xb3   : > { %v878_v49 = vpop.permute.xlu1 %877  ;;  %1558 = vmatpush.xpose.msk.msra.mxu2 %vm524_vm0, %v666_v44  ;;  %1587 = vmatpush.xpose.msk.msrb.mxu0 %vm524_vm0, %v1072_v48 }
  0xba   : > { %v1070_v51 = vpop.permute.xlu0 %1069 }
  0xbb   : > { %1588 = vmatpush.xpose.msk.msrb.mxu0 %vm524_vm0, %v1070_v51  ;;  %v876_v52 = vpop.permute.xlu1 %875 }
  0xbf   : > { %1589 = vmatpush.xpose.msk.msrb.mxu0 %vm524_vm0, %v1068_v47 }
  0xc2   : > { %v880_v54 = vpop.permute.xlu0 %879 }
  0xc3   : > { %1571 = vmatpush.xpose.msk.msrb.mxu1 %vm524_vm0, %v880_v54  ;;  %v874_v55 = vpop.permute.xlu1 %873  ;;  %1590 = vmatpush.xpose.msk.msrb.mxu0 %vm524_vm0, %v1066_v50 }
  0xc7   : > { %1572 = vmatpush.xpose.msk.msrb.mxu1 %vm524_vm0, %v878_v49  ;;  %1591 = vmatpush.xpose.msk.msrb.mxu0 %vm524_vm0, %v1064_v53 }
  0xca   : > { %v664_v59 = vpop.permute.xlu0 %663 }
  0xcb   : > { %v872_v61 = vpop.permute.xlu1 %871  ;;  %1573 = vmatpush.xpose.msk.msrb.mxu1 %vm524_vm0, %v876_v52  ;;  %1559 = vmatpush.xpose.msk.msra.mxu2 %vm524_vm0, %v664_v59 }
  0xcc   : > { %v596_v62 = vpop.f32.mrf.mxu0  ;;  %1592 = vmatpush.xpose.msk.msrb.mxu0 %vm524_vm0, %v1062_v57 }
  0xcd   : > { %v602_v0 = vmul.f32 0.17677669, %v596_v62  ;;  %v2199_v62 = vpack.i.bf16 %v2043_v21, %v2040_v20  ;;  %v2215_v20 = vpack.i.bf16 %v2083_v30, %v2080_v29 }
  0xcf   : > { %v604_v2 = vadd.f32 %v602_v0, %v2135_v60  ;;  %1574 = vmatpush.xpose.msk.msrb.mxu1 %vm524_vm0, %v874_v55 }
  0xd0   : > { %1593 = vmatpush.xpose.msk.msrb.mxu0 %vm524_vm0, %v1060_v1 }
  0xd1   : > { %606 = vmax.xlane.f32.xlu1 %v604_v2 }
  0xd2   : > { %v662_v4 = vpop.permute.xlu0 %661 }
  0xd3   : > { %v870_v6 = vpop.permute.xlu1 %869  ;;  %1560 = vmatpush.xpose.msk.msra.mxu2 %vm524_vm0, %v662_v4  ;;  %1575 = vmatpush.xpose.msk.msrb.mxu1 %vm524_vm0, %v872_v61 }
  0xd4   : > { %v599_v7 = vpop.f32.mrf.mxu0  ;;  %1594 = vmatpush.xpose.msk.msrb.mxu0 %vm524_vm0, %v1058_v10 }
  0xd5   : > { %v603_v8 = vmul.f32 0.17677669, %v599_v7 }
  0xd7   : > { %v605_v9 = vadd.f32 %v603_v8, %v2143_v5  ;;  %1576 = vmatpush.xpose.msk.msrb.mxu1 %vm524_vm0, %v870_v6 }
  0xd9   : > { %608 = vmax.xlane.f32.xlu2 %v605_v9 }
  0xda   : > { %v660_v11 = vpop.permute.xlu0 %659 }
  0xdb   : > { %1561 = vmatpush.xpose.msk.msra.mxu2 %vm524_vm0, %v660_v11  ;;  %v868_v28 = vpop.permute.xlu1 %867 }
  0xdc   : > { %1577 = vmatpush.xpose.msk.msrb.mxu1 %vm524_vm0, %v868_v28 }
  0xe2   : > { %v658_v31 = vpop.permute.xlu0 %657 }
  0xe3   : > { %1562 = vmatpush.xpose.msk.msra.mxu2 %vm524_vm0, %v658_v31  ;;  %v652_v37 = vpop.permute.xlu1 %651 }
  0xea   : > { %v656_v34 = vpop.permute.xlu0 %655  ;;  %861 = vrot.lane.b32.xlu1 %v1967_v12, %s1832_s19 }
  0xeb   : > { %1563 = vmatpush.xpose.msk.msra.mxu2 %vm524_vm0, %v656_v34  ;;  %v648_v39 = vpop.permute.xlu1 %647 }
  0xf1   : > { %857 = vrot.lane.b32.xlu2 %v1980_v14, %s1832_s19 }
  0xf2   : > { %v654_v38 = vpop.permute.xlu0 %653  ;;  %1049 = vrot.lane.b32.xlu1 %v1967_v12, %s1831_s18 }
  0xf3   : > { %1564 = vmatpush.xpose.msk.msra.mxu2 %vm524_vm0, %v654_v38  ;;  %v864_v43 = vpop.permute.xlu1 %863 }
  0xf7   : > { %1565 = vmatpush.xpose.msk.msra.mxu2 %vm524_vm0, %v652_v37 }
  0xfa   : > { %1566 = vmatmul.msk.f32.vlgmr.msra.gmra.mxu2 %vm524_vm0, %v648_v39  ;;  %v1056_v40 = vpop.permute.xlu0 %1055  ;;  %859 = vrot.lane.b32.xlu1 %v1973_v13, %s1832_s19 }
  0xfb   : > { %1595 = vmatpush.xpose.msk.msrb.mxu0 %vm524_vm0, %v1056_v40  ;;  %v1052_v44 = vpop.permute.xlu1 %1051 }
 0x102   : > { %1567 = vmatmul.msk.f32.gmra.mxu2 %vm524_vm0, %v650_v41  ;;  %v866_v42 = vpop.permute.xlu0 %865  ;;  %1047 = vrot.lane.b32.xlu1 %v1973_v13, %s1831_s18 }
 0x103   : > { %1578 = vmatpush.xpose.msk.msrb.mxu1 %vm524_vm0, %v866_v42 }
 0x107   : > { %1579 = vmatpush.xpose.msk.msrb.mxu1 %vm524_vm0, %v864_v43  ;;  %v1660_v43 = vpack.i.bf16 %v2063_v25, %v2060_v24  ;;  %v2262_v24 = vpack.i.bf16 %v2104_v36, %v2101_v35 }
 0x10a   : > { %v1054_v12 = vpop.permute.xlu0 %1053  ;;  %1045 = vrot.lane.b32.xlu1 %v1980_v14, %s1831_s18 }
 0x10b   : > { %1596 = vmatpush.xpose.msk.msrb.mxu0 %vm524_vm0, %v1054_v12  ;;  %v1655_v12 = vpack.i.bf16 %v2051_v23, %v2047_v22 }
 0x10f   : > { %1597 = vmatpush.xpose.msk.msrb.mxu0 %vm524_vm0, %v1052_v44 }
 0x112   : > { %851 = vrot.lane.b32.xlu1 %v2002_v17, %s1832_s19 }
 0x11a   : > { %853 = vrot.lane.b32.xlu1 %v1996_v16, %s1832_s19 }
 0x144   : > { %v607_v13 = vpop.xlane.xlu1 %606 }
 0x145   : > { %v610_v45 = vsub.f32 %v604_v2, %v607_v13 }
 0x147   : > { %v612_v46 = vmul.f32 1.442695, %v610_v45 }
 0x149   : > { %1768 = vpow2.f32 %v612_v46 }
 0x14c   : > { %v609_v47 = vpop.xlane.xlu2 %608 }
 0x14d   : > { %v611_v48 = vsub.f32 %v605_v9, %v609_v47 }
 0x14f   : > { %v1769_v49 = vpop.eup %1768  ;;  %v614_v50 = vmul.f32 1.442695, %v611_v48 }
 0x150   : > { %616 = vadd.xlane.f32.xlu2 %v1769_v49 }
 0x151   : > { %1770 = vpow2.f32 %v614_v50 }
 0x154   : > { %v858_v54 = vpop.permute.xlu2 %857 }
 0x157   : > { %v1771_v14 = vpop.eup %1770 }
 0x158   : > { %618 = vadd.xlane.f32.xlu0 %v1771_v14 }
 0x15c   : > { %v862_v51 = vpop.permute.xlu1 %861 }
 0x15d   : > { %1580 = vmatpush.xpose.msk.msrb.mxu1 %vm524_vm0, %v862_v51 }
 0x164   : > { %v1050_v52 = vpop.permute.xlu1 %1049 }
 0x165   : > { %1598 = vmatpush.xpose.msk.msrb.mxu0 %vm524_vm0, %v1050_v52 }
 0x168   : > { %1043 = vrot.lane.b32.xlu2 %v1993_v15, %s1831_s18 }
 0x16c   : > { %855 = vrot.lane.b32.xlu0 %v1993_v15, %s1832_s19  ;;  %v860_v53 = vpop.permute.xlu1 %859 }
 0x16d   : > { %1581 = vmatpush.xpose.msk.msrb.mxu1 %vm524_vm0, %v860_v53 }
 0x170   : > { %1039 = vrot.lane.b32.xlu2 %v2002_v17, %s1831_s18 }
 0x171   : > { %1582 = vmatpush.xpose.msk.msrb.mxu1 %vm524_vm0, %v858_v54 }
 0x174   : > { %v1048_v55 = vpop.permute.xlu1 %1047 }
 0x175   : > { %1599 = vmatpush.xpose.msk.msrb.mxu0 %vm524_vm0, %v1048_v55 }
 0x178   : > { %1041 = vrot.lane.b32.xlu2 %v1996_v16, %s1831_s18  ;;  %v1675_v16 = vpack.i.bf16 %v2031_v19, %v2028_v18  ;;  %v2221_v18 = vpack.i.bf16 %v2092_v33, %v2088_v32 }
 0x17c   : > { %v1046_v17 = vpop.permute.xlu1 %1045 }
 0x17d   : > { %v736_v56 = vpop.f32.mrf.mxu2  ;;  %1600 = vmatpush.xpose.msk.msrb.mxu0 %vm524_vm0, %v1046_v17 }
 0x17e   : > { %v742_v59 = vmul.f32 0.17677669, %v736_v56 }
 0x180   : > { %v744_v61 = vadd.f32 %v742_v59, %v2135_v60 }
 0x184   : > { %v852_v32 = vpop.permute.xlu1 %851 }
 0x185   : > { %v739_v57 = vpop.f32.mrf.mxu2 }
 0x186   : > { %v743_v58 = vmul.f32 0.17677669, %v739_v57 }
 0x188   : > { %v2193_v15 = vadd.f32 %v743_v58, %v2143_v5 }
 0x18a   : > { %748 = vmax.xlane.f32.xlu1 %v2193_v15 }
 0x18c   : > { %v854_v3 = vpop.permute.xlu1 %853 }
 0x196   : > { %746 = vmax.xlane.f32.xlu0 %v744_v61 }
 0x1a3   : > { %1651 = vrot.lane.b32.xlu1 %v2199_v62, %s1830_s17 }
 0x1ab   : > { %1676 = vrot.lane.b32.xlu1 %v1675_v16, %s1831_s18 }
 0x1b3   : > { %1731 = vrot.lane.b32.xlu1 %v2209_v63, %s1831_s18 }
 0x1bb   : > { %1741 = vrot.lane.b32.xlu1 %v2215_v20, %s1831_s18 }
 0x1c3   : > { %v617_v21 = vpop.xlane.xlu2 %616  ;;  %1746 = vrot.lane.b32.xlu1 %v2221_v18, %s1832_s19 }
 0x1c4   : > { %1772 = vrcp.f32 %v617_v21 }
 0x1ca   : > { %v1773_v19 = vpop.eup %1772 }
 0x1cb   : > { %v619_v0 = vpop.xlane.xlu0 %618  ;;  %v1044_v26 = vpop.permute.xlu2 %1043  ;;  %v622_v27 = vmul.f32 %v1773_v19, %v1769_v49 }
 0x1cc   : > { %1774 = vrcp.f32 %v619_v0  ;;  %1601 = vmatpush.xpose.msk.msrb.mxu0 %vm524_vm0, %v1044_v26 }
 0x1cd   : > { %640 = vmatmul.f32.vlgmr.msra.gmra.mxu1 %v622_v27 }
 0x1d2   : > { %v1775_v29 = vpop.eup %1774 }
 0x1d3   : > { %v1040_v30 = vpop.permute.xlu2 %1039  ;;  %v623_v1 = vmul.f32 %v1775_v29, %v1771_v14 }
 0x1d4   : > { %1602 = vmatmul.msk.f32.vlgmr.msrb.gmra.mxu0 %vm524_vm0, %v1040_v30 }
 0x1d5   : > { %643 = vmatmul.f32.gmra.mxu1 %v623_v1 }
 0x1db   : > { %v1042_v2 = vpop.permute.xlu2 %1041 }
 0x1dc   : > { %1603 = vmatmul.msk.f32.gmra.mxu0 %vm524_vm0, %v1042_v2 }
 0x1de   : > { %v856_v33 = vpop.permute.xlu0 %855 }
 0x1df   : > { %1583 = vmatpush.xpose.msk.msrb.mxu1 %vm524_vm0, %v856_v33 }
 0x1e2   : > { %1584 = vmatmul.msk.f32.vlgmr.msrb.gmra.mxu1 %vm524_vm0, %v852_v32 }
 0x1ea   : > { %1585 = vmatmul.msk.f32.gmra.mxu1 %vm524_vm0, %v854_v3 }
 0x1fd   : > { %v749_v22 = vpop.xlane.xlu1 %748 }
 0x1fe   : > { %v751_v46 = vsub.f32 %v2193_v15, %v749_v22 }
 0x200   : > { %v754_v49 = vmul.f32 1.442695, %v751_v46 }
 0x209   : > { %v747_v4 = vpop.xlane.xlu0 %746 }
 0x20a   : > { %v750_v6 = vsub.f32 %v744_v61, %v747_v4 }
 0x20c   : > { %v752_v7 = vmul.f32 1.442695, %v750_v6 }
 0x20e   : > { %1776 = vpow2.f32 %v752_v7 }
 0x214   : > { %v2231_v8 = vpop.eup %1776 }
 0x215   : > { %756 = vadd.xlane.f32.xlu1 %v2231_v8  ;;  %v1652_v23 = vpop.permute.xlu1 %1651 }
 0x216   : > { %v1653_v15 = vunpack.i.l.bf16 %v1652_v23  ;;  %v1654_v17 = vunpack.i.h.bf16 %v1652_v23 }
 0x21d   : > { %v1677_v25 = vpop.permute.xlu1 %1676 }
 0x21e   : > { %v1678_v48 = vunpack.i.l.bf16 %v1677_v25  ;;  %v1679_v50 = vunpack.i.h.bf16 %v1677_v25 }
 0x220   : > { %1204 = vmatpush.msrb.mxu2 %v1678_v48 }
 0x222   : > { %1205 = vmatpush.msrb.mxu2 %v1679_v50 }
 0x225   : > { %v2278_v35 = vpop.permute.xlu1 %1731 }
 0x22d   : > { %v2280_v36 = vpop.permute.xlu1 %1741 }
 0x235   : > { %v2282_v45 = vpop.permute.xlu1 %1746 }
 0x24a   : > { %v2234_v9 = vpop.f32.mrf.mxu1 }
 0x251   : > { %v1128_v10 = vpop.f32.mrf.mxu0 }
 0x252   : > { %v1134_v11 = vmul.f32 0.17677669, %v1128_v10  ;;  %v2237_v31 = vpop.f32.mrf.mxu1 }
 0x254   : > { %v1136_v28 = vadd.f32 %v1134_v11, %v2135_v60 }
 0x256   : > { %1138 = vmax.xlane.f32.xlu0 %v1136_v28 }
 0x259   : > { %v1131_v34 = vpop.f32.mrf.mxu0 }
 0x25a   : > { %v1135_v37 = vmul.f32 0.17677669, %v1131_v34 }
 0x25c   : > { %v2240_v38 = vadd.f32 %v1135_v37, %v2143_v5 }
 0x25e   : > { %1140 = vmax.xlane.f32.xlu2 %v2240_v38 }
 0x25f   : > { %v940_v39 = vpop.f32.mrf.mxu1 }
 0x260   : > { %v946_v55 = vmul.f32 0.17677669, %v940_v39 }
 0x267   : > { %v943_v40 = vpop.f32.mrf.mxu1 }
 0x268   : > { %v947_v41 = vmul.f32 0.17677669, %v943_v40 }
 0x26a   : > { %1646 = vrot.lane.b32.xlu0 %v1675_v16, %s1830_s17  ;;  %v949_v42 = vadd.f32 %v947_v41, %v2143_v5 }
 0x26c   : > { %952 = vmax.xlane.f32.xlu1 %v949_v42 }
 0x272   : > { %1661 = vrot.lane.b32.xlu0 %v1660_v43, %s1830_s17 }
 0x276   : > { %1656 = vrot.lane.b32.xlu2 %v1655_v12, %s1830_s17 }
 0x27a   : > { %1671 = vrot.lane.b32.xlu0 %v1675_v16, %s1832_s19 }
 0x27e   : > { %1666 = vrot.lane.b32.xlu2 %v2209_v63, %s1830_s17 }
 0x282   : > { %1686 = vrot.lane.b32.xlu0 %v2199_v62, %s1832_s19 }
 0x285   : > { %1756 = vrot.lane.b32.xlu1 %v2262_v24, %s1832_s19 }
 0x286   : > { %1681 = vrot.lane.b32.xlu2 %v2215_v20, %s1830_s17 }
 0x288   : > { %v757_v51 = vpop.xlane.xlu1 %756 }
 0x28a   : > { %1696 = vrot.lane.b32.xlu0 %v2221_v18, %s1830_s17 }
 0x28e   : > { %1691 = vrot.lane.b32.xlu2 %v2199_v62, %s1831_s18  ;;  %v2294_v62 = vadd.f32 %v946_v55, %v2135_v60  ;;  %v1743_v55 = vunpack.i.l.bf16 %v2280_v36 }
 0x292   : > { %1706 = vrot.lane.b32.xlu0 %v1655_v12, %s1831_s18 }
 0x296   : > { %1701 = vrot.lane.b32.xlu2 %v1655_v12, %s1832_s19 }
 0x29a   : > { %1716 = vrot.lane.b32.xlu0 %v1660_v43, %s1832_s19 }
 0x29e   : > { %1711 = vrot.lane.b32.xlu2 %v2262_v24, %s1830_s17  ;;  %s482_s17 = scalar_lea.vmem %s2376_s9, %s1983_s20 }
 0x2a2   : > { %1721 = vrot.lane.b32.xlu0 %v1660_v43, %s1831_s18 }
 0x2aa   : > { %1726 = vrot.lane.b32.xlu0 %v2209_v63, %s1832_s19 }
 0x2b2   : > { %1736 = vrot.lane.b32.xlu0 %v2215_v20, %s1832_s19 }
 0x2c9   : > { %v1139_v5 = vpop.xlane.xlu0 %1138 }
 0x2ca   : > { %v1142_v44 = vsub.f32 %v1136_v28, %v1139_v5 }
 0x2cc   : > { %v1144_v13 = vmul.f32 1.442695, %v1142_v44 }
 0x2ce   : > { %1778 = vpow2.f32 %v1144_v13 }
 0x2cf   : > { %1780 = vpow2.f32 %v754_v49 }
 0x2d1   : > { %v2285_v47 = vpop.xlane.xlu2 %1140 }
 0x2d2   : > { %v1143_v50 = vsub.f32 %v2240_v38, %v2285_v47 }
 0x2d4   : > { %v2287_v14 = vpop.eup %1778 }
 0x2d5   : > { %1148 = vadd.xlane.f32.xlu2 %v2287_v14  ;;  %v2290_v53 = vpop.eup %1780 }
 0x2d9   : > { %v1657_v52 = vpop.permute.xlu2 %1656 }
 0x2da   : > { %v1658_v20 = vunpack.i.l.bf16 %v1657_v52  ;;  %v1659_v21 = vunpack.i.h.bf16 %v1657_v52  ;;  %v1734_v52 = vunpack.i.h.bf16 %v2278_v35 }
 0x2dc   : > { %v1647_v54 = vpop.permute.xlu0 %1646 }
 0x2dd   : > { %758 = vadd.xlane.f32.xlu2 %v2290_v53  ;;  %v1648_v56 = vunpack.i.l.bf16 %v1647_v54  ;;  %v1649_v57 = vunpack.i.h.bf16 %v1647_v54  ;;  %v1146_v54 = vmul.f32 1.442695, %v1143_v50 }
 0x2df   : > { %v953_v58 = vpop.xlane.xlu1 %952  ;;  %828 = vmatpush.msra.mxu3 %v1648_v56 }
 0x2e0   : > { %v955_v59 = vsub.f32 %v949_v42, %v953_v58 }
 0x2e1   : > { %829 = vmatpush.msra.mxu3 %v1649_v57  ;;  %v1667_v61 = vpop.permute.xlu2 %1666 }
 0x2e2   : > { %v958_v16 = vmul.f32 1.442695, %v955_v59  ;;  %v1668_v29 = vunpack.i.l.bf16 %v1667_v61  ;;  %v1669_v30 = vunpack.i.h.bf16 %v1667_v61 }
 0x2e3   : > { %830 = vmatpush.msra.mxu3 %v1653_v15  ;;  %v1744_v15 = vunpack.i.h.bf16 %v2280_v36 }
 0x2e4   : > { %1782 = vpow2.f32 %v958_v16  ;;  %v1662_v63 = vpop.permute.xlu0 %1661 }
 0x2e5   : > { %831 = vmatpush.msra.mxu3 %v1654_v17  ;;  %950 = vmax.xlane.f32.xlu2 %v2294_v62  ;;  %v1663_v19 = vunpack.i.l.bf16 %v1662_v63  ;;  %v1664_v26 = vunpack.i.h.bf16 %v1662_v63  ;;  %1784 = vrcp.f32 %v757_v51  ;;  %v1733_v51 = vunpack.i.l.bf16 %v2278_v35 }
 0x2e6   : > { %1786 = vpow2.f32 %v1146_v54  ;;  %v1748_v35 = vunpack.i.l.bf16 %v2282_v45  ;;  %v1749_v17 = vunpack.i.h.bf16 %v2282_v45 }
 0x2e7   : > { %832 = vmatpush.msra.mxu3 %v1658_v20 }
 0x2e9   : > { %v1682_v0 = vpop.permute.xlu2 %1681  ;;  %833 = vmatpush.msra.mxu3 %v1659_v21 }
 0x2ea   : > { %v2297_v27 = vpop.eup %1782  ;;  %v1683_v2 = vunpack.i.l.bf16 %v1682_v0  ;;  %v1684_v3 = vunpack.i.h.bf16 %v1682_v0 }
 0x2eb   : > { %962 = vadd.xlane.f32.xlu1 %v2297_v27  ;;  %834 = vmatpush.msra.mxu3 %v1663_v19  ;;  %v1785_v34 = vpop.eup %1784 }
 0x2ec   : > { %v1672_v60 = vpop.permute.xlu0 %1671  ;;  %v762_v42 = vmul.f32 %v1785_v34, %v2231_v8  ;;  %v1787_v47 = vpop.eup %1786 }
 0x2ed   : > { %835 = vmatpush.msra.mxu3 %v1664_v26  ;;  %v1673_v40 = vunpack.i.l.bf16 %v1672_v60  ;;  %v1674_v22 = vunpack.i.h.bf16 %v1672_v60 }
 0x2ef   : > { %836 = vmatpush.msra.mxu3 %v1668_v29 }
 0x2f1   : > { %v1692_v1 = vpop.permute.xlu2 %1691  ;;  %837 = vmatpush.msra.mxu3 %v1669_v30 }
 0x2f2   : > { %v1693_v32 = vunpack.i.l.bf16 %v1692_v1  ;;  %v1694_v33 = vunpack.i.h.bf16 %v1692_v1 }
 0x2f3   : > { %838 = vmatpush.msra.mxu3 %v1683_v2 }
 0x2f4   : > { %v1687_v4 = vpop.permute.xlu0 %1686  ;;  %1206 = vmatpush.msrb.mxu2 %v1693_v32 }
 0x2f5   : > { %839 = vmatpush.msra.mxu3 %v1684_v3  ;;  %v1689_v23 = vunpack.i.h.bf16 %v1687_v4 }
 0x2f6   : > { %1207 = vmatpush.msrb.mxu2 %v1694_v33 }
 0x2f7   : > { %v1757_v45 = vpop.permute.xlu1 %1756 }
 0x2f8   : > { %v1758_v29 = vunpack.i.l.bf16 %v1757_v45  ;;  %v1759_v30 = vunpack.i.h.bf16 %v1757_v45 }
 0x2f9   : > { %v1702_v6 = vpop.permute.xlu2 %1701 }
 0x2fa   : > { %v1703_v5 = vunpack.i.l.bf16 %v1702_v6  ;;  %v1704_v44 = vunpack.i.h.bf16 %v1702_v6 }
 0x2fc   : > { %v1697_v7 = vpop.permute.xlu0 %1696 }
 0x2fd   : > { %1751 = vrot.lane.b32.xlu2 %v2221_v18, %s1831_s18  ;;  %v1698_v10 = vunpack.i.l.bf16 %v1697_v7  ;;  %v1699_v11 = vunpack.i.h.bf16 %v1697_v7  ;;  %v1688_v18 = vunpack.i.l.bf16 %v1687_v4 }
 0x2ff   : > { %840 = vmatpush.msra.mxu3 %v1698_v10 }
 0x301   : > { %v1712_v28 = vpop.permute.xlu2 %1711  ;;  %841 = vmatpush.msra.mxu3 %v1699_v11 }
 0x302   : > { %v1713_v37 = vunpack.i.l.bf16 %v1712_v28  ;;  %v1714_v39 = vunpack.i.h.bf16 %v1712_v28 }
 0x304   : > { %842 = vmatpush.msra.mxu3 %v1713_v37  ;;  %v1707_v41 = vpop.permute.xlu0 %1706 }
 0x305   : > { %v1708_v43 = vunpack.i.l.bf16 %v1707_v41  ;;  %v1709_v12 = vunpack.i.h.bf16 %v1707_v41 }
 0x306   : > { %843 = vmatpush.msra.mxu3 %v1714_v39 }
 0x307   : > { %844 = vmatmul.f32.vlgmr.msra.gmra.mxu3 %v762_v42  ;;  %1208 = vmatpush.msrb.mxu2 %v1708_v43 }
 0x308   : > { %1016 = vmatpush.msrb.mxu3 %v1673_v40 }
 0x309   : > { %1209 = vmatpush.msrb.mxu2 %v1709_v12  ;;  %v1262_v12 = vld [vmem:[%s2372_s5 + $0x18] sm:$0xff] }
 0x30a   : > { %1017 = vmatpush.msrb.mxu3 %v1674_v22  ;;  %v1260_v22 = vld [vmem:[%s2372_s5 + $0x8] sm:$0xff] }
 0x30c   : > { %1018 = vmatpush.msrb.mxu3 %v1688_v18  ;;  %v1717_v25 = vpop.permute.xlu0 %1716  ;;  %v1259_v18 = vld [vmem:[%s2372_s5] sm:$0xff] }
 0x30d   : > { %v1718_v13 = vunpack.i.l.bf16 %v1717_v25  ;;  %v1719_v8 = vunpack.i.h.bf16 %v1717_v25 }
 0x30e   : > { %1019 = vmatpush.msrb.mxu3 %v1689_v23 }
 0x310   : > { %1020 = vmatpush.msrb.mxu3 %v1703_v5 }
 0x312   : > { %1021 = vmatpush.msrb.mxu3 %v1704_v44 }
 0x314   : > { %v1722_v46 = vpop.permute.xlu0 %1721  ;;  %1022 = vmatpush.msrb.mxu3 %v1718_v13 }
 0x315   : > { %v1723_v48 = vunpack.i.l.bf16 %v1722_v46  ;;  %v1724_v49 = vunpack.i.h.bf16 %v1722_v46 }
 0x316   : > { %1023 = vmatpush.msrb.mxu3 %v1719_v8 }
 0x317   : > { %1210 = vmatpush.msrb.mxu2 %v1723_v48 }
 0x319   : > { %1211 = vmatpush.msrb.mxu2 %v1724_v49 }
 0x31b   : > { %1212 = vmatpush.msrb.mxu2 %v1733_v51 }
 0x31c   : > { %v1727_v56 = vpop.permute.xlu0 %1726 }
 0x31d   : > { %1213 = vmatpush.msrb.mxu2 %v1734_v52  ;;  %v1728_v57 = vunpack.i.l.bf16 %v1727_v56  ;;  %v1729_v58 = vunpack.i.h.bf16 %v1727_v56 }
 0x31f   : > { %1024 = vmatpush.msrb.mxu3 %v1728_v57  ;;  %1214 = vmatpush.msrb.mxu2 %v1743_v55  ;;  %v1297_v55 = vld [vmem:[%s472_s28] sm:$0xff] }
 0x321   : > { %1025 = vmatpush.msrb.mxu3 %v1729_v58  ;;  %1215 = vmatpush.msrb.mxu2 %v1744_v15  ;;  %v1298_v15 = vld [vmem:[%s472_s28 + $0x8] sm:$0xff] }
 0x324   : > { %v1737_v38 = vpop.permute.xlu0 %1736 }
 0x325   : > { %v1738_v59 = vunpack.i.l.bf16 %v1737_v38  ;;  %v1739_v61 = vunpack.i.h.bf16 %v1737_v38 }
 0x326   : > { %1150 = vadd.xlane.f32.xlu2 %v1787_v47 }
 0x327   : > { %1026 = vmatpush.msrb.mxu3 %v1738_v59 }
 0x329   : > { %1027 = vmatpush.msrb.mxu3 %v1739_v61  ;;  %v1836_v61 = vmov 32.0  }
 0x32b   : > { %1028 = vmatpush.msrb.mxu3 %v1748_v35 }
 0x32d   : > { %1029 = vmatpush.msrb.mxu3 %v1749_v17 }
 0x32f   : > { %1030 = vmatpush.msrb.mxu3 %v1758_v29 }
 0x331   : > { %1031 = vmatpush.msrb.mxu3 %v1759_v30 }
 0x333   : > { %1286 = vmatpush.msra.mxu3 %v1262_v12 }
 0x348   : > { %v1149_v16 = vpop.xlane.xlu2 %1148 }
 0x350   : > { %v759_v36 = vpop.xlane.xlu2 %758 }
 0x351   : > { %1788 = vrcp.f32 %v759_v36 }
 0x357   : > { %v1789_v63 = vpop.eup %1788 }
 0x358   : > { %v951_v20 = vpop.xlane.xlu2 %950  ;;  %v763_v21 = vmul.f32 %v1789_v63, %v2290_v53 }
 0x359   : > { %v954_v19 = vsub.f32 %v2294_v62, %v951_v20 }
 0x35a   : > { %847 = vmatmul.f32.gmra.mxu3 %v763_v21 }
 0x35b   : > { %v956_v0 = vmul.f32 1.442695, %v954_v19 }
 0x35d   : > { %1790 = vpow2.f32 %v956_v0 }
 0x35e   : > { %v963_v32 = vpop.xlane.xlu1 %962 }
 0x360   : > { %v1752_v60 = vpop.permute.xlu2 %1751 }
 0x361   : > { %v1753_v1 = vunpack.i.l.bf16 %v1752_v60  ;;  %v1754_v2 = vunpack.i.h.bf16 %v1752_v60 }
 0x363   : > { %v1791_v26 = vpop.eup %1790  ;;  %1216 = vmatpush.msrb.mxu2 %v1753_v1 }
 0x364   : > { %960 = vadd.xlane.f32.xlu0 %v1791_v26 }
 0x365   : > { %1217 = vmatpush.msrb.mxu2 %v1754_v2 }
 0x378   : > { %1761 = vrot.lane.b32.xlu0 %v2262_v24, %s1831_s18 }
 0x38a   : > { %v845_v53 = vpop.f32.mrf.mxu3 }
 0x38b   : > { %1229 = vrot.lane.b32.xlu0 %v845_v53, %s1833_s30 }
 0x399   : > { %v1151_v7 = vpop.xlane.xlu2 %1150 }
 0x3d7   : > { %v961_v62 = vpop.xlane.xlu0 %960 }
 0x3d8   : > { %1792 = vrcp.f32 %v961_v62 }
 0x3d9   : > { %1794 = vrcp.f32 %v963_v32 }
 0x3da   : > { %1796 = vrcp.f32 %v1149_v16 }
 0x3db   : > { %1798 = vrcp.f32 %v1151_v7 }
 0x3dc   : > { %1800 = vrcp.f32 %v1836_v61 }
 0x3dd   : > { %v848_v33 = vpop.f32.mrf.mxu3 }
 0x3de   : > { %v1793_v3 = vpop.eup %1792  ;;  %1231 = vrot.lane.b32.xlu0 %v848_v33, %s1833_s30 }
 0x3df   : > { %v966_v24 = vmul.f32 %v1793_v3, %v1791_v26  ;;  %v1795_v4 = vpop.eup %1794 }
 0x3e0   : > { %v967_v6 = vmul.f32 %v1795_v4, %v2297_v27  ;;  %v1797_v11 = vpop.eup %1796 }
 0x3e1   : > { %1032 = vmatmul.f32.vlgmr.msrb.gmra.mxu3 %v966_v24  ;;  %v1154_v37 = vmul.f32 %v1797_v11, %v2287_v14  ;;  %v1799_v39 = vpop.eup %1798  ;;  %v1261_v14 = vld [vmem:[%s2372_s5 + $0x10] sm:$0xff] }
 0x3e2   : > { %v1155_v40 = vmul.f32 %v1799_v39, %v1787_v47  ;;  %1287 = vmatpush.msra.mxu3 %v1261_v14  ;;  %v1801_v35 = vpop.eup %1800  ;;  %v1766_v39 = vld [vmem:[%s2374_s7] ss:$0 sm:$0xff] }
 0x3e3   : > { %v1308_v17 = vmul.f32 32.0, %v1801_v35  ;;  %vm1312_vm4 = vweird.f32 %v1801_v35 }
 0x3e4   : > { %1288 = vmatpush.msra.mxu3 %v1260_v22 }
 0x3e5   : > { %v1309_v16 = vsub.f32 1.0, %v1308_v17 }
 0x3e6   : > { %1289 = vmatpush.msra.mxu3 %v1259_v18 }
 0x3e7   : > { %v1310_v36 = vmul.f32 %v1801_v35, %v1309_v16 }
 0x3e9   : > { %1035 = vmatmul.f32.gmra.mxu3 %v967_v6  ;;  %v1311_v63 = vadd.f32 %v1801_v35, %v1310_v36 }
 0x3ea   : > { %v1762_v10 = vpop.permute.xlu0 %1761 }
 0x3eb   : > { %v1763_v28 = vunpack.i.l.bf16 %v1762_v10  ;;  %v1764_v34 = vunpack.i.h.bf16 %v1762_v10  ;;  %v1313_v20 = vsel %vm1312_vm4, %v1801_v35, %v1311_v63 }
 0x3ed   : > { %1218 = vmatpush.msrb.mxu2 %v1763_v28 }
 0x3ef   : > { %1219 = vmatpush.msrb.mxu2 %v1764_v34 }
 0x3f0   : > { %1220 = vmatmul.f32.vlgmr.msrb.gmra.mxu2 %v1154_v37 }
 0x3f8   : > { %1223 = vmatmul.f32.gmra.mxu2 %v1155_v40 }
 0x3fd   : > { %v1230_v23 = vpop.permute.xlu0 %1229 }
 0x3fe   : > { %v1251_v44 = vsel %vm524_vm0, %v2234_v9, %v1230_v23  ;;  %v1765_v9 = vld [vmem:[%s2373_s6] ss:$0 sm:$0xff] }
 0x450   : > { %v1232_v25 = vpop.permute.xlu0 %1231 }
 0x451   : > { %v1252_v49 = vsel %vm524_vm0, %v2237_v31, %v1232_v25 }
 0x464   : > { %v1033_v41 = vpop.f32.mrf.mxu3 }
 0x465   : > { %1237 = vrot.lane.b32.xlu0 %v1033_v41, %s1834_s13 }
 0x46c   : > { %v1036_v42 = vpop.f32.mrf.mxu3 }
 0x46d   : > { %1239 = vrot.lane.b32.xlu0 %v1036_v42, %s1834_s13  ;;  %v1767_v42 = vld [vmem:[%s2375_s8] ss:$0 sm:$0xff] }
 0x473   : > { %v1221_v27 = vpop.f32.mrf.mxu2 }
 0x474   : > { %1245 = vrot.lane.b32.xlu1 %v1221_v27, %s1835_s14 }
 0x47b   : > { %v1224_v43 = vpop.f32.mrf.mxu2 }
 0x47c   : > { %1247 = vrot.lane.b32.xlu2 %v1224_v43, %s1835_s14 }
 0x4d6   : > { %v1248_v51 = vpop.permute.xlu2 %1247 }
 0x4d7   : > { %v1238_v5 = vpop.permute.xlu0 %1237 }
 0x4d8   : > { %v1254_v13 = vsel %vm1253_vm1, %v1251_v44, %v1238_v5 }
 0x4df   : > { %v1240_v48 = vpop.permute.xlu0 %1239 }
 0x4e0   : > { %v1255_v50 = vsel %vm1253_vm1, %v1252_v49, %v1240_v48 }
 0x4e1   : > { %v1258_v52 = vsel %vm1256_vm3, %v1255_v50, %v1248_v51 }
 0x4e6   : > { %v1246_v8 = vpop.permute.xlu1 %1245 }
 0x4e7   : > { %v1257_v46 = vsel %vm1256_vm3, %v1254_v13, %v1246_v8 }
 0x4e8   : > { %1604 = vmatmul.msk.f32.vlgmr.msra.gmra.mxu3 %vm1267_vm2, %v1257_v46 }
 0x4f0   : > { %1605 = vmatmul.msk.f32.gmra.mxu3 %vm1267_vm2, %v1258_v52 }
 0x56b   : > { %v1291_v54 = vpop.f32.mrf.mxu3 }
 0x56c   : > { %v1292_v56 = vadd.f32 %v1765_v9, %v1291_v54 }
 0x56e   : > { %v1299_v57 = vadd.f32 %v1297_v55, %v1292_v56 }
 0x570   : > { %v1301_v58 = vsel %vm1267_vm2, %v1299_v57, 0.0 }
 0x571   : > { %1302 = vadd.xlane.f32.xlu0 %v1301_v58 }
 0x573   : > { %v1294_v31 = vpop.f32.mrf.mxu3 }
 0x574   : > { %v1295_v38 = vadd.f32 %v1765_v9, %v1294_v31 }
 0x576   : > { %v1300_v47 = vadd.f32 %v1298_v15, %v1295_v38 }
 0x578   : > { %v1304_v59 = vsel %vm1267_vm2, %v1300_v47, 0.0 }
 0x579   : > { %1305 = vadd.xlane.f32.xlu1 %v1304_v59 }
 0x5e4   : > { %v1303_v21 = vpop.xlane.xlu0 %1302 }
 0x5e5   : > { %v1314_v19 = vmul.f32 %v1313_v20, %v1303_v21 }
 0x5e7   : > { %v1316_v0 = vsub.f32 %v1299_v57, %v1314_v19 }
 0x5e9   : > { %v1318_v26 = vmul.f32 %v1316_v0, %v1316_v0 }
 0x5eb   : > { %v1320_v45 = vsel %vm1267_vm2, %v1318_v26, 0.0 }
 0x5ec   : > { %v1306_v60 = vpop.xlane.xlu1 %1305  ;;  %1321 = vadd.xlane.f32.xlu2 %v1320_v45 }
 0x5ed   : > { %v1315_v29 = vmul.f32 %v1313_v20, %v1306_v60 }
 0x5ef   : > { %v1317_v30 = vsub.f32 %v1300_v47, %v1315_v29 }
 0x5f1   : > { %v1319_v1 = vmul.f32 %v1317_v30, %v1317_v30 }
 0x5f3   : > { %v1323_v2 = vsel %vm1267_vm2, %v1319_v1, 0.0 }
 0x5f4   : > { %1324 = vadd.xlane.f32.xlu0 %v1323_v2 }
 0x65f   : > { %v1322_v53 = vpop.xlane.xlu2 %1321 }
 0x660   : > { %v1326_v62 = vmul.f32 %v1322_v53, %v1313_v20 }
 0x662   : > { %v1328_v32 = vadd.f32 1e-05, %v1326_v62 }
 0x664   : > { %1802 = vrsqrt.f32 %v1328_v32  ;;  %vm1336_vm6 = vweird.f32 %v1328_v32 }
 0x667   : > { %v1325_v33 = vpop.xlane.xlu0 %1324 }
 0x668   : > { %v1327_v3 = vmul.f32 %v1325_v33, %v1313_v20 }
 0x66a   : > { %v1803_v24 = vpop.eup %1802  ;;  %v1329_v4 = vadd.f32 1e-05, %v1327_v3 }
 0x66b   : > { %v1331_v6 = vmul.f32 %v1803_v24, %v1328_v32  ;;  %vm1337_vm5 = vweird.f32 %v1803_v24 }
 0x66c   : > { %1804 = vrsqrt.f32 %v1329_v4  ;;  %vm1338_vm7 = vmor %vm1336_vm6, %vm1337_vm5  ;;  %vm1346_vm9 = vweird.f32 %v1329_v4 }
 0x66d   : > { %v1332_v7 = vmul.f32 %v1803_v24, %v1331_v6 }
 0x66f   : > { %v1333_v10 = vmul.f32 0.5, %v1332_v7 }
 0x671   : > { %v1334_v11 = vsub.f32 1.5, %v1333_v10 }
 0x672   : > { %v1805_v28 = vpop.eup %1804 }
 0x673   : > { %v1335_v34 = vmul.f32 %v1803_v24, %v1334_v11  ;;  %v1341_v37 = vmul.f32 %v1805_v28, %v1329_v4  ;;  %vm1347_vm8 = vweird.f32 %v1805_v28 }
 0x674   : > { %vm1348_vm10 = vmor %vm1346_vm9, %vm1347_vm8 }
 0x675   : > { %v1339_v40 = vsel %vm1338_vm7, %v1803_v24, %v1335_v34  ;;  %v1342_v41 = vmul.f32 %v1805_v28, %v1341_v37 }
 0x676   : > { %v1350_v27 = vmul.f32 %v1339_v40, %v1316_v0 }
 0x677   : > { %v1343_v43 = vmul.f32 0.5, %v1342_v41 }
 0x678   : > { %v1356_v12 = vmul.f32 %v1766_v39, %v1350_v27 }
 0x679   : > { %v1344_v14 = vsub.f32 1.5, %v1343_v43 }
 0x67a   : > { %v1362_v22 = vadd.f32 %v1767_v42, %v1356_v12 }
 0x67b   : > { %v1345_v18 = vmul.f32 %v1805_v28, %v1344_v14 }
 0x67c   : > { %1364 = vst.msk [vmem:[%s482_s17] sm:$0xff] %vm1267_vm2, %v1362_v22 }
 0x67d   : > { %v1349_v23 = vsel %vm1348_vm10, %v1805_v28, %v1345_v18 }
 0x67e   : > { %v1351_v25 = vmul.f32 %v1349_v23, %v1317_v30 }
 0x680   : > { %v1357_v5 = vmul.f32 %v1766_v39, %v1351_v25 }
 0x682   : > { %v1363_v44 = vadd.f32 %v1767_v42, %v1357_v5 }
 0x684   : > { %1365 = vst.msk [vmem:[%s482_s17 + $0x8] sm:$0xff] %vm1267_vm2, %v1363_v44 }
 0x685 PF: > { %s19_s11 = sadd.s32 1, %s1828_s11   ;;  %s2377_s30 = smov %s1824_s10 }
 0x686   : > { %p16_p5 = scmp.ge.s32.totalorder %s19_s11, 4   ;;  %s2378_s10 = smov %s2380_s12 }
 0x688   :  { %18 = sbr.rel (!%p16_p5) target bundleno = 2 (0x2), region = 98 }

</bundles_post_ra>
